<compile_context>
chip_gen: v7x
topology: tpu7x:2x2x1
jax: 0.10.0
libtpu: 0.0.40
codegen_flags: <defaults>
</compile_context>

<pallas_src>
import functools

import jax
import jax.numpy as jnp
import numpy as np
from jax.experimental import pallas as pl
from jax.experimental.pallas import tpu as pltpu


def _round_up(x, m):
    return (x + m - 1) // m * m


def _vmem_caps():
    """Per-generation (scoped VMEM limit to request, slab budget) in bytes."""
    cap = 64 * 1024 * 1024                # conservative default (= v7x physical)
    try:
        info = pltpu.get_tpu_info()
        cap = int(getattr(info, "vmem_capacity_bytes", cap))
    except Exception:
        pass
    limit = min(cap * 3 // 4, 100 * 1024 * 1024)   # ~48 MiB on v7x, ~96 MiB on v5e/v6e
    budget = limit - 4 * 1024 * 1024               # headroom for outputs / compiler scratch
    return int(limit), int(budget)


def _pick_config(N, D):
    """Choose (TM, Np, Dp, TK, k_tiles, vmem_limit) under the VMEM budget."""
    limit, budget = _vmem_caps()

    # Row/column tile: big tiles cut E^T HBM traffic (~1/TM), but keep >=2 row
    # tiles when possible so the 'parallel' axis can feed both v7x TensorCores.
    tm = 128
    for cand in (512, 256):
        if _round_up(N, cand) // cand >= 2:
            tm = cand
            break

    def fits(tm_, kblk):
        e_slab = 2 * 2 * tm_ * kblk        # double-buffered bf16 row slab
        et_slab = 2 * 2 * kblk * tm_       # double-buffered bf16 column slab
        acc = 4 * tm_ * tm_                # f32 similarity tile
        return e_slab + et_slab + acc + (2 << 20) <= budget

    dp_full = _round_up(D, 128)

    # Preferred: whole feature dim resident -> K collapses to one step and the
    # E row slab is fetched from HBM once per row tile (index constant over c).
    for tm_ in [t for t in (512, 256, 128) if t <= tm]:
        if fits(tm_, dp_full):
            return tm_, _round_up(N, tm_), dp_full, dp_full, 1, limit

    # Fallback for huge feature dims: stream K in fat chunks (the E row tile is
    # then re-fetched per column tile -- unavoidable once it exceeds VMEM).
    for tk in (4096, 2048, 1024, 512, 256, 128):
        if fits(128, tk):
            dp = _round_up(D, tk)
            return 128, _round_up(N, 128), dp, tk, dp // tk, limit

    dp = _round_up(D, 128)
    return 128, _round_up(N, 128), dp, 128, dp // 128, limit


def _focl_kernel(e_ref, et_ref, y_row_ref, y_col_ref, nsame_ref,
                 cl_ref,
                 acc_ref, m_ref, l_ref, col0_ref, fidx_ref,
                 *, n_real, half_tau, tm, tn, k_tiles):
    rt = pl.program_id(0)
    ct = pl.program_id(1)
    kt = pl.program_id(2)
    nct = pl.num_programs(1)
    BIG_IDX = jnp.int32(2 ** 30)

    # ---- reset per-row online stats at the start of every row tile -----------
    @pl.when(jnp.logical_and(ct == 0, kt == 0))
    def _():
        m_ref[...] = jnp.zeros_like(m_ref)
        l_ref[...] = jnp.zeros_like(l_ref)
        col0_ref[...] = jnp.zeros_like(col0_ref)
        fidx_ref[...] = jnp.full_like(fidx_ref, BIG_IDX)

    # ---- cosine-similarity tile: bf16 MXU matmul, f32 accumulation -----------
    prod = jnp.dot(e_ref[...], et_ref[...], preferred_element_type=jnp.float32)
    if k_tiles == 1:
        acc_ref[...] = prod                     # single fat K step (common case)
    else:
        @pl.when(kt == 0)
        def _():
            acc_ref[...] = prod

        @pl.when(kt != 0)
        def _():
            acc_ref[...] += prod

    # ---- K reduction done: fold this column tile into the online stats -------
    @pl.when(kt == k_tiles - 1)
    def _():
        # rows pre-normalized => acc is already the cosine; one FMA epilogue.
        scaled = acc_ref[...] * half_tau + half_tau      # (cos + 1) * 0.5 * tau
        acc_ref[...] = scaled            # keep the big temp in VMEM scratch

        row_g = rt * tm + jax.lax.broadcasted_iota(jnp.int32, (tm, tn), 0)
        col_g = ct * tn + jax.lax.broadcasted_iota(jnp.int32, (tm, tn), 1)
        eq = y_row_ref[...] == y_col_ref[...]            # (tm, tn)
        valid_col = col_g < n_real                       # mask padded columns

        # negatives: online logsumexp (mask folded into the exp argument)
        neg_arg = jnp.where(jnp.logical_and(jnp.logical_not(eq), valid_col),
                            scaled, -jnp.inf)
        m_new = jnp.maximum(m_ref[...], jnp.max(neg_arg, axis=1, keepdims=True))
        l_ref[...] = (l_ref[...] * jnp.exp(m_ref[...] - m_new)
                      + jnp.sum(jnp.exp(neg_arg - m_new), axis=1, keepdims=True))
        m_ref[...] = m_new

        # first positive = smallest global column index with the same label
        pos_mask = jnp.logical_and(jnp.logical_and(eq, row_g != col_g), valid_col)
        pos_idx = jnp.where(pos_mask, col_g, BIG_IDX)
        tile_fidx = jnp.min(pos_idx, axis=1, keepdims=True)          # (tm, 1)
        hit = jnp.logical_and(pos_mask, col_g == tile_fidx)
        tile_val = jnp.sum(jnp.where(hit, acc_ref[...], 0.0), axis=1,
                           keepdims=True)
        better = tile_fidx < fidx_ref[...]
        col0_ref[...] = jnp.where(better, tile_val, col0_ref[...])
        fidx_ref[...] = jnp.where(better, tile_fidx, fidx_ref[...])

        # ---- last column tile: emit the per-row CL term ----------------------
        @pl.when(ct == nct - 1)
        def _():
            rows = rt * tm + jax.lax.broadcasted_iota(jnp.int32, (tm, 1), 0)
            row_valid = rows < n_real
            # n_neg = N - n_same  =>  zero ("unused") columns = 2N-2-n_neg
            n_same = nsame_ref[...].astype(jnp.float32)               # (tm, 1)
            n_unused = jnp.float32(n_real - 2) + n_same
            col0 = col0_ref[...]              # stays 0 when no positive exists
            m_fin = jnp.maximum(m_ref[...], jnp.maximum(col0, 0.0))
            l_fin = (l_ref[...] * jnp.exp(m_ref[...] - m_fin)
                     + jnp.exp(col0 - m_fin)
                     + n_unused * jnp.exp(-m_fin))
            lse = m_fin + jnp.log(l_fin)
            cl_ref[...] = jnp.where(row_valid, lse - col0, 0.0)


def focl_pallas(layer_embeds, y_true, y_pred, tau, lambd=0.3, gamma=2.0):
    N = int(layer_embeds.shape[0])
    E = jnp.asarray(layer_embeds, jnp.float32).reshape(N, -1)
    D = int(E.shape[1])
    C = int(y_pred.shape[1])

    TM, Np, Dp, TK, k_tiles, vmem_limit = _pick_config(N, D)
    TN = TM

    y = jnp.asarray(y_true, jnp.int32).reshape(N)
    counts = jnp.bincount(y, length=C)                   # per-class histogram
    n_same = jnp.take(counts, y).astype(jnp.int32)       # (N,)

    # L2-normalize in f32 BEFORE the bf16 cast (accuracy + one-FMA epilogue).
    # NOTE: clamps each per-row norm; the PyTorch reference clamps the product
    # norm_i * norm_j at 1e-8 -- identical unless an embedding is ~zero.
    sq = jnp.sum(E * E, axis=1, keepdims=True)
    En = E * jax.lax.rsqrt(jnp.maximum(sq, jnp.float32(1e-16)))

    E_p = jnp.pad(En.astype(jnp.bfloat16), ((0, Np - N), (0, Dp - D)))
    ET_p = E_p.T                                # (Dp, Np): no in-kernel transpose
    y_row = jnp.pad(y.reshape(N, 1), ((0, Np - N), (0, 0)), constant_values=-1)
    y_col = y_row.reshape(1, Np)
    nsame_col = jnp.pad(n_same.reshape(N, 1), ((0, Np - N), (0, 0)),
                        constant_values=1)

    grid = (Np // TM, Np // TN, k_tiles)
    kernel = functools.partial(_focl_kernel, n_real=N,
                               half_tau=0.5 * float(tau),
                               tm=TM, tn=TN, k_tiles=k_tiles)

    cl_rows = pl.pallas_call(
        kernel,
        out_shape=jax.ShapeDtypeStruct((Np, 1), jnp.float32),
        grid_spec=pltpu.PrefetchScalarGridSpec(
            num_scalar_prefetch=0,
            grid=grid,
            in_specs=[
                # E rows: block index constant across c (and across k when
                # k_tiles==1) => the row slab is DMA'd once per row tile.
                pl.BlockSpec((TM, TK), lambda r, c, k: (r, k)),
                pl.BlockSpec((TK, TN), lambda r, c, k: (k, c)),   # E^T columns
                pl.BlockSpec((TM, 1), lambda r, c, k: (r, 0)),    # row labels
                pl.BlockSpec((1, TN), lambda r, c, k: (0, c)),    # column labels
                pl.BlockSpec((TM, 1), lambda r, c, k: (r, 0)),    # same-label counts
            ],
            out_specs=pl.BlockSpec((TM, 1), lambda r, c, k: (r, 0)),
            scratch_shapes=[
                pltpu.VMEM((TM, TN), jnp.float32),   # similarity tile / scaled
                pltpu.VMEM((TM, 1), jnp.float32),    # running max m
                pltpu.VMEM((TM, 1), jnp.float32),    # running sum l
                pltpu.VMEM((TM, 1), jnp.float32),    # first-positive value
                pltpu.VMEM((TM, 1), jnp.int32),      # first-positive index
            ]),
        compiler_params=pltpu.CompilerParams(
            dimension_semantics=("parallel", "arbitrary", "arbitrary"),
            vmem_limit_bytes=int(vmem_limit)),
    )(E_p, ET_p, y_row, y_col, nsame_col)

    cl = jnp.sum(cl_rows) / N

    # cross-entropy + focal + mixing: O(N*C) scalar work kept in plain JAX
    logits = jnp.asarray(y_pred, jnp.float32)
    lmax = jnp.max(logits, axis=1, keepdims=True)
    lse_c = (lmax + jnp.log(jnp.sum(jnp.exp(logits - lmax), axis=1,
                                    keepdims=True))).reshape(N)
    picked = jnp.take_along_axis(logits, y.reshape(N, 1), axis=1).reshape(N)
    ce = jnp.mean(lse_c - picked)
    pt = jnp.exp(-ce)
    focal = (1.0 - pt) ** gamma * ce
    return lambd * cl + (1.0 - lambd) * focal


def focl_reference(layer_embeds, y_true, y_pred, tau, lambd=0.3, gamma=2.0):
    """Literal numpy transcription of the PyTorch forward (for verification)."""
    E = np.asarray(layer_embeds, dtype=np.float64)
    E = E.reshape(E.shape[0], -1)
    y = np.asarray(y_true)
    P = np.asarray(y_pred, dtype=np.float64)
    N = E.shape[0]
    loss_temp = np.zeros((N, 2 * N - 1), dtype=np.float64)
    for i in range(N):
        indice = 1
        pos = True
        for j in range(N):
            if i == j:
                continue
            cs = E[i] @ E[j] / max(np.linalg.norm(E[i]) * np.linalg.norm(E[j]),
                                   1e-8)
            val = (cs + 1.0) * 0.5 * tau
            if y[i] == y[j] and pos:
                loss_temp[i, 0] = val
                pos = False
            elif y[i] != y[j]:
                loss_temp[i, indice] = val
                indice += 1
    m = loss_temp.max(axis=1, keepdims=True)
    lse = m + np.log(np.exp(loss_temp - m).sum(axis=1, keepdims=True))
    cl = (-(loss_temp - lse)).sum(axis=0)[0] / N
    lm = P.max(axis=1, keepdims=True)
    lsep = lm + np.log(np.exp(P - lm).sum(axis=1, keepdims=True))
    logp = P - lsep
    ce = -np.mean(logp[np.arange(N), y])
    pt = np.exp(-ce)
    focal = (1.0 - pt) ** gamma * ce
    return lambd * cl + (1.0 - lambd) * focal


if __name__ == "__main__":
    key = jax.random.PRNGKey(0)
    k1, k2, k3 = jax.random.split(key, 3)

    N, C_feat, H, W = 8, 4, 16, 16   # 8 embeddings, NCHW feature maps
    num_classes = 4
    tau = 0.5

    layer_embeds = jax.random.normal(k1, (N, C_feat, H, W), dtype=jnp.float32)
    y_true = jax.random.randint(k2, (N,), 0, num_classes, dtype=jnp.int32)
    y_pred = jax.random.normal(k3, (N, num_classes), dtype=jnp.float32)

    loss = focl_pallas(layer_embeds, y_true, y_pred, tau)
    loss = jax.block_until_ready(loss)

    ref = focl_reference(np.asarray(layer_embeds), np.asarray(y_true),
                         np.asarray(y_pred), tau)
    assert np.isfinite(float(loss))
    assert abs(float(loss) - float(ref)) < 3e-3, (float(loss), float(ref))

    print("KERNEL_OK")
</pallas_src>

<mosaic_0001>
module attributes {stable_mosaic.version = 11 : i64} {
  func.func @_focl_kernel(%arg0: i32, %arg1: i32, %arg2: i32, %arg3: memref<128x1024xbf16, #tpu.memory_space<vmem>>, %arg4: memref<1024x128xbf16, #tpu.memory_space<vmem>>, %arg5: memref<128x1xi32, #tpu.memory_space<vmem>>, %arg6: memref<1x128xi32, #tpu.memory_space<vmem>>, %arg7: memref<128x1xi32, #tpu.memory_space<vmem>>, %arg8: memref<128x1xf32, #tpu.memory_space<vmem>>, %arg9: memref<128x128xf32, #tpu.memory_space<vmem>>, %arg10: memref<128x1xf32, #tpu.memory_space<vmem>>, %arg11: memref<128x1xf32, #tpu.memory_space<vmem>>, %arg12: memref<128x1xf32, #tpu.memory_space<vmem>>, %arg13: memref<128x1xi32, #tpu.memory_space<vmem>>) attributes {dimension_semantics = [#tpu.dimension_semantics<parallel>, #tpu.dimension_semantics<arbitrary>, #tpu.dimension_semantics<arbitrary>], iteration_bounds = array<i64: 1, 1, 1>, scalar_prefetch = 0 : i64, scratch_operands = 5 : i64, tpu.core_type = #tpu.core_type<tc>, window_params = [{transform_indices = @transform_0, window_bounds = array<i64: 128, 1024>}, {transform_indices = @transform_1, window_bounds = array<i64: 1024, 128>}, {transform_indices = @transform_2, window_bounds = array<i64: 128, 1>}, {transform_indices = @transform_3, window_bounds = array<i64: 1, 128>}, {transform_indices = @transform_4, window_bounds = array<i64: 128, 1>}, {transform_indices = @transform_5, window_bounds = array<i64: 128, 1>}]} {
    %c0_i32 = arith.constant 0 : i32
    %0 = arith.cmpi eq, %arg1, %c0_i32 : i32
    %c0_i32_0 = arith.constant 0 : i32
    %1 = arith.cmpi eq, %arg2, %c0_i32_0 : i32
    %2 = arith.andi %0, %1 : i1
    %3 = arith.extui %2 : i1 to i32
    %c1073741824_i32 = arith.constant 1073741824 : i32
    %c0_i32_1 = arith.constant 0 : i32
    %4 = arith.cmpi ne, %3, %c0_i32_1 : i32
    scf.if %4 {
      %cst_10 = arith.constant 0.000000e+00 : f32
      %12 = vector.broadcast %cst_10 : f32 to vector<128x1xf32>
      %c0_11 = arith.constant 0 : index
      %c0_12 = arith.constant 0 : index
      %13 = vector.load %arg10[%c0_11, %c0_12] : memref<128x1xf32, #tpu.memory_space<vmem>>, vector<128x1xf32>
      tpu.vector_store %arg10[%c0_11, %c0_12], %12 {strides = array<i32>} : memref<128x1xf32, #tpu.memory_space<vmem>>, vector<128x1xf32>,
      %cst_13 = arith.constant 0.000000e+00 : f32
      %14 = vector.broadcast %cst_13 : f32 to vector<128x1xf32>
      %c0_14 = arith.constant 0 : index
      %c0_15 = arith.constant 0 : index
      %15 = vector.load %arg11[%c0_14, %c0_15] : memref<128x1xf32, #tpu.memory_space<vmem>>, vector<128x1xf32>
      tpu.vector_store %arg11[%c0_14, %c0_15], %14 {strides = array<i32>} : memref<128x1xf32, #tpu.memory_space<vmem>>, vector<128x1xf32>,
      %cst_16 = arith.constant 0.000000e+00 : f32
      %16 = vector.broadcast %cst_16 : f32 to vector<128x1xf32>
      %c0_17 = arith.constant 0 : index
      %c0_18 = arith.constant 0 : index
      %17 = vector.load %arg12[%c0_17, %c0_18] : memref<128x1xf32, #tpu.memory_space<vmem>>, vector<128x1xf32>
      tpu.vector_store %arg12[%c0_17, %c0_18], %16 {strides = array<i32>} : memref<128x1xf32, #tpu.memory_space<vmem>>, vector<128x1xf32>,
      %18 = vector.broadcast %c1073741824_i32 : i32 to vector<128x1xi32>
      %c0_19 = arith.constant 0 : index
      %c0_20 = arith.constant 0 : index
      %19 = vector.load %arg13[%c0_19, %c0_20] : memref<128x1xi32, #tpu.memory_space<vmem>>, vector<128x1xi32>
      tpu.vector_store %arg13[%c0_19, %c0_20], %18 {strides = array<i32>} : memref<128x1xi32, #tpu.memory_space<vmem>>, vector<128x1xi32>,
    } else {
    }
    %c0 = arith.constant 0 : index
    %c0_2 = arith.constant 0 : index
    %5 = vector.load %arg3[%c0, %c0_2] : memref<128x1024xbf16, #tpu.memory_space<vmem>>, vector<128x1024xbf16>
    %c0_3 = arith.constant 0 : index
    %c0_4 = arith.constant 0 : index
    %6 = vector.load %arg4[%c0_3, %c0_4] : memref<1024x128xbf16, #tpu.memory_space<vmem>>, vector<1024x128xbf16>
    %cst = arith.constant dense<0.000000e+00> : vector<128x128xf32>
    %7 = tpu.matmul %5, %6, %cst {dimension_numbers = #tpu.dot_dimension_numbers<[1], [0], [0], [1], [0, 0, 1, 1], [], []>} : vector<128x1024xbf16>, vector<1024x128xbf16>, vector<128x128xf32> -> vector<128x128xf32>
    %c0_5 = arith.constant 0 : index
    %c0_6 = arith.constant 0 : index
    %8 = vector.load %arg9[%c0_5, %c0_6] : memref<128x128xf32, #tpu.memory_space<vmem>>, vector<128x128xf32>
    tpu.vector_store %arg9[%c0_5, %c0_6], %7 {strides = array<i32>} : memref<128x128xf32, #tpu.memory_space<vmem>>, vector<128x128xf32>,
    %c0_i32_7 = arith.constant 0 : i32
    %9 = arith.cmpi eq, %arg2, %c0_i32_7 : i32
    %10 = arith.extui %9 : i1 to i32
    %c1073741824_i32_8 = arith.constant 1073741824 : i32
    %c0_i32_9 = arith.constant 0 : i32
    %11 = arith.cmpi ne, %10, %c0_i32_9 : i32
    scf.if %11 {
      %c0_10 = arith.constant 0 : index
      %c0_11 = arith.constant 0 : index
      %12 = vector.load %arg9[%c0_10, %c0_11] : memref<128x128xf32, #tpu.memory_space<vmem>>, vector<128x128xf32>
      %cst_12 = arith.constant 2.500000e-01 : f32
      %13 = vector.broadcast %cst_12 : f32 to vector<128x128xf32>
      %14 = arith.mulf %12, %13 : vector<128x128xf32>
      %cst_13 = arith.constant 2.500000e-01 : f32
      %15 = vector.broadcast %cst_13 : f32 to vector<128x128xf32>
      %16 = arith.addf %14, %15 : vector<128x128xf32>
      %c0_14 = arith.constant 0 : index
      %c0_15 = arith.constant 0 : index
      %17 = vector.load %arg9[%c0_14, %c0_15] : memref<128x128xf32, #tpu.memory_space<vmem>>, vector<128x128xf32>
      tpu.vector_store %arg9[%c0_14, %c0_15], %16 {strides = array<i32>} : memref<128x128xf32, #tpu.memory_space<vmem>>, vector<128x128xf32>,
      %c128_i32 = arith.constant 128 : i32
      %18 = arith.muli %arg0, %c128_i32 : i32
      %19 = tpu.iota {dimensions = array<i32: 0>} : vector<128x128xi32>
      %20 = vector.broadcast %18 : i32 to vector<128x128xi32>
      %21 = arith.addi %20, %19 : vector<128x128xi32>
      %c128_i32_16 = arith.constant 128 : i32
      %22 = arith.muli %arg1, %c128_i32_16 : i32
      %23 = tpu.iota {dimensions = array<i32: 1>} : vector<128x128xi32>
      %24 = vector.broadcast %22 : i32 to vector<128x128xi32>
      %25 = arith.addi %24, %23 : vector<128x128xi32>
      %c0_17 = arith.constant 0 : index
      %c0_18 = arith.constant 0 : index
      %26 = vector.load %arg5[%c0_17, %c0_18] : memref<128x1xi32, #tpu.memory_space<vmem>>, vector<128x1xi32>
      %c0_19 = arith.constant 0 : index
      %c0_20 = arith.constant 0 : index
      %27 = vector.load %arg6[%c0_19, %c0_20] : memref<1x128xi32, #tpu.memory_space<vmem>>, vector<1x128xi32>
      %28 = vector.broadcast %26 : vector<128x1xi32> to vector<128x128xi32>
      %29 = vector.broadcast %27 : vector<1x128xi32> to vector<128x128xi32>
      %30 = arith.cmpi eq, %28, %29 : vector<128x128xi32>
      %c8_i32 = arith.constant 8 : i32
      %31 = vector.broadcast %c8_i32 : i32 to vector<128x128xi32>
      %32 = arith.cmpi slt, %25, %31 : vector<128x128xi32>
      %cst_21 = arith.constant dense<true> : vector<128x128xi1>
      %33 = arith.xori %30, %cst_21 : vector<128x128xi1>
      %34 = arith.andi %33, %32 : vector<128x128xi1>
      %cst_22 = arith.constant 0xFF800000 : f32
      %35 = vector.broadcast %cst_22 : f32 to vector<128x128xf32>
      %36 = arith.select %34, %16, %35 : vector<128x128xi1>, vector<128x128xf32>
      %c0_23 = arith.constant 0 : index
      %c0_24 = arith.constant 0 : index
      %37 = vector.load %arg10[%c0_23, %c0_24] : memref<128x1xf32, #tpu.memory_space<vmem>>, vector<128x1xf32>
      %cst_25 = arith.constant dense<0xFF800000> : vector<128xf32>
      %38 = vector.multi_reduction <maximumf>, %36, %cst_25 [1] : vector<128x128xf32> to vector<128xf32>
      %39 = vector.shape_cast %38 : vector<128xf32> to vector<128x1xf32>
      %40 = arith.maximumf %37, %39 : vector<128x1xf32>
      %c0_26 = arith.constant 0 : index
      %c0_27 = arith.constant 0 : index
      %41 = vector.load %arg11[%c0_26, %c0_27] : memref<128x1xf32, #tpu.memory_space<vmem>>, vector<128x1xf32>
      %c0_28 = arith.constant 0 : index
      %c0_29 = arith.constant 0 : index
      %42 = vector.load %arg10[%c0_28, %c0_29] : memref<128x1xf32, #tpu.memory_space<vmem>>, vector<128x1xf32>
      %43 = arith.subf %42, %40 : vector<128x1xf32>
      %44 = math.exp %43 : vector<128x1xf32>
      %45 = arith.mulf %41, %44 : vector<128x1xf32>
      %46 = vector.broadcast %40 : vector<128x1xf32> to vector<128x128xf32>
      %47 = arith.subf %36, %46 : vector<128x128xf32>
      %48 = math.exp %47 : vector<128x128xf32>
      %cst_30 = arith.constant dense<0.000000e+00> : vector<128xf32>
      %49 = vector.multi_reduction <add>, %48, %cst_30 [1] : vector<128x128xf32> to vector<128xf32>
      %50 = vector.shape_cast %49 : vector<128xf32> to vector<128x1xf32>
      %51 = arith.addf %45, %50 : vector<128x1xf32>
      %c0_31 = arith.constant 0 : index
      %c0_32 = arith.constant 0 : index
      %52 = vector.load %arg11[%c0_31, %c0_32] : memref<128x1xf32, #tpu.memory_space<vmem>>, vector<128x1xf32>
      tpu.vector_store %arg11[%c0_31, %c0_32], %51 {strides = array<i32>} : memref<128x1xf32, #tpu.memory_space<vmem>>, vector<128x1xf32>,
      %c0_33 = arith.constant 0 : index
      %c0_34 = arith.constant 0 : index
      %53 = vector.load %arg10[%c0_33, %c0_34] : memref<128x1xf32, #tpu.memory_space<vmem>>, vector<128x1xf32>
      tpu.vector_store %arg10[%c0_33, %c0_34], %40 {strides = array<i32>} : memref<128x1xf32, #tpu.memory_space<vmem>>, vector<128x1xf32>,
      %54 = arith.cmpi ne, %21, %25 : vector<128x128xi32>
      %55 = arith.andi %30, %54 : vector<128x128xi1>
      %56 = arith.andi %55, %32 : vector<128x128xi1>
      %57 = vector.broadcast %c1073741824_i32_8 : i32 to vector<128x128xi32>
      %58 = arith.select %56, %25, %57 : vector<128x128xi1>, vector<128x128xi32>
      %cst_35 = arith.constant dense<2147483647> : vector<128xi32>
      %59 = vector.multi_reduction <minsi>, %58, %cst_35 [1] : vector<128x128xi32> to vector<128xi32>
      %60 = vector.shape_cast %59 : vector<128xi32> to vector<128x1xi32>
      %61 = vector.broadcast %60 : vector<128x1xi32> to vector<128x128xi32>
      %62 = arith.cmpi eq, %25, %61 : vector<128x128xi32>
      %63 = arith.andi %56, %62 : vector<128x128xi1>
      %c0_36 = arith.constant 0 : index
      %c0_37 = arith.constant 0 : index
      %64 = vector.load %arg9[%c0_36, %c0_37] : memref<128x128xf32, #tpu.memory_space<vmem>>, vector<128x128xf32>
      %cst_38 = arith.constant 0.000000e+00 : f32
      %65 = vector.broadcast %cst_38 : f32 to vector<128x128xf32>
      %66 = arith.select %63, %64, %65 : vector<128x128xi1>, vector<128x128xf32>
      %cst_39 = arith.constant dense<0.000000e+00> : vector<128xf32>
      %67 = vector.multi_reduction <add>, %66, %cst_39 [1] : vector<128x128xf32> to vector<128xf32>
      %68 = vector.shape_cast %67 : vector<128xf32> to vector<128x1xf32>
      %c0_40 = arith.constant 0 : index
      %c0_41 = arith.constant 0 : index
      %69 = vector.load %arg13[%c0_40, %c0_41] : memref<128x1xi32, #tpu.memory_space<vmem>>, vector<128x1xi32>
      %70 = arith.cmpi slt, %60, %69 : vector<128x1xi32>
      %c0_42 = arith.constant 0 : index
      %c0_43 = arith.constant 0 : index
      %71 = vector.load %arg12[%c0_42, %c0_43] : memref<128x1xf32, #tpu.memory_space<vmem>>, vector<128x1xf32>
      %72 = arith.select %70, %68, %71 : vector<128x1xi1>, vector<128x1xf32>
      %c0_44 = arith.constant 0 : index
      %c0_45 = arith.constant 0 : index
      %73 = vector.load %arg12[%c0_44, %c0_45] : memref<128x1xf32, #tpu.memory_space<vmem>>, vector<128x1xf32>
      tpu.vector_store %arg12[%c0_44, %c0_45], %72 {strides = array<i32>} : memref<128x1xf32, #tpu.memory_space<vmem>>, vector<128x1xf32>,
      %c0_46 = arith.constant 0 : index
      %c0_47 = arith.constant 0 : index
      %74 = vector.load %arg13[%c0_46, %c0_47] : memref<128x1xi32, #tpu.memory_space<vmem>>, vector<128x1xi32>
      %75 = arith.select %70, %60, %74 : vector<128x1xi1>, vector<128x1xi32>
      %c0_48 = arith.constant 0 : index
      %c0_49 = arith.constant 0 : index
      %76 = vector.load %arg13[%c0_48, %c0_49] : memref<128x1xi32, #tpu.memory_space<vmem>>, vector<128x1xi32>
      tpu.vector_store %arg13[%c0_48, %c0_49], %75 {strides = array<i32>} : memref<128x1xi32, #tpu.memory_space<vmem>>, vector<128x1xi32>,
      %c0_i32_50 = arith.constant 0 : i32
      %77 = arith.cmpi eq, %arg1, %c0_i32_50 : i32
      %78 = arith.extui %77 : i1 to i32
      %c0_i32_51 = arith.constant 0 : i32
      %79 = arith.cmpi ne, %78, %c0_i32_51 : i32
      scf.if %79 {
        %c128_i32_52 = arith.constant 128 : i32
        %80 = arith.muli %arg0, %c128_i32_52 : i32
        %81 = tpu.iota {dimensions = array<i32: 0>} : vector<128x1xi32>
        %82 = vector.broadcast %80 : i32 to vector<128x1xi32>
        %83 = arith.addi %82, %81 : vector<128x1xi32>
        %c8_i32_53 = arith.constant 8 : i32
        %84 = vector.broadcast %c8_i32_53 : i32 to vector<128x1xi32>
        %85 = arith.cmpi slt, %83, %84 : vector<128x1xi32>
        %c0_54 = arith.constant 0 : index
        %c0_55 = arith.constant 0 : index
        %86 = vector.load %arg7[%c0_54, %c0_55] : memref<128x1xi32, #tpu.memory_space<vmem>>, vector<128x1xi32>
        %87 = arith.sitofp %86 : vector<128x1xi32> to vector<128x1xf32>
        %cst_56 = arith.constant 6.000000e+00 : f32
        %88 = vector.broadcast %cst_56 : f32 to vector<128x1xf32>
        %89 = arith.addf %88, %87 : vector<128x1xf32>
        %c0_57 = arith.constant 0 : index
        %c0_58 = arith.constant 0 : index
        %90 = vector.load %arg12[%c0_57, %c0_58] : memref<128x1xf32, #tpu.memory_space<vmem>>, vector<128x1xf32>
        %c0_59 = arith.constant 0 : index
        %c0_60 = arith.constant 0 : index
        %91 = vector.load %arg10[%c0_59, %c0_60] : memref<128x1xf32, #tpu.memory_space<vmem>>, vector<128x1xf32>
        %cst_61 = arith.constant 0.000000e+00 : f32
        %92 = vector.broadcast %cst_61 : f32 to vector<128x1xf32>
        %93 = arith.maximumf %90, %92 : vector<128x1xf32>
        %94 = arith.maximumf %91, %93 : vector<128x1xf32>
        %c0_62 = arith.constant 0 : index
        %c0_63 = arith.constant 0 : index
        %95 = vector.load %arg11[%c0_62, %c0_63] : memref<128x1xf32, #tpu.memory_space<vmem>>, vector<128x1xf32>
        %c0_64 = arith.constant 0 : index
        %c0_65 = arith.constant 0 : index
        %96 = vector.load %arg10[%c0_64, %c0_65] : memref<128x1xf32, #tpu.memory_space<vmem>>, vector<128x1xf32>
        %97 = arith.subf %96, %94 : vector<128x1xf32>
        %98 = math.exp %97 : vector<128x1xf32>
        %99 = arith.mulf %95, %98 : vector<128x1xf32>
        %100 = arith.subf %90, %94 : vector<128x1xf32>
        %101 = math.exp %100 : vector<128x1xf32>
        %102 = arith.addf %99, %101 : vector<128x1xf32>
        %cst_66 = arith.constant 0.000000e+00 : f32
        %103 = vector.broadcast %cst_66 : f32 to vector<128x1xf32>
        %104 = arith.subf %103, %94 : vector<128x1xf32>
        %105 = math.exp %104 : vector<128x1xf32>
        %106 = arith.mulf %89, %105 : vector<128x1xf32>
        %107 = arith.addf %102, %106 : vector<128x1xf32>
        %108 = math.log %107 : vector<128x1xf32>
        %109 = arith.addf %94, %108 : vector<128x1xf32>
        %110 = arith.subf %109, %90 : vector<128x1xf32>
        %cst_67 = arith.constant 0.000000e+00 : f32
        %111 = vector.broadcast %cst_67 : f32 to vector<128x1xf32>
        %112 = arith.select %85, %110, %111 : vector<128x1xi1>, vector<128x1xf32>
        %c0_68 = arith.constant 0 : index
        %c0_69 = arith.constant 0 : index
        %113 = vector.load %arg8[%c0_68, %c0_69] : memref<128x1xf32, #tpu.memory_space<vmem>>, vector<128x1xf32>
        tpu.vector_store %arg8[%c0_68, %c0_69], %112 {strides = array<i32>} : memref<128x1xf32, #tpu.memory_space<vmem>>, vector<128x1xf32>,
      } else {
      }
    } else {
    }
    return
  }
  func.func @transform_0(%arg0: i32, %arg1: i32, %arg2: i32) -> (i32, i32) {
    %c0_i32 = arith.constant 0 : i32
    return %arg0, %arg2 : i32, i32
  }
  func.func @transform_1(%arg0: i32, %arg1: i32, %arg2: i32) -> (i32, i32) {
    %c0_i32 = arith.constant 0 : i32
    return %arg2, %arg1 : i32, i32
  }
  func.func @transform_2(%arg0: i32, %arg1: i32, %arg2: i32) -> (i32, i32) {
    %c0_i32 = arith.constant 0 : i32
    %c0_i32_0 = arith.constant 0 : i32
    return %arg0, %c0_i32 : i32, i32
  }
  func.func @transform_3(%arg0: i32, %arg1: i32, %arg2: i32) -> (i32, i32) {
    %c0_i32 = arith.constant 0 : i32
    %c0_i32_0 = arith.constant 0 : i32
    return %c0_i32, %arg1 : i32, i32
  }
  func.func @transform_4(%arg0: i32, %arg1: i32, %arg2: i32) -> (i32, i32) {
    %c0_i32 = arith.constant 0 : i32
    %c0_i32_0 = arith.constant 0 : i32
    return %arg0, %c0_i32 : i32, i32
  }
  func.func @transform_5(%arg0: i32, %arg1: i32, %arg2: i32) -> (i32, i32) {
    %c0_i32 = arith.constant 0 : i32
    %c0_i32_0 = arith.constant 0 : i32
    return %arg0, %c0_i32 : i32, i32
  }
}

</mosaic_0001>

<bundles_post_ra>
// kernel: tpu_custom_call.1
= control target key start
LH: loop header
LB: loop body
LE: loop exit
PB: predicated region body
PF: predicated region fallthrough
CT: control target
= control target key end

     0   :  { %10 = vsyncpa [#allocation8], 0  ;;  %s5336_s0 = inlined_call_operand.hbm [shape: bf16[128,1024], index: 0, kind: input, shape index: {}]   ;;  %s5337_s1 = inlined_call_operand.hbm [shape: bf16[1024,128], index: 1, kind: input, shape index: {}]   ;;  %s5338_s2 = inlined_call_operand.vmem [shape: s32[128,1], index: 2, kind: input, shape index: {}]   ;;  %s5339_s3 = inlined_call_operand.vmem [shape: s32[1,128], index: 3, kind: input, shape index: {}]   ;;  %s5340_s4 = inlined_call_operand.vmem [shape: s32[128,1], index: 4, kind: input, shape index: {}]   ;;  %s5341_s5 = inlined_call_operand.vmem [shape: f32[128,1], index: 5, kind: output, shape index: {}]  }
   0x1   :  { %11 = vsyncpa [#allocation10], 0  ;;  %s3564_s18 = smov [#allocation7]   ;;  %s3516_s22 = scalar_lea.hbm %s5336_s0, 8192 }
   0x2   :  { %s17_s19 = sshll.u32 %s3564_s18, 4  ;;  %p3517_p0 = scmp.ne.s32.totalorder %s5336_s0, %s3516_s22  ;;  %s18_s19 = int_to_ptr.vmem [resolvable:$true] %s17_s19 }
   0x3   :  { %p3520_p1 = scmp.lt.u32.totalorder %s3516_s22, %s5336_s0 }
   0x5   :  { %p3522_p2 = pnand %p3520_p1, %p3517_p0 }
   0x7   :  { %3525 = shalt.err (!%p3522_p2)
}
   0x8   :  { %s3526_s27 = scalar_lea.vmem %s18_s19, 8192  ;;  %p3531_p4 = scmp.lt.s32.totalorder %s18_s19, %s18_s19 }
   0x9   :  { %p3527_p3 = scmp.ne.s32.totalorder %s18_s19, %s3526_s27  ;;  %p3532_p5 = scmp.lt.s32.totalorder %s3526_s27, %s3526_s27 }
   0xb   :  { %p3533_p6 = por %p3532_p5, %p3531_p4 }
   0xd   :  { %p3534_p7 = pnand %p3533_p6, %p3527_p3 }
   0xf   :  { %3537 = shalt.err (!%p3534_p7)
}
  0x10   :  { %s3565_s28 = smov 512   ;;  %s3566_s29 = smov 32  }
  0x11   :  { %23 = dma.hbm_to_vmem [thread:$0]  %s5336_s0, 8192, %s18_s19, [#allocation8], %s3565_s28, %s3565_s28, %s3566_s29  }
  0x12   :  { %s3567_s7 = smov [#allocation9]   ;;  %s3538_s11 = scalar_lea.hbm %s5337_s1, 8192 }
  0x13   :  { %s29_s8 = sshll.u32 %s3567_s7, 4  ;;  %p3539_p8 = scmp.ne.s32.totalorder %s5337_s1, %s3538_s11  ;;  %s30_s8 = int_to_ptr.vmem [resolvable:$true] %s29_s8 }
  0x14   :  { %p3542_p9 = scmp.lt.u32.totalorder %s3538_s11, %s5337_s1 }
  0x16   :  { %p3544_p10 = pnand %p3542_p9, %p3539_p8 }
  0x18   :  { %3547 = shalt.err (!%p3544_p10)
}
  0x19   :  { %s3548_s16 = scalar_lea.vmem %s30_s8, 8192  ;;  %p3553_p12 = scmp.lt.s32.totalorder %s30_s8, %s30_s8 }
  0x1a   :  { %p3549_p11 = scmp.ne.s32.totalorder %s30_s8, %s3548_s16  ;;  %p3554_p13 = scmp.lt.s32.totalorder %s3548_s16, %s3548_s16 }
  0x1c   :  { %p3555_p0 = por %p3554_p13, %p3553_p12 }
  0x1e   :  { %p3556_p1 = pnand %p3555_p0, %p3549_p11 }
  0x20   :  { %3559 = shalt.err (!%p3556_p1)
}
  0x21   :  { %s3568_s0 = smov 64   ;;  %s3569_s17 = smov 4  }
  0x22   :  { %35 = dma.hbm_to_vmem [thread:$0]  %s5337_s1, 8192, %s30_s8, [#allocation10], %s3568_s0, %s3568_s0, %s3569_s17  }
  0x23   :  { %3560 = dma.done.wait [#allocation8], 8192  }
  0x24   :  { %3561 = vsyncadd [#allocation8], 4294959104 }
  0x25   :  { %3562 = dma.done.wait [#allocation10], 8192  }
  0x26   :  { %3563 = vsyncadd [#allocation10], 4294959104  ;;  %vm5342_vm0 = vcmask 7168   ;;  %v3570_v0 = vmov 0.0   ;;  %v3571_v1 = vmov 0   ;;  %v1529_v2 = vld [vmem:[%s5338_s2 + $0x10] sm:$0xff] }
  0x27   :  { %2962 = vst.msk [vmem:[%s5341_s5 + $0x8] sm:$0xff] %vm5342_vm0, %v3570_v0  ;;  %2963 = vst.msk [vmem:[%s5341_s5 + $0x10] sm:$0xff] %vm5342_vm0, %v3570_v0  ;;  %3379 = vset.pattern.permute.xlu1 %v3571_v1  ;;  %3378 = vset.pattern.permute.xlu0 %v3571_v1  ;;  %v1527_v3 = vld [vmem:[%s5338_s2] sm:$0xff]  ;;  %v1528_v8 = vld [vmem:[%s5338_s2 + $0x8] sm:$0xff]  ;;  %vm5348_vm15 = vmmov 1  }
  0x28   :  { %2964 = vst.msk [vmem:[%s5341_s5 + $0x18] sm:$0xff] %vm5342_vm0, %v3570_v0  ;;  %2965 = vst.msk [vmem:[%s5341_s5 + $0x20] sm:$0xff] %vm5342_vm0, %v3570_v0  ;;  %1551 = vperm.xlu1 %3379, %v1529_v2   ;;  %1545 = vperm.xlu0 %3378, %v1527_v3   ;;  %v3380_v4 = vld [vmem:[#allocation9 + $0x40] sm:$0xff]   ;;  %v3384_v9 = vld [vmem:[#allocation9 + $0x48] sm:$0xff]  }
  0x29   :  { %2966 = vst.msk [vmem:[%s5341_s5 + $0x28] sm:$0xff] %vm5342_vm0, %v3570_v0  ;;  %2967 = vst.msk [vmem:[%s5341_s5 + $0x30] sm:$0xff] %vm5342_vm0, %v3570_v0  ;;  %v3381_v5 = vld [vmem:[#allocation9 + $0xc0] sm:$0xff]   ;;  %3112 = vmatprep.subr.bf16.mxu0 %v3380_v4  ;;  %v3385_v10 = vld [vmem:[#allocation9 + $0xc8] sm:$0xff]  }
  0x2a   :  { %2968 = vst.msk [vmem:[%s5341_s5 + $0x38] sm:$0xff] %vm5342_vm0, %v3570_v0  ;;  %2969 = vst.msk [vmem:[%s5341_s5 + $0x40] sm:$0xff] %vm5342_vm0, %v3570_v0  ;;  %v3382_v6 = vld [vmem:[#allocation9] sm:$0xff]   ;;  %3176 = vmatprep.subr.bf16.mxu1 %v3381_v5  ;;  %v3386_v11 = vld [vmem:[#allocation9 + $0x8] sm:$0xff]  }
  0x2b   :  { %2970 = vst.msk [vmem:[%s5341_s5 + $0x48] sm:$0xff] %vm5342_vm0, %v3570_v0  ;;  %2971 = vst.msk [vmem:[%s5341_s5 + $0x50] sm:$0xff] %vm5342_vm0, %v3570_v0  ;;  %v3383_v7 = vld [vmem:[#allocation9 + $0x80] sm:$0xff]   ;;  %3113 = vmatpush3.bf16.msra.mxu0 %v3382_v6  ;;  %v3387_v12 = vld [vmem:[#allocation9 + $0x88] sm:$0xff]  }
  0x2c   :  { %2972 = vst.msk [vmem:[%s5341_s5 + $0x58] sm:$0xff] %vm5342_vm0, %v3570_v0  ;;  %2973 = vst.msk [vmem:[%s5341_s5 + $0x60] sm:$0xff] %vm5342_vm0, %v3570_v0  ;;  %1548 = vperm.xlu0 %3378, %v1528_v8   ;;  %3177 = vmatpush3.bf16.msra.mxu1 %v3383_v7  ;;  %v1530_v13 = vld [vmem:[%s5338_s2 + $0x18] sm:$0xff]  ;;  %v1531_v14 = vld [vmem:[%s5338_s2 + $0x20] sm:$0xff] }
  0x2d   :  { %2974 = vst.msk [vmem:[%s5341_s5 + $0x68] sm:$0xff] %vm5342_vm0, %v3570_v0  ;;  %2975 = vst.msk [vmem:[%s5341_s5 + $0x70] sm:$0xff] %vm5342_vm0, %v3570_v0  ;;  %3114 = vmatprep.subr.bf16.mxu0 %v3384_v9  ;;  %3178 = vmatprep.subr.bf16.mxu1 %v3385_v10  ;;  %v3388_v15 = vld [vmem:[#allocation9 + $0x50] sm:$0xff]   ;;  %v1532_v19 = vld [vmem:[%s5338_s2 + $0x28] sm:$0xff] }
  0x2e   :  { %2976 = vst.msk [vmem:[%s5341_s5 + $0x78] sm:$0xff] %vm5342_vm0, %v3570_v0  ;;  %56 = vst.msk [vmem:[#allocation3] sm:$0xff] %vm5342_vm0, %v3570_v0  ;;  %1554 = vperm.xlu1 %3379, %v1530_v13   ;;  %v3389_v16 = vld [vmem:[#allocation9 + $0xd0] sm:$0xff]   ;;  %v3392_v21 = vld [vmem:[#allocation9 + $0x58] sm:$0xff]  }
  0x2f   :  { %57 = vst.msk [vmem:[#allocation3 + $0x8] sm:$0xff] %vm5342_vm0, %v3570_v0  ;;  %58 = vst.msk [vmem:[#allocation3 + $0x10] sm:$0xff] %vm5342_vm0, %v3570_v0  ;;  %3115 = vmatpush3.bf16.msra.mxu0 %v3386_v11  ;;  %v3390_v17 = vld [vmem:[#allocation9 + $0x10] sm:$0xff]   ;;  %v3393_v22 = vld [vmem:[#allocation9 + $0xd8] sm:$0xff]  }
  0x30   :  { %59 = vst.msk [vmem:[#allocation3 + $0x18] sm:$0xff] %vm5342_vm0, %v3570_v0  ;;  %60 = vst.msk [vmem:[#allocation3 + $0x20] sm:$0xff] %vm5342_vm0, %v3570_v0  ;;  %3179 = vmatpush3.bf16.msra.mxu1 %v3387_v12  ;;  %1557 = vperm.xlu0 %3378, %v1531_v14   ;;  %v3391_v18 = vld [vmem:[#allocation9 + $0x90] sm:$0xff]   ;;  %v3394_v23 = vld [vmem:[#allocation9 + $0x18] sm:$0xff]  }
  0x31   :  { %61 = vst.msk [vmem:[#allocation3 + $0x28] sm:$0xff] %vm5342_vm0, %v3570_v0  ;;  %62 = vst.msk [vmem:[#allocation3 + $0x30] sm:$0xff] %vm5342_vm0, %v3570_v0  ;;  %3116 = vmatprep.subr.bf16.mxu0 %v3388_v15  ;;  %3180 = vmatprep.subr.bf16.mxu1 %v3389_v16  ;;  %v1533_v20 = vld [vmem:[%s5338_s2 + $0x30] sm:$0xff]  ;;  %v3395_v24 = vld [vmem:[#allocation9 + $0x98] sm:$0xff]  }
  0x32   :  { %63 = vst.msk [vmem:[#allocation3 + $0x38] sm:$0xff] %vm5342_vm0, %v3570_v0  ;;  %64 = vst.msk [vmem:[#allocation3 + $0x40] sm:$0xff] %vm5342_vm0, %v3570_v0  ;;  %1560 = vperm.xlu1 %3379, %v1532_v19   ;;  %v1534_v25 = vld [vmem:[%s5338_s2 + $0x38] sm:$0xff]  ;;  %v1535_v26 = vld [vmem:[%s5338_s2 + $0x40] sm:$0xff] }
  0x33   :  { %65 = vst.msk [vmem:[#allocation3 + $0x48] sm:$0xff] %vm5342_vm0, %v3570_v0  ;;  %66 = vst.msk [vmem:[#allocation3 + $0x50] sm:$0xff] %vm5342_vm0, %v3570_v0  ;;  %3117 = vmatpush3.bf16.msra.mxu0 %v3390_v17  ;;  %v3396_v27 = vld [vmem:[#allocation9 + $0x60] sm:$0xff]   ;;  %v1536_v31 = vld [vmem:[%s5338_s2 + $0x48] sm:$0xff] }
  0x34   :  { %67 = vst.msk [vmem:[#allocation3 + $0x58] sm:$0xff] %vm5342_vm0, %v3570_v0  ;;  %68 = vst.msk [vmem:[#allocation3 + $0x60] sm:$0xff] %vm5342_vm0, %v3570_v0  ;;  %3181 = vmatpush3.bf16.msra.mxu1 %v3391_v18  ;;  %1563 = vperm.xlu0 %3378, %v1533_v20   ;;  %v3397_v28 = vld [vmem:[#allocation9 + $0xe0] sm:$0xff]   ;;  %v1537_v32 = vld [vmem:[%s5338_s2 + $0x50] sm:$0xff] }
  0x35   :  { %69 = vst.msk [vmem:[#allocation3 + $0x68] sm:$0xff] %vm5342_vm0, %v3570_v0  ;;  %70 = vst.msk [vmem:[#allocation3 + $0x70] sm:$0xff] %vm5342_vm0, %v3570_v0  ;;  %3118 = vmatprep.subr.bf16.mxu0 %v3392_v21  ;;  %3182 = vmatprep.subr.bf16.mxu1 %v3393_v22  ;;  %v3398_v29 = vld [vmem:[#allocation9 + $0x20] sm:$0xff]   ;;  %v3400_v33 = vld [vmem:[#allocation9 + $0x68] sm:$0xff]  }
  0x36   :  { %71 = vst.msk [vmem:[#allocation3 + $0x78] sm:$0xff] %vm5342_vm0, %v3570_v0  ;;  %72 = vst.msk [vmem:[#allocation4] sm:$0xff] %vm5342_vm0, %v3570_v0  ;;  %1566 = vperm.xlu1 %3379, %v1534_v25   ;;  %v3399_v30 = vld [vmem:[#allocation9 + $0xa0] sm:$0xff]   ;;  %v3401_v34 = vld [vmem:[#allocation9 + $0xe8] sm:$0xff]  }
  0x37   :  { %73 = vst.msk [vmem:[#allocation4 + $0x8] sm:$0xff] %vm5342_vm0, %v3570_v0  ;;  %74 = vst.msk [vmem:[#allocation4 + $0x10] sm:$0xff] %vm5342_vm0, %v3570_v0  ;;  %3119 = vmatpush3.bf16.msra.mxu0 %v3394_v23  ;;  %v3402_v35 = vld [vmem:[#allocation9 + $0x28] sm:$0xff]   ;;  %v1538_v37 = vld [vmem:[%s5338_s2 + $0x58] sm:$0xff] }
  0x38   :  { %75 = vst.msk [vmem:[#allocation4 + $0x18] sm:$0xff] %vm5342_vm0, %v3570_v0  ;;  %76 = vst.msk [vmem:[#allocation4 + $0x20] sm:$0xff] %vm5342_vm0, %v3570_v0  ;;  %3183 = vmatpush3.bf16.msra.mxu1 %v3395_v24  ;;  %1569 = vperm.xlu0 %3378, %v1535_v26   ;;  %v3403_v36 = vld [vmem:[#allocation9 + $0xa8] sm:$0xff]   ;;  %v1539_v38 = vld [vmem:[%s5338_s2 + $0x60] sm:$0xff] }
  0x39   :  { %77 = vst.msk [vmem:[#allocation4 + $0x28] sm:$0xff] %vm5342_vm0, %v3570_v0  ;;  %78 = vst.msk [vmem:[#allocation4 + $0x30] sm:$0xff] %vm5342_vm0, %v3570_v0  ;;  %3120 = vmatprep.subr.bf16.mxu0 %v3396_v27  ;;  %3184 = vmatprep.subr.bf16.mxu1 %v3397_v28  ;;  %v3404_v39 = vld [vmem:[#allocation9 + $0x70] sm:$0xff]   ;;  %v1540_v43 = vld [vmem:[%s5338_s2 + $0x68] sm:$0xff] }
  0x3a   :  { %79 = vst.msk [vmem:[#allocation4 + $0x38] sm:$0xff] %vm5342_vm0, %v3570_v0  ;;  %80 = vst.msk [vmem:[#allocation4 + $0x40] sm:$0xff] %vm5342_vm0, %v3570_v0  ;;  %1572 = vperm.xlu1 %3379, %v1536_v31   ;;  %v3405_v40 = vld [vmem:[#allocation9 + $0xf0] sm:$0xff]   ;;  %v3408_v45 = vld [vmem:[#allocation9 + $0x78] sm:$0xff]  }
  0x3b   :  { %81 = vst.msk [vmem:[#allocation4 + $0x48] sm:$0xff] %vm5342_vm0, %v3570_v0  ;;  %82 = vst.msk [vmem:[#allocation4 + $0x50] sm:$0xff] %vm5342_vm0, %v3570_v0  ;;  %3121 = vmatpush3.bf16.msra.mxu0 %v3398_v29  ;;  %v3406_v41 = vld [vmem:[#allocation9 + $0x30] sm:$0xff]   ;;  %v3409_v46 = vld [vmem:[#allocation9 + $0xf8] sm:$0xff]  }
  0x3c   :  { %83 = vst.msk [vmem:[#allocation4 + $0x58] sm:$0xff] %vm5342_vm0, %v3570_v0  ;;  %84 = vst.msk [vmem:[#allocation4 + $0x60] sm:$0xff] %vm5342_vm0, %v3570_v0  ;;  %3185 = vmatpush3.bf16.msra.mxu1 %v3399_v30  ;;  %1575 = vperm.xlu0 %3378, %v1537_v32   ;;  %v3407_v42 = vld [vmem:[#allocation9 + $0xb0] sm:$0xff]   ;;  %v3410_v47 = vld [vmem:[#allocation9 + $0x38] sm:$0xff]  }
  0x3d   :  { %85 = vst.msk [vmem:[#allocation4 + $0x68] sm:$0xff] %vm5342_vm0, %v3570_v0  ;;  %86 = vst.msk [vmem:[#allocation4 + $0x70] sm:$0xff] %vm5342_vm0, %v3570_v0  ;;  %3122 = vmatprep.subr.bf16.mxu0 %v3400_v33  ;;  %3186 = vmatprep.subr.bf16.mxu1 %v3401_v34  ;;  %v1541_v44 = vld [vmem:[%s5338_s2 + $0x70] sm:$0xff]  ;;  %v3411_v48 = vld [vmem:[#allocation9 + $0xb8] sm:$0xff]  }
  0x3e   :  { %87 = vst.msk [vmem:[#allocation4 + $0x78] sm:$0xff] %vm5342_vm0, %v3570_v0  ;;  %88 = vst.msk [vmem:[#allocation5] sm:$0xff] %vm5342_vm0, %v3570_v0  ;;  %1578 = vperm.xlu1 %3379, %v1538_v37   ;;  %v1542_v49 = vld [vmem:[%s5338_s2 + $0x78] sm:$0xff]  ;;  %v120_v50 = vld [vmem:[#allocation7] sm:$0xff] }
  0x3f   :  { %89 = vst.msk [vmem:[#allocation5 + $0x8] sm:$0xff] %vm5342_vm0, %v3570_v0  ;;  %90 = vst.msk [vmem:[#allocation5 + $0x10] sm:$0xff] %vm5342_vm0, %v3570_v0  ;;  %3123 = vmatpush3.bf16.msra.mxu0 %v3402_v35  ;;  %v124_v51 = vld [vmem:[#allocation7 + $0x20] sm:$0xff]  ;;  %v121_v54 = vld [vmem:[#allocation7 + $0x8] sm:$0xff] }
  0x40   :  { %91 = vst.msk [vmem:[#allocation5 + $0x18] sm:$0xff] %vm5342_vm0, %v3570_v0  ;;  %92 = vst.msk [vmem:[#allocation5 + $0x20] sm:$0xff] %vm5342_vm0, %v3570_v0  ;;  %3187 = vmatpush3.bf16.msra.mxu1 %v3403_v36  ;;  %1581 = vperm.xlu0 %3378, %v1539_v38   ;;  %v2983_v52 = vcombine.low %v120_v50, %v124_v51  ;;  %v2984_v53 = vcombine.high %v120_v50, %v124_v51  ;;  %v125_v55 = vld [vmem:[#allocation7 + $0x28] sm:$0xff]  ;;  %v3412_v58 = vld [vmem:[#allocation9 + $0x140] sm:$0xff]  }
  0x41   :  { %93 = vst.msk [vmem:[#allocation5 + $0x28] sm:$0xff] %vm5342_vm0, %v3570_v0  ;;  %94 = vst.msk [vmem:[#allocation5 + $0x30] sm:$0xff] %vm5342_vm0, %v3570_v0  ;;  %3124 = vmatprep.subr.bf16.mxu0 %v3404_v39  ;;  %3188 = vmatprep.subr.bf16.mxu1 %v3405_v40  ;;  %v2985_v56 = vcombine.low %v121_v54, %v125_v55  ;;  %v2986_v57 = vcombine.high %v121_v54, %v125_v55  ;;  %v3413_v59 = vld [vmem:[#allocation9 + $0x100] sm:$0xff]   ;;  %v133_v1 = vld [vmem:[#allocation7 + $0x68] sm:$0xff] }
  0x42   :  { %95 = vst.msk [vmem:[#allocation5 + $0x38] sm:$0xff] %vm5342_vm0, %v3570_v0  ;;  %96 = vst.msk [vmem:[#allocation5 + $0x40] sm:$0xff] %vm5342_vm0, %v3570_v0  ;;  %1584 = vperm.xlu1 %3379, %v1540_v43   ;;  %1048 = vmatprep.mubr.bf16.mxu0 %v2984_v53  ;;  %v3414_v60 = vld [vmem:[#allocation9 + $0x1c0] sm:$0xff]   ;;  %v3416_v4 = vld [vmem:[#allocation9 + $0x148] sm:$0xff]  }
  0x43   :  { %97 = vst.msk [vmem:[#allocation5 + $0x48] sm:$0xff] %vm5342_vm0, %v3570_v0  ;;  %98 = vst.msk [vmem:[#allocation5 + $0x50] sm:$0xff] %vm5342_vm0, %v3570_v0  ;;  %3125 = vmatpush3.bf16.msra.mxu0 %v3406_v41  ;;  %1145 = vmatprep.mubr.bf16.mxu1 %v2986_v57  ;;  %v3415_v61 = vld [vmem:[#allocation9 + $0x180] sm:$0xff]   ;;  %v3417_v6 = vld [vmem:[#allocation9 + $0x108] sm:$0xff]  }
  0x44   :  { %99 = vst.msk [vmem:[#allocation5 + $0x58] sm:$0xff] %vm5342_vm0, %v3570_v0  ;;  %100 = vst.msk [vmem:[#allocation5 + $0x60] sm:$0xff] %vm5342_vm0, %v3570_v0  ;;  %3189 = vmatpush3.bf16.msra.mxu1 %v3407_v42  ;;  %1587 = vperm.xlu0 %3378, %v1541_v44   ;;  %v128_v62 = vld [vmem:[#allocation7 + $0x40] sm:$0xff]  ;;  %v3418_v8 = vld [vmem:[#allocation9 + $0x1c8] sm:$0xff]  }
  0x45   :  { %101 = vst.msk [vmem:[#allocation5 + $0x68] sm:$0xff] %vm5342_vm0, %v3570_v0  ;;  %102 = vst.msk [vmem:[#allocation5 + $0x70] sm:$0xff] %vm5342_vm0, %v3570_v0  ;;  %3126 = vmatprep.subr.bf16.mxu0 %v3408_v45  ;;  %3190 = vmatprep.subr.bf16.mxu1 %v3409_v46  ;;  %v132_v63 = vld [vmem:[#allocation7 + $0x60] sm:$0xff]  ;;  %v3419_v9 = vld [vmem:[#allocation9 + $0x188] sm:$0xff]  }
  0x46   :  { %103 = vst.msk [vmem:[#allocation5 + $0x78] sm:$0xff] %vm5342_vm0, %v3570_v0  ;;  %1590 = vperm.xlu1 %3379, %v1542_v49   ;;  %v129_v0 = vld [vmem:[#allocation7 + $0x48] sm:$0xff]  ;;  %v2992_v2 = vcombine.high %v128_v62, %v132_v63  ;;  %v2991_v5 = vcombine.low %v128_v62, %v132_v63  ;;  %v136_v10 = vld [vmem:[#allocation7 + $0x80] sm:$0xff]  ;;  %v3420_v16 = vld [vmem:[#allocation9 + $0x150] sm:$0xff]  }
  0x47   :  { %3127 = vmatpush3.bf16.msra.mxu0 %v3410_v47  ;;  %v2994_v3 = vcombine.high %v129_v0, %v133_v1  ;;  %v2993_v7 = vcombine.low %v129_v0, %v133_v1  ;;  %v140_v11 = vld [vmem:[#allocation7 + $0xa0] sm:$0xff]  ;;  %v137_v12 = vld [vmem:[#allocation7 + $0x88] sm:$0xff]  ;;  %v3421_v17 = vld [vmem:[#allocation9 + $0x110] sm:$0xff]  }
  0x48   :  { %3191 = vmatpush3.bf16.msra.mxu1 %v3411_v48  ;;  %3240 = vmatprep.subr.bf16.mxu0 %v3412_v58  ;;  %v3000_v13 = vcombine.high %v136_v10, %v140_v11  ;;  %v141_v14 = vld [vmem:[#allocation7 + $0xa8] sm:$0xff]  ;;  %v3422_v18 = vld [vmem:[#allocation9 + $0x1d0] sm:$0xff]   ;;  %v2999_v19 = vcombine.low %v136_v10, %v140_v11  ;;  %v144_v21 = vld [vmem:[#allocation7 + $0xc0] sm:$0xff] }
  0x49   :  { %3304 = vmatprep.subr.bf16.mxu1 %v3414_v60  ;;  %v3002_v15 = vcombine.high %v137_v12, %v141_v14  ;;  %v3423_v20 = vld [vmem:[#allocation9 + $0x190] sm:$0xff]   ;;  %v148_v22 = vld [vmem:[#allocation7 + $0xe0] sm:$0xff]  ;;  %v3001_v23 = vcombine.low %v137_v12, %v141_v14  ;;  %v145_v25 = vld [vmem:[#allocation7 + $0xc8] sm:$0xff] }
  0x4a   :  { %1049 = vmatmul.mubr.bf16.vlgmr.msra.gmra.mrb[0].mxu0 %v2983_v52  ;;  %v3008_v24 = vcombine.high %v144_v21, %v148_v22  ;;  %v149_v26 = vld [vmem:[#allocation7 + $0xe8] sm:$0xff]  ;;  %v3424_v28 = vld [vmem:[#allocation9 + $0x158] sm:$0xff]   ;;  %v152_v32 = vld [vmem:[#allocation7 + $0x100] sm:$0xff]  ;;  %v3007_v37 = vcombine.low %v144_v21, %v148_v22 }
  0x4b   :  { %1146 = vmatmul.mubr.bf16.vlgmr.msra.gmra.mrb[0].mxu1 %v2985_v56  ;;  %3241 = vmatpush3.bf16.msra.mxu0 %v3413_v59  ;;  %v3010_v27 = vcombine.high %v145_v25, %v149_v26  ;;  %v3425_v29 = vld [vmem:[#allocation9 + $0x118] sm:$0xff]   ;;  %v156_v33 = vld [vmem:[#allocation7 + $0x120] sm:$0xff]  ;;  %v153_v34 = vld [vmem:[#allocation7 + $0x108] sm:$0xff]  ;;  %v3009_v39 = vcombine.low %v145_v25, %v149_v26 }
  0x4c   :  { %3305 = vmatpush3.bf16.msra.mxu1 %v3415_v61  ;;  %1056 = vmatprep.mubr.bf16.mxu0 %v2992_v2  ;;  %v3426_v30 = vld [vmem:[#allocation9 + $0x1d8] sm:$0xff]   ;;  %v157_v35 = vld [vmem:[#allocation7 + $0x128] sm:$0xff]  ;;  %v3428_v36 = vld [vmem:[#allocation9 + $0x160] sm:$0xff]   ;;  %v3016_v40 = vcombine.high %v152_v32, %v156_v33  ;;  %v3015_v51 = vcombine.low %v152_v32, %v156_v33 }
  0x4d   :  { %1153 = vmatprep.mubr.bf16.mxu1 %v2994_v3  ;;  %3242 = vmatprep.subr.bf16.mxu0 %v3416_v4  ;;  %v3427_v31 = vld [vmem:[#allocation9 + $0x198] sm:$0xff]   ;;  %v3429_v38 = vld [vmem:[#allocation9 + $0x120] sm:$0xff]   ;;  %v3018_v42 = vcombine.high %v153_v34, %v157_v35  ;;  %v161_v46 = vld [vmem:[#allocation7 + $0x148] sm:$0xff]  ;;  %v3017_v53 = vcombine.low %v153_v34, %v157_v35 }
  0x4e   :  { %3306 = vmatprep.subr.bf16.mxu1 %v3418_v8  ;;  %v3430_v41 = vld [vmem:[#allocation9 + $0x1e0] sm:$0xff]   ;;  %v165_v47 = vld [vmem:[#allocation7 + $0x168] sm:$0xff]  ;;  %v3436_v56 = vld [vmem:[#allocation9 + $0x170] sm:$0xff]  }
  0x4f   :  { %3243 = vmatpush3.bf16.msra.mxu0 %v3417_v6  ;;  %v3431_v43 = vld [vmem:[#allocation9 + $0x1a0] sm:$0xff]   ;;  %v3432_v48 = vld [vmem:[#allocation9 + $0x168] sm:$0xff]   ;;  %v3026_v55 = vcombine.high %v161_v46, %v165_v47  ;;  %v3437_v57 = vld [vmem:[#allocation9 + $0x130] sm:$0xff]   ;;  %v3025_v3 = vcombine.low %v161_v46, %v165_v47 }
  0x50   :  { %3307 = vmatpush3.bf16.msra.mxu1 %v3419_v9  ;;  %3244 = vmatprep.subr.bf16.mxu0 %v3420_v16  ;;  %v160_v44 = vld [vmem:[#allocation7 + $0x140] sm:$0xff]  ;;  %v3433_v49 = vld [vmem:[#allocation9 + $0x128] sm:$0xff]   ;;  %v3438_v58 = vld [vmem:[#allocation9 + $0x1f0] sm:$0xff]  }
  0x51   :  { %3308 = vmatprep.subr.bf16.mxu1 %v3422_v18  ;;  %v164_v45 = vld [vmem:[#allocation7 + $0x160] sm:$0xff]  ;;  %v3434_v50 = vld [vmem:[#allocation9 + $0x1e8] sm:$0xff]   ;;  %v3439_v60 = vld [vmem:[#allocation9 + $0x1b0] sm:$0xff]  }
  0x52   :  { %1057 = vmatmul.mubr.bf16.gmra.mrb[4].mxu0 %v2991_v5  ;;  %v3435_v52 = vld [vmem:[#allocation9 + $0x1a8] sm:$0xff]   ;;  %v3024_v54 = vcombine.high %v160_v44, %v164_v45  ;;  %v168_v59 = vld [vmem:[#allocation7 + $0x180] sm:$0xff]  ;;  %v3440_v0 = vld [vmem:[#allocation9 + $0x178] sm:$0xff]   ;;  %v3023_v1 = vcombine.low %v160_v44, %v164_v45 }
  0x53   :  { %1154 = vmatmul.mubr.bf16.gmra.mrb[4].mxu1 %v2993_v7  ;;  %1064 = vmatprep.mubr.bf16.mxu0 %v3000_v13  ;;  %v172_v61 = vld [vmem:[#allocation7 + $0x1a0] sm:$0xff]  ;;  %v169_v62 = vld [vmem:[#allocation7 + $0x188] sm:$0xff]  ;;  %v3441_v2 = vld [vmem:[#allocation9 + $0x138] sm:$0xff]  }
  0x54   :  { %1161 = vmatprep.mubr.bf16.mxu1 %v3002_v15  ;;  %3245 = vmatpush3.bf16.msra.mxu0 %v3421_v17  ;;  %v173_v63 = vld [vmem:[#allocation7 + $0x1a8] sm:$0xff]  ;;  %v3032_v4 = vcombine.high %v168_v59, %v172_v61  ;;  %v3442_v5 = vld [vmem:[#allocation9 + $0x1f8] sm:$0xff]   ;;  %v176_v8 = vld [vmem:[#allocation7 + $0x1c0] sm:$0xff]  ;;  %v3031_v12 = vcombine.low %v168_v59, %v172_v61 }
  0x55   :  { %3309 = vmatpush3.bf16.msra.mxu1 %v3423_v20  ;;  %3246 = vmatprep.subr.bf16.mxu0 %v3424_v28  ;;  %v3034_v6 = vcombine.high %v169_v62, %v173_v63  ;;  %v3443_v7 = vld [vmem:[#allocation9 + $0x1b8] sm:$0xff]   ;;  %v180_v9 = vld [vmem:[#allocation7 + $0x1e0] sm:$0xff]  ;;  %v177_v10 = vld [vmem:[#allocation7 + $0x1c8] sm:$0xff]  ;;  %v3033_v13 = vcombine.low %v169_v62, %v173_v63 }
  0x56   :  { %3310 = vmatprep.subr.bf16.mxu1 %v3426_v30  ;;  %v181_v11 = vld [vmem:[#allocation7 + $0x1e8] sm:$0xff]  ;;  %v3040_v14 = vcombine.high %v176_v8, %v180_v9  ;;  %v122_v16 = vld [vmem:[#allocation7 + $0x10] sm:$0xff]  ;;  %v123_v18 = vld [vmem:[#allocation7 + $0x18] sm:$0xff]  ;;  %v3039_v20 = vcombine.low %v176_v8, %v180_v9  ;;  %v5449_v8 = vmov 0 }
  0x57   :  { %v3042_v15 = vcombine.high %v177_v10, %v181_v11  ;;  %v126_v17 = vld [vmem:[#allocation7 + $0x30] sm:$0xff]  ;;  %v3041_v21 = vcombine.low %v177_v10, %v181_v11  ;;  %v131_v26 = vld [vmem:[#allocation7 + $0x58] sm:$0xff] }
  0x58   :  { %3247 = vmatpush3.bf16.msra.mxu0 %v3425_v29  ;;  %v2988_v22 = vcombine.high %v122_v16, %v126_v17  ;;  %v134_v25 = vld [vmem:[#allocation7 + $0x70] sm:$0xff]  ;;  %v2987_v28 = vcombine.low %v122_v16, %v126_v17  ;;  %v139_v34 = vld [vmem:[#allocation7 + $0x98] sm:$0xff] }
  0x59   :  { %3311 = vmatpush3.bf16.msra.mxu1 %v3427_v31  ;;  %3248 = vmatprep.subr.bf16.mxu0 %v3428_v36  ;;  %v138_v32 = vld [vmem:[#allocation7 + $0x90] sm:$0xff]  ;;  %v143_v35 = vld [vmem:[#allocation7 + $0xb8] sm:$0xff] }
  0x5a   :  { %1065 = vmatmul.mubr.bf16.gmra.mrb[8].mxu0 %v2999_v19  ;;  %3312 = vmatprep.subr.bf16.mxu1 %v3430_v41  ;;  %v127_v19 = vld [vmem:[#allocation7 + $0x38] sm:$0xff]  ;;  %v142_v33 = vld [vmem:[#allocation7 + $0xb0] sm:$0xff]  ;;  %v3005_v46 = vcombine.low %v139_v34, %v143_v35 }
  0x5b   :  { %1162 = vmatmul.mubr.bf16.gmra.mrb[8].mxu1 %v3001_v23  ;;  %1072 = vmatprep.mubr.bf16.mxu0 %v3008_v24  ;;  %v2990_v23 = vcombine.high %v123_v18, %v127_v19  ;;  %v130_v24 = vld [vmem:[#allocation7 + $0x50] sm:$0xff]  ;;  %v2989_v29 = vcombine.low %v123_v18, %v127_v19  ;;  %v151_v44 = vld [vmem:[#allocation7 + $0xf8] sm:$0xff]  ;;  %v3003_v45 = vcombine.low %v138_v32, %v142_v33 }
  0x5c   :  { %1169 = vmatprep.mubr.bf16.mxu1 %v3010_v27  ;;  %3249 = vmatpush3.bf16.msra.mxu0 %v3429_v38  ;;  %v135_v27 = vld [vmem:[#allocation7 + $0x78] sm:$0xff]  ;;  %v2996_v30 = vcombine.high %v130_v24, %v134_v25  ;;  %v2995_v36 = vcombine.low %v130_v24, %v134_v25  ;;  %v3004_v38 = vcombine.high %v138_v32, %v142_v33  ;;  %v150_v41 = vld [vmem:[#allocation7 + $0xf0] sm:$0xff] }
  0x5d   :  { %3313 = vmatpush3.bf16.msra.mxu1 %v3431_v43  ;;  %3250 = vmatprep.subr.bf16.mxu0 %v3432_v48  ;;  %v2998_v31 = vcombine.high %v131_v26, %v135_v27  ;;  %v147_v43 = vld [vmem:[#allocation7 + $0xd8] sm:$0xff] }
  0x5e   :  { %3314 = vmatprep.subr.bf16.mxu1 %v3434_v50  ;;  %v3014_v48 = vcombine.high %v147_v43, %v151_v44  ;;  %v3978_v32 = vld [vmem:[#allocation7 + $0x198] sm:$0xff] }
  0x5f   :  { %v3980_v33 = vld [vmem:[#allocation7 + $0x1b8] sm:$0xff] }
  0x60   :  { %3251 = vmatpush3.bf16.msra.mxu0 %v3433_v49 }
  0x61   :  { %3315 = vmatpush3.bf16.msra.mxu1 %v3435_v52  ;;  %3252 = vmatprep.subr.bf16.mxu0 %v3436_v56  ;;  %v154_v52 = vld [vmem:[#allocation7 + $0x110] sm:$0xff] }
  0x62   :  { %1073 = vmatmul.mubr.bf16.gmra.mrb[12].mxu0 %v3007_v37  ;;  %3316 = vmatprep.subr.bf16.mxu1 %v3438_v58  ;;  %v2997_v37 = vcombine.low %v131_v26, %v135_v27  ;;  %v3855_v58 = vld [vmem:[%s5339_s3] ss:$0 sm:$0xff] }
  0x63   :  { %1170 = vmatmul.mubr.bf16.gmra.mrb[12].mxu1 %v3009_v39  ;;  %1080 = vmatprep.mubr.bf16.mxu0 %v3016_v40  ;;  %v3006_v39 = vcombine.high %v139_v34, %v143_v35  ;;  %v146_v40 = vld [vmem:[#allocation7 + $0xd0] sm:$0xff] }
  0x64   :  { %1177 = vmatprep.mubr.bf16.mxu1 %v3018_v42  ;;  %3253 = vmatpush3.bf16.msra.mxu0 %v3437_v57  ;;  %v1488_v42 = vlaneseq  ;;  %v3012_v47 = vcombine.high %v146_v40, %v150_v41  ;;  %v3011_v56 = vcombine.low %v146_v40, %v150_v41  ;;  %v3013_v57 = vcombine.low %v147_v43, %v151_v44 }
  0x65   :  { %3317 = vmatpush3.bf16.msra.mxu1 %v3439_v60  ;;  %3254 = vmatprep.subr.bf16.mxu0 %v3440_v0  ;;  %v5446_v0 = vmov 0 }
  0x66   :  { %3318 = vmatprep.subr.bf16.mxu1 %v3442_v5  ;;  %v3847_v49 = vshrl.u32 %v1488_v42, 7 }
  0x68   :  { %3255 = vmatpush3.bf16.msra.mxu0 %v3441_v2  ;;  %v1491_v50 = vadd.s32 16, %v3847_v49  ;;  %v1490_v61 = vadd.s32 8, %v3847_v49  ;;  %v3879_v2 = vld [vmem:[#allocation7 + $0x170] sm:$0xff]  ;;  %v1494_v19 = vadd.s32 40, %v3847_v49  ;;  %v1497_v43 = vadd.s32 64, %v3847_v49 }
  0x69   :  { %3319 = vmatpush3.bf16.msra.mxu1 %v3443_v7  ;;  %v3891_v7 = vld [vmem:[#allocation7 + $0x178] sm:$0xff] }
  0x6a   :  { %1081 = vmatmul.mubr.bf16.gmra.mrb[16].mxu0 %v3015_v51  ;;  %v3850_v51 = vand.u32 127, %v1488_v42 }
  0x6b   :  { %1178 = vmatmul.mubr.bf16.gmra.mrb[16].mxu1 %v3017_v53  ;;  %1088 = vmatprep.mubr.bf16.mxu0 %v3024_v54  ;;  %v158_v53 = vld [vmem:[#allocation7 + $0x130] sm:$0xff]  ;;  %v155_v54 = vld [vmem:[#allocation7 + $0x118] sm:$0xff] }
  0x6c   :  { %1185 = vmatprep.mubr.bf16.mxu1 %v3026_v55  ;;  %5445 = vst [vmem:[#allocation13_spill] sm:$0xff] %v3850_v51  ;;  %v159_v55 = vld [vmem:[#allocation7 + $0x138] sm:$0xff]  ;;  %v3020_v59 = vcombine.high %v154_v52, %v158_v53  ;;  %vm2016_vm1 = vcmp.ne.s32.totalorder %v1491_v50, %v3850_v51  ;;  %vm5352_vm2 = vcmp.lt.s32.totalorder %v3850_v51, 8  ;;  %vm2014_vm4 = vcmp.ne.s32.totalorder %v3847_v49, %v3850_v51 }
  0x6d   :  { %v3022_v60 = vcombine.high %v155_v54, %v159_v55  ;;  %vm2015_vm8 = vcmp.ne.s32.totalorder %v1490_v61, %v3850_v51  ;;  %v3019_v9 = vcombine.low %v154_v52, %v158_v53  ;;  %v3021_v11 = vcombine.low %v155_v54, %v159_v55  ;;  %v4074_v61 = vld [vmem:[#allocation7 + $0x1f0] sm:$0xff] }
  0x6e   :  { %v1498_v50 = vadd.s32 72, %v3847_v49  ;;  %v5468_v53 = vmov 0 }
  0x72   :  { %1089 = vmatmul.mubr.bf16.gmra.mrb[20].mxu0 %v3023_v1  ;;  %v3877_v1 = vld [vmem:[#allocation7 + $0x150] sm:$0xff] }
  0x73   :  { %1186 = vmatmul.mubr.bf16.gmra.mrb[20].mxu1 %v3025_v3  ;;  %1096 = vmatprep.mubr.bf16.mxu0 %v3032_v4  ;;  %v1492_v4 = vadd.s32 24, %v3847_v49  ;;  %v3027_v34 = vcombine.low %v3877_v1, %v3879_v2 }
  0x74   :  { %1193 = vmatprep.mubr.bf16.mxu1 %v3034_v6  ;;  %v3889_v6 = vld [vmem:[#allocation7 + $0x158] sm:$0xff] }
  0x75   :  { %v3030_v18 = vcombine.high %v3889_v6, %v3891_v7  ;;  %vm2017_vm14 = vcmp.ne.s32.totalorder %v1492_v4, %v3850_v51  ;;  %v4096_v4 = vld [vmem:[#allocation7 + $0x1d8] sm:$0xff] }
  0x7a   :  { %1097 = vmatmul.mubr.bf16.gmra.mrb[24].mxu0 %v3031_v12  ;;  %v1493_v12 = vadd.s32 32, %v3847_v49 }
  0x7b   :  { %1194 = vmatmul.mubr.bf16.gmra.mrb[24].mxu1 %v3033_v13  ;;  %1104 = vmatprep.mubr.bf16.mxu0 %v3040_v14  ;;  %v3028_v14 = vcombine.high %v3877_v1, %v3879_v2  ;;  %v1499_v1 = vadd.s32 80, %v3847_v49 }
  0x7c   :  { %1201 = vmatprep.mubr.bf16.mxu1 %v3042_v15  ;;  %v5452_v15 = vmov 0 }
  0x82   :  { %1105 = vmatmul.mubr.bf16.gmra.mrb[28].mxu0 %v3039_v20 }
  0x83   :  { %1202 = vmatmul.mubr.bf16.gmra.mrb[28].mxu1 %v3041_v21  ;;  %1242 = vmatprep.mubr.bf16.mxu0 %v2988_v22 }
  0x84   :  { %1339 = vmatprep.mubr.bf16.mxu1 %v2990_v23  ;;  %v1495_v23 = vadd.s32 48, %v3847_v49 }
  0x8a   :  { %1243 = vmatmul.mubr.bf16.vlgmr.msra.gmra.mrb[32].mxu0 %v2987_v28 }
  0x8b   :  { %1340 = vmatmul.mubr.bf16.vlgmr.msra.gmra.mrb[32].mxu1 %v2989_v29  ;;  %1250 = vmatprep.mubr.bf16.mxu0 %v2996_v30  ;;  %v3967_v29 = vld [vmem:[#allocation7 + $0x190] sm:$0xff] }
  0x8c   :  { %1347 = vmatprep.mubr.bf16.mxu1 %v2998_v31  ;;  %v3969_v30 = vld [vmem:[#allocation7 + $0x1b0] sm:$0xff]  ;;  %v5459_v31 = vmov 0 }
  0x8d   :  { %v3036_v42 = vcombine.high %v3967_v29, %v3969_v30 }
  0x92   :  { %1251 = vmatmul.mubr.bf16.gmra.mrb[36].mxu0 %v2995_v36  ;;  %v1496_v36 = vadd.s32 56, %v3847_v49 }
  0x93   :  { %1348 = vmatmul.mubr.bf16.gmra.mrb[36].mxu1 %v2997_v37  ;;  %1258 = vmatprep.mubr.bf16.mxu0 %v3004_v38  ;;  %v5462_v38 = vmov 0 }
  0x94   :  { %1355 = vmatprep.mubr.bf16.mxu1 %v3006_v39  ;;  %v3029_v39 = vcombine.low %v3889_v6, %v3891_v7  ;;  %v4098_v6 = vld [vmem:[#allocation7 + $0x1f8] sm:$0xff]  ;;  %v5473_v7 = vmov 0 }
  0x9a   :  { %1259 = vmatmul.mubr.bf16.gmra.mrb[40].mxu0 %v3003_v45  ;;  %v3038_v45 = vcombine.high %v3978_v32, %v3980_v33 }
  0x9b   :  { %1356 = vmatmul.mubr.bf16.gmra.mrb[40].mxu1 %v3005_v46  ;;  %1266 = vmatprep.mubr.bf16.mxu0 %v3012_v47  ;;  %v5465_v46 = vmov 0 }
  0x9c   :  { %1363 = vmatprep.mubr.bf16.mxu1 %v3014_v48 }
  0xa2   :  { %1267 = vmatmul.mubr.bf16.gmra.mrb[44].mxu0 %v3011_v56 }
  0xa3   :  { %1364 = vmatmul.mubr.bf16.gmra.mrb[44].mxu1 %v3013_v57  ;;  %1274 = vmatprep.mubr.bf16.mxu0 %v3020_v59 }
  0xa4   :  { %1371 = vmatprep.mubr.bf16.mxu1 %v3022_v60  ;;  %v4072_v60 = vld [vmem:[#allocation7 + $0x1d0] sm:$0xff] }
  0xa7   :  { %v3860_v62 = vpop.permute.xlu1 %1551  ;;  %v1546_v63 = vpop.permute.xlu0 %1545 }
  0xa8   :  { %vm5347_vm3 = vcmp.eq.s32.totalorder %v3860_v62, %v3855_v58  ;;  %vm1596_vm5 = vcmp.eq.s32.totalorder %v1546_v63, %v3855_v58 }
  0xa9   :  { %vm2032_vm6 = vmand %vm5347_vm3, %vm2016_vm1 }
  0xaa   :  { %vm3872_vm7 = vmand %vm2032_vm6, %vm5352_vm2  ;;  %1275 = vmatmul.mubr.bf16.gmra.mrb[48].mxu0 %v3019_v9  ;;  %vm2018_vm6 = vcmp.ne.s32.totalorder %v1493_v12, %v3850_v51  ;;  %v3035_v9 = vcombine.low %v3967_v29, %v3969_v30  ;;  %v1501_v29 = vadd.s32 96, %v3847_v49 }
  0xab   :  { %v5447_v0 = vsel %vm3872_vm7, 4294967295, %v5446_v0  ;;  %vm2030_vm9 = vmand %vm1596_vm5, %vm2014_vm4  ;;  %v1549_v3 = vpop.permute.xlu0 %1548  ;;  %v3887_v5 = vsel %vm3872_vm7, %v3850_v51, 1073741824  ;;  %1372 = vmatmul.mubr.bf16.gmra.mrb[48].mxu1 %v3021_v11  ;;  %1282 = vmatprep.mubr.bf16.mxu0 %v3028_v14  ;;  %v3037_v11 = vcombine.low %v3978_v32, %v3980_v33  ;;  %v5505_v32 = vmov 0 }
  0xac   :  { %5448 = vst [vmem:[#allocation14_spill] sm:$0xff] %v5447_v0  ;;  %vm3895_vm10 = vmand %vm2030_vm9, %vm5352_vm2  ;;  %vm1597_vm11 = vcmp.eq.s32.totalorder %v1549_v3, %v3855_v58  ;;  %v2107_v10 = vshra.s32 %v3887_v5, 16  ;;  %1379 = vmatprep.mubr.bf16.mxu1 %v3030_v18  ;;  %v5476_v18 = vmov 0 }
  0xad   :  { %v5450_v8 = vsel %vm3895_vm10, 4294967295, %v5449_v8  ;;  %vm2031_vm12 = vmand %vm1597_vm11, %vm2015_vm8  ;;  %v3907_v13 = vsel %vm3895_vm10, %v3850_v51, 1073741824  ;;  %v3932_v21 = vpop.permute.xlu1 %1554  ;;  %vm5488_vm10 = vcmp.ne.s32.totalorder %v1499_v1, %v3850_v51  ;;  %v5493_v1 = vmov 0 }
  0xae   :  { %5451 = vst [vmem:[#allocation15_spill] sm:$0xff] %v5450_v8  ;;  %vm3913_vm13 = vmand %vm2031_vm12, %vm5352_vm2  ;;  %v3917_v16 = vcvt.s32.f32 %v2107_v10  ;;  %v2079_v17 = vshra.s32 %v3907_v13, 16  ;;  %v1500_v10 = vadd.s32 88, %v3847_v49 }
  0xaf   :  { %v5453_v15 = vsel %vm3913_vm13, 4294967295, %v5452_v15  ;;  %v3927_v20 = vsel %vm3913_vm13, %v3850_v51, 1073741824  ;;  %vm1613_vm1 = vmxor %vm1596_vm5, %vm5348_vm15  ;;  %vm5344_vm5 = vcmp.eq.s32.totalorder %v3932_v21, %v3855_v58  ;;  %v3948_v26 = vpop.permute.xlu0 %1557 }
  0xb0   :  { %5454 = vst [vmem:[#allocation16_spill] sm:$0xff] %v5453_v15  ;;  %2110 = vmin.xlane.f32.xlu1 %v3917_v16  ;;  %v3935_v22 = vcvt.s32.f32 %v2079_v17  ;;  %v2093_v24 = vshra.s32 %v3927_v20, 16  ;;  %vm3941_vm4 = vmand %vm1613_vm1, %vm5352_vm2  ;;  %vm5343_vm12 = vcmp.eq.s32.totalorder %v3948_v26, %v3855_v58  ;;  %v3044_v17 = vcombine.high %v4072_v60, %v4074_v61 }
  0xb1   :  { %vm3953_vm8 = vmxor %vm1597_vm11, %vm5348_vm15  ;;  %v3989_v35 = vpop.permute.xlu1 %1560  ;;  %vm2025_vm7 = vcmp.ne.s32.totalorder %v1500_v10, %v3850_v51 }
  0xb2   :  { %vm2033_vm9 = vmand %vm5344_vm5, %vm2017_vm14  ;;  %2082 = vmin.xlane.f32.xlu0 %v3935_v22  ;;  %v3965_v28 = vcvt.s32.f32 %v2093_v24  ;;  %vm2019_vm14 = vcmp.ne.s32.totalorder %v1494_v19, %v3850_v51  ;;  %1283 = vmatmul.mubr.bf16.gmra.mrb[52].mxu0 %v3027_v34  ;;  %v3046_v24 = vcombine.high %v4096_v4, %v4098_v6 }
  0xb3   :  { %vm3973_vm11 = vmand %vm2033_vm9, %vm5352_vm2  ;;  %vm2020_vm9 = vcmp.ne.s32.totalorder %v1495_v23, %v3850_v51  ;;  %v4008_v40 = vpop.permute.xlu0 %1563  ;;  %1380 = vmatmul.mubr.bf16.gmra.mrb[52].mxu1 %v3029_v39  ;;  %1290 = vmatprep.mubr.bf16.mxu0 %v3036_v42  ;;  %v5490_v42 = vmov 0 }
  0xb4   :  { %v5460_v31 = vsel %vm3973_vm11, 4294967295, %v5459_v31  ;;  %vm2034_vm1 = vmand %vm5343_vm12, %vm2018_vm6  ;;  %v3996_v37 = vsel %vm3973_vm11, %v3850_v51, 1073741824  ;;  %vm5345_vm6 = vcmp.eq.s32.totalorder %v3989_v35, %v3855_v58  ;;  %vm5346_vm12 = vcmp.eq.s32.totalorder %v4008_v40, %v3855_v58  ;;  %1387 = vmatprep.mubr.bf16.mxu1 %v3038_v45 }
  0xb5   :  { %5461 = vst [vmem:[#allocation17_spill] sm:$0xff] %v5460_v31  ;;  %vm4000_vm0 = vmand %vm2034_vm1, %vm5352_vm2  ;;  %v2121_v41 = vshra.s32 %v3996_v37, 16  ;;  %v4056_v54 = vpop.permute.xlu1 %1566  ;;  %v1502_v45 = vadd.s32 104, %v3847_v49 }
  0xb6   :  { %v5463_v38 = vsel %vm4000_vm0, 4294967295, %v5462_v38  ;;  %vm2035_vm1 = vmand %vm5345_vm6, %vm2019_vm14  ;;  %2096 = vmin.xlane.f32.xlu0 %v3965_v28  ;;  %v4025_v44 = vsel %vm4000_vm0, %v3850_v51, 1073741824  ;;  %vm2021_vm6 = vcmp.ne.s32.totalorder %v1496_v36, %v3850_v51 }
  0xb7   :  { %5464 = vst [vmem:[#allocation18_spill] sm:$0xff] %v5463_v38  ;;  %vm4031_vm5 = vmand %vm2035_vm1, %vm5352_vm2  ;;  %v4035_v47 = vcvt.s32.f32 %v2121_v41  ;;  %v2135_v48 = vshra.s32 %v4025_v44, 16  ;;  %v4064_v57 = vpop.permute.xlu0 %1569 }
  0xb8   :  { %v5466_v46 = vsel %vm4031_vm5, 4294967295, %v5465_v46  ;;  %vm2036_vm14 = vmand %vm5346_vm12, %vm2020_vm9  ;;  %v4048_v52 = vsel %vm4031_vm5, %v3850_v51, 1073741824  ;;  %vm5350_vm9 = vcmp.eq.s32.totalorder %v4056_v54, %v3855_v58  ;;  %vm2022_vm12 = vcmp.ne.s32.totalorder %v1497_v43, %v3850_v51 }
  0xb9   :  { %5467 = vst [vmem:[#allocation19_spill] sm:$0xff] %v5466_v46  ;;  %vm4052_vm1 = vmand %vm2036_vm14, %vm5352_vm2  ;;  %v4058_v55 = vcvt.s32.f32 %v2135_v48  ;;  %v2149_v56 = vshra.s32 %v4048_v52, 16  ;;  %vm5351_vm15 = vcmp.eq.s32.totalorder %v4064_v57, %v3855_v58  ;;  %v4132_v19 = vpop.permute.xlu1 %1572 }
  0xba   :  { %v5469_v53 = vsel %vm4052_vm1, 4294967295, %v5468_v53  ;;  %2124 = vmin.xlane.f32.xlu0 %v4035_v47  ;;  %v4070_v59 = vsel %vm4052_vm1, %v3850_v51, 1073741824  ;;  %vm4080_vm14 = vmand %vm3953_vm8, %vm5352_vm2  ;;  %1291 = vmatmul.mubr.bf16.gmra.mrb[56].mxu0 %v3035_v9  ;;  %v1503_v9 = vadd.s32 112, %v3847_v49 }
  0xbb   :  { %5470 = vst [vmem:[#allocation20_spill] sm:$0xff] %v5469_v53  ;;  %vm2037_vm3 = vmand %vm5350_vm9, %vm2021_vm6  ;;  %2138 = vmin.xlane.f32.xlu1 %v4058_v55  ;;  %v4093_v2 = vcvt.s32.f32 %v2149_v56  ;;  %v2163_v3 = vshra.s32 %v4070_v59, 16  ;;  %v4141_v27 = vpop.permute.xlu0 %1575  ;;  %1388 = vmatmul.mubr.bf16.gmra.mrb[56].mxu1 %v3037_v11  ;;  %v5497_v11 = vmov 0 }
  0xbc   :  { %vm4102_vm8 = vmand %vm2037_vm3, %vm5352_vm2  ;;  %vm5358_vm0 = vcmp.eq.s32.totalorder %v4141_v27, %v3855_v58  ;;  %1298 = vmatprep.mubr.bf16.mxu0 %v3044_v17  ;;  %1395 = vmatprep.mubr.bf16.mxu1 %v3046_v24  ;;  %v1504_v24 = vadd.s32 120, %v3847_v49 }
  0xbd   :  { %v5474_v7 = vsel %vm4102_vm8, 4294967295, %v5473_v7  ;;  %vm2038_vm9 = vmand %vm5351_vm15, %vm2022_vm12  ;;  %v4117_v12 = vcvt.s32.f32 %v2163_v3  ;;  %v4122_v14 = vsel %vm4102_vm8, %v3850_v51, 1073741824  ;;  %vm5359_vm12 = vcmp.eq.s32.totalorder %v4132_v19, %v3855_v58  ;;  %v4180_v36 = vpop.permute.xlu1 %1578 }
  0xbe   :  { %5475 = vst [vmem:[#allocation21_spill] sm:$0xff] %v5474_v7  ;;  %vm4128_vm3 = vmand %vm2038_vm9, %vm5352_vm2  ;;  %2152 = vmin.xlane.f32.xlu0 %v4093_v2  ;;  %v2177_v23 = vshra.s32 %v4122_v14, 16  ;;  %vm5479_vm9 = vmmov 1   ;;  %vm5480_vm2 = vcmp.eq.s32.totalorder %v3860_v62, %v3855_v58  ;;  %vm5483_vm15 = vcmp.ne.s32.totalorder %v1498_v50, %v3850_v51 }
  0xbf   :  { %v5477_v18 = vsel %vm4128_vm3, 4294967295, %v5476_v18  ;;  %2166 = vmin.xlane.f32.xlu1 %v4117_v12  ;;  %v4148_v30 = vsel %vm4128_vm3, %v3850_v51, 1073741824  ;;  %vm4154_vm6 = vmxor %vm5480_vm2, %vm5479_vm9  ;;  %vm5484_vm2 = vcmp.lt.s32.totalorder %v3850_v51, 8  ;;  %v5485_v62 = vmov 0  ;;  %v4199_v43 = vpop.permute.xlu0 %1581 }
  0xc0   :  { %5478 = vst [vmem:[#allocation22_spill] sm:$0xff] %v5477_v18  ;;  %vm2039_vm1 = vmand %vm5359_vm12, %vm5483_vm15  ;;  %v4165_v33 = vcvt.s32.f32 %v2177_v23  ;;  %v2191_v34 = vshra.s32 %v4148_v30, 16  ;;  %v3043_v50 = vcombine.low %v4072_v60, %v4074_v61  ;;  %v3045_v3 = vcombine.low %v4096_v4, %v4098_v6 }
  0xc1   :  { %vm4170_vm3 = vmand %vm2039_vm1, %vm5484_vm2  ;;  %v1585_v4 = vpop.permute.xlu1 %1584  ;;  %vm2029_vm8 = vcmp.ne.s32.totalorder %v1504_v24, %v3850_v51  ;;  %v5521_v18 = vmov 0 }
  0xc2   :  { %v5486_v62 = vsel %vm4170_vm3, 4294967295, %v5485_v62  ;;  %vm2040_vm15 = vmand %vm5358_vm0, %vm5488_vm10  ;;  %2180 = vmin.xlane.f32.xlu0 %v4165_v33  ;;  %v4183_v39 = vcvt.s32.f32 %v2191_v34  ;;  %v4188_v41 = vsel %vm4170_vm3, %v3850_v51, 1073741824  ;;  %vm5361_vm10 = vcmp.eq.s32.totalorder %v4180_v36, %v3855_v58  ;;  %1299 = vmatmul.mubr.bf16.gmra.mrb[60].mxu0 %v3043_v50 }
  0xc3   :  { %5487 = vst [vmem:[#allocation23_spill] sm:$0xff] %v5486_v62  ;;  %vm5489_vm1 = vmmov %vm5484_vm2  ;;  %vm2026_vm0 = vcmp.ne.s32.totalorder %v1501_v29, %v3850_v51  ;;  %v2205_v48 = vshra.s32 %v4188_v41, 16  ;;  %v1588_v23 = vpop.permute.xlu0 %1587  ;;  %1396 = vmatmul.mubr.bf16.gmra.mrb[60].mxu1 %v3045_v3 }
  0xc4   :  { %vm4192_vm2 = vmand %vm2040_vm15, %vm5489_vm1  ;;  %vm5362_vm15 = vcmp.eq.s32.totalorder %v4199_v43, %v3855_v58  ;;  %2194 = vmin.xlane.f32.xlu1 %v4183_v39 }
  0xc5   :  { %v5491_v42 = vsel %vm4192_vm2, 4294967295, %v5490_v42  ;;  %vm2041_vm12 = vmand %vm5361_vm10, %vm2025_vm7  ;;  %v4214_v56 = vsel %vm4192_vm2, %v3850_v51, 1073741824  ;;  %v4225_v10 = vcvt.s32.f32 %v2205_v48  ;;  %vm2027_vm10 = vcmp.ne.s32.totalorder %v1502_v45, %v3850_v51  ;;  %v1591_v3 = vpop.permute.xlu1 %1590 }
  0xc6   :  { %5492 = vst [vmem:[#allocation24_spill] sm:$0xff] %v5491_v42  ;;  %vm4218_vm3 = vmand %vm2041_vm12, %vm5489_vm1  ;;  %v2219_v60 = vshra.s32 %v4214_v56, 16 }
  0xc7   :  { %v5494_v1 = vsel %vm4218_vm3, 4294967295, %v5493_v1  ;;  %vm2042_vm7 = vmand %vm5362_vm15, %vm2026_vm0  ;;  %v4234_v61 = vsel %vm4218_vm3, %v3850_v51, 1073741824  ;;  %2208 = vmin.xlane.f32.xlu0 %v4225_v10  ;;  %vm2028_vm15 = vcmp.ne.s32.totalorder %v1503_v9, %v3850_v51  ;;  %vm5371_vm0 = vcmp.eq.s32.totalorder %v1588_v23, %v3855_v58 }
  0xc8   :  { %5495 = vst [vmem:[#allocation25_spill] sm:$0xff] %v5494_v1  ;;  %vm5496_vm12 = vmmov %vm5489_vm1  ;;  %v4244_v6 = vcvt.s32.f32 %v2219_v60  ;;  %v2233_v17 = vshra.s32 %v4234_v61, 16  ;;  %v5509_v9 = vmov 0 }
  0xc9   :  { %vm4238_vm1 = vmand %vm2042_vm7, %vm5496_vm12 }
  0xca   :  { %v5498_v11 = vsel %vm4238_vm1, 4294967295, %v5497_v11  ;;  %v4252_v29 = vsel %vm4238_vm1, %v3850_v51, 1073741824  ;;  %vm5500_vm7 = vmmov %vm5496_vm12  ;;  %2222 = vmin.xlane.f32.xlu1 %v4244_v6  ;;  %v4265_v49 = vcvt.s32.f32 %v2233_v17  ;;  %vm5503_vm1 = vcmp.eq.s32.totalorder %v1585_v4, %v3855_v58 }
  0xcb   :  { %5499 = vst [vmem:[#allocation26_spill] sm:$0xff] %v5498_v11  ;;  %vm4258_vm12 = vmand %vm4154_vm6, %vm5500_vm7  ;;  %v2247_v48 = vshra.s32 %v4252_v29, 16  ;;  %v5514_v11 = vmov 0 }
  0xcc   :  { %vm2043_vm2 = vmand %vm5503_vm1, %vm2027_vm10  ;;  %2236 = vmin.xlane.f32.xlu0 %v4265_v49  ;;  %vm5372_vm1 = vcmp.eq.s32.totalorder %v1591_v3, %v3855_v58 }
  0xcd   :  { %vm5504_vm6 = vmmov %vm5500_vm7  ;;  %v4279_v50 = vcvt.s32.f32 %v2247_v48 }
  0xce   :  { %vm4274_vm7 = vmand %vm2043_vm2, %vm5504_vm6 }
  0xcf   :  { %v5506_v32 = vsel %vm4274_vm7, 4294967295, %v5505_v32  ;;  %vm2044_vm3 = vmand %vm5371_vm0, %vm2028_vm15  ;;  %v4287_v45 = vsel %vm4274_vm7, %v3850_v51, 1073741824  ;;  %2250 = vmin.xlane.f32.xlu1 %v4279_v50  ;;  %vm5523_vm0 = vcmp.eq.s32.totalorder %v3948_v26, %v3855_v58  ;;  %v5530_v26 = vmov 0 }
  0xd0   :  { %5507 = vst [vmem:[#allocation27_spill] sm:$0xff] %v5506_v32  ;;  %vm5508_vm2 = vmmov %vm5504_vm6  ;;  %v2261_v60 = vshra.s32 %v4287_v45, 16 }
  0xd1   :  { %vm4291_vm10 = vmand %vm2044_vm3, %vm5508_vm2 }
  0xd2   :  { %v5510_v9 = vsel %vm4291_vm10, 4294967295, %v5509_v9  ;;  %v4301_v17 = vsel %vm4291_vm10, %v3850_v51, 1073741824  ;;  %vm2045_vm15 = vmand %vm5372_vm1, %vm2029_vm8  ;;  %v4305_v24 = vcvt.s32.f32 %v2261_v60  ;;  %vm5519_vm8 = vcmp.eq.s32.totalorder %v3932_v21, %v3855_v58 }
  0xd3   :  { %5511 = vst [vmem:[#allocation28_spill] sm:$0xff] %v5510_v9  ;;  %5512 = vst [vmem:[#allocation29_spill] sm:$0xff] %v4301_v17  ;;  %v2275_v48 = vshra.s32 %v4301_v17, 16  ;;  %v5526_v21 = vmov 0 }
  0xd4   :  { %vm5513_vm3 = vmmov %vm5508_vm2  ;;  %2264 = vmin.xlane.f32.xlu0 %v4305_v24 }
  0xd5   :  { %vm4310_vm6 = vmand %vm2045_vm15, %vm5513_vm3  ;;  %v4315_v42 = vcvt.s32.f32 %v2275_v48 }
  0xd6   :  { %v5515_v11 = vsel %vm4310_vm6, 4294967295, %v5514_v11  ;;  %v4320_v9 = vsel %vm4310_vm6, %v3850_v51, 1073741824  ;;  %vm1616_vm2 = vmxor %vm5519_vm8, %vm5479_vm9 }
  0xd7   :  { %5516 = vst [vmem:[#allocation30_spill] sm:$0xff] %v5515_v11  ;;  %5517 = vst [vmem:[#allocation31_spill] sm:$0xff] %v4315_v42  ;;  %v2289_v60 = vshra.s32 %v4320_v9, 16  ;;  %2278 = vmin.xlane.f32.xlu1 %v4315_v42 }
  0xd8   :  { %5518 = vst [vmem:[#allocation32_spill] sm:$0xff] %v4320_v9  ;;  %vm5520_vm15 = vmmov %vm5513_vm3 }
  0xd9   :  { %vm4329_vm3 = vmand %vm1616_vm2, %vm5520_vm15  ;;  %v4338_v48 = vcvt.s32.f32 %v2289_v60  ;;  %vm5528_vm2 = vcmp.eq.s32.totalorder %v3989_v35, %v3855_v58  ;;  %v5534_v60 = vmov 0  ;;  %v5539_v35 = vmov 0 }
  0xda   :  { %v5522_v18 = vsel %vm4329_vm3, 4294967295, %v5521_v18  ;;  %vm1617_vm1 = vmxor %vm5523_vm0, %vm5479_vm9  ;;  %vm5532_vm0 = vcmp.eq.s32.totalorder %v4008_v40, %v3855_v58  ;;  %v5542_v40 = vmov 0 }
  0xdb   :  { %5524 = vst [vmem:[#allocation33_spill] sm:$0xff] %v4338_v48  ;;  %vm5525_vm10 = vmmov %vm5520_vm15  ;;  %2292 = vmin.xlane.f32.xlu0 %v4338_v48 }
  0xdc   :  { %vm4342_vm8 = vmand %vm1617_vm1, %vm5525_vm10 }
  0xdd   :  { %v5527_v21 = vsel %vm4342_vm8, 4294967295, %v5526_v21  ;;  %vm1618_vm15 = vmxor %vm5528_vm2, %vm5479_vm9  ;;  %vm5536_vm2 = vcmp.eq.s32.totalorder %v4056_v54, %v3855_v58  ;;  %v5547_v54 = vmov 0 }
  0xde   :  { %vm5529_vm6 = vmmov %vm5525_vm10 }
  0xdf   :  { %vm4353_vm7 = vmand %vm1618_vm15, %vm5529_vm6 }
  0xe0   :  { %v5531_v26 = vsel %vm4353_vm7, 4294967295, %v5530_v26  ;;  %vm1619_vm10 = vmxor %vm5532_vm0, %vm5479_vm9  ;;  %vm5541_vm0 = vcmp.eq.s32.totalorder %v4064_v57, %v3855_v58  ;;  %v5550_v57 = vmov 0 }
  0xe1   :  { %vm5533_vm1 = vmmov %vm5529_vm6  ;;  %vm5537_vm6 = vcmp.eq.s32.totalorder %v1585_v4, %v3855_v58  ;;  %v5572_v4 = vmov 0 }
  0xe2   :  { %vm4363_vm5 = vmand %vm1619_vm10, %vm5533_vm1 }
  0xe3   :  { %v5535_v60 = vsel %vm4363_vm5, 4294967295, %v5534_v60  ;;  %vm1620_vm11 = vmxor %vm5536_vm2, %vm5479_vm9  ;;  %vm5544_vm2 = vcmp.eq.s32.totalorder %v1591_v3, %v3855_v58 }
  0xe4   :  { %vm1626_vm15 = vmxor %vm5537_vm6, %vm5479_vm9 }
  0xe5   :  { %vm5538_vm13 = vmmov %vm5533_vm1 }
  0xe6   :  { %vm4376_vm7 = vmand %vm1620_vm11, %vm5538_vm13  ;;  %vm5545_vm13 = vcmp.eq.s32.totalorder %v4132_v19, %v3855_v58  ;;  %v5554_v19 = vmov 0 }
  0xe7   :  { %v5540_v35 = vsel %vm4376_vm7, 4294967295, %v5539_v35  ;;  %vm1621_vm10 = vmxor %vm5541_vm0, %vm5479_vm9  ;;  %vm5549_vm0 = vcmp.eq.s32.totalorder %v4141_v27, %v3855_v58  ;;  %v5559_v27 = vmov 0 }
  0xe8   :  { %vm4386_vm5 = vmand %vm1621_vm10, %vm5533_vm1 }
  0xe9   :  { %v5543_v40 = vsel %vm4386_vm5, 4294967295, %v5542_v40  ;;  %vm1628_vm6 = vmxor %vm5544_vm2, %vm5479_vm9  ;;  %vm5552_vm2 = vcmp.eq.s32.totalorder %v4180_v36, %v3855_v58  ;;  %v5563_v36 = vmov 0 }
  0xea   :  { %vm1622_vm11 = vmxor %vm5545_vm13, %vm5479_vm9 }
  0xeb   :  { %vm5546_vm7 = vmmov %vm5533_vm1 }
  0xec   :  { %vm4399_vm8 = vmand %vm1622_vm11, %vm5546_vm7 }
  0xed   :  { %v5548_v54 = vsel %vm4399_vm8, 4294967295, %v5547_v54  ;;  %vm1623_vm10 = vmxor %vm5549_vm0, %vm5479_vm9  ;;  %vm5557_vm0 = vcmp.eq.s32.totalorder %v4199_v43, %v3855_v58  ;;  %v5568_v43 = vmov 0 }
  0xee   :  { %vm4409_vm5 = vmand %vm1623_vm10, %vm5533_vm1 }
  0xef   :  { %v5551_v57 = vsel %vm4409_vm5, 4294967295, %v5550_v57  ;;  %vm1624_vm13 = vmxor %vm5552_vm2, %vm5479_vm9 }
  0xf0   :  { %vm5553_vm7 = vmmov %vm5533_vm1 }
  0xf1   :  { %vm4419_vm11 = vmand %vm1624_vm13, %vm5553_vm7  ;;  %vm5566_vm13 = vcmp.eq.s32.totalorder %v1588_v23, %v3855_v58 }
  0xf2   :  { %v5555_v19 = vsel %vm4419_vm11, 4294967295, %v5554_v19  ;;  %vm1625_vm8 = vmxor %vm5557_vm0, %vm5479_vm9 }
  0xf3   :  { %5556 = vst [vmem:[#allocation34_spill] sm:$0xff] %v5555_v19  ;;  %vm5558_vm10 = vmmov %vm5533_vm1 }
  0xf4   :  { %vm4429_vm1 = vmand %vm1625_vm8, %vm5558_vm10 }
  0xf5   :  { %v5560_v27 = vsel %vm4429_vm1, 4294967295, %v5559_v27  ;;  %vm5562_vm5 = vmmov %vm5553_vm7 }
  0xf6   :  { %5561 = vst [vmem:[#allocation35_spill] sm:$0xff] %v5560_v27  ;;  %vm4435_vm2 = vmand %vm1626_vm15, %vm5562_vm5 }
  0xf7   :  { %v5564_v36 = vsel %vm4435_vm2, 4294967295, %v5563_v36  ;;  %vm1627_vm7 = vmxor %vm5566_vm13, %vm5479_vm9 }
  0xf8   :  { %5565 = vst [vmem:[#allocation36_spill] sm:$0xff] %v5564_v36  ;;  %vm5567_vm11 = vmmov %vm5562_vm5 }
  0xf9   :  { %vm4444_vm3 = vmand %vm1627_vm7, %vm5567_vm11 }
  0xfa   :  { %v5569_v43 = vsel %vm4444_vm3, 4294967295, %v5568_v43  ;;  %vm5571_vm8 = vmmov %vm5562_vm5 }
  0xfb   :  { %5570 = vst [vmem:[#allocation37_spill] sm:$0xff] %v5569_v43  ;;  %vm4450_vm0 = vmand %vm1628_vm6, %vm5571_vm8 }
  0xfc   :  { %v5573_v4 = vsel %vm4450_vm0, 4294967295, %v5572_v4 }
  0xfd   :  { %5574 = vst [vmem:[#allocation38_spill] sm:$0xff] %v5573_v4 }
 0x11d   :  { %v3128_v3 = vpop.f32.mrb[0].mxu0 }
 0x11e   :  { %v3192_v11 = vpop.f32.mrb[0].mxu1  ;;  %v3129_v53 = vpop.f32.mrb[1].mxu0 }
 0x11f   :  { %v3130_v38 = vadd.f32 %v3129_v53, %v3128_v3  ;;  %v3193_v0 = vpop.f32.mrb[1].mxu1  ;;  %v3131_v8 = vpop.f32.mrb[2].mxu0 }
 0x120   :  { %v3194_v58 = vadd.f32 %v3193_v0, %v3192_v11  ;;  %v3195_v23 = vpop.f32.mrb[2].mxu1  ;;  %v3132_v32 = vpop.f32.mrb[3].mxu0 }
 0x121   :  { %v3133_v42 = vadd.f32 %v3132_v32, %v3131_v8  ;;  %v3196_v17 = vpop.f32.mrb[3].mxu1 }
 0x122   :  { %v4454_v1 = vadd.f32 %v3194_v58, %v3130_v38  ;;  %v3197_v62 = vadd.f32 %v3196_v17, %v3195_v23 }
 0x124   :  { %v4456_v7 = vadd.f32 %v3197_v62, %v3133_v42 }
 0x125   :  { %v3134_v46 = vpop.f32.mrb[4].mxu0 }
 0x126   :  { %v3198_v31 = vpop.f32.mrb[4].mxu1  ;;  %v3135_v15 = vpop.f32.mrb[5].mxu0 }
 0x127   :  { %v3136_v51 = vadd.f32 %v3135_v15, %v3134_v46  ;;  %v3199_v4 = vpop.f32.mrb[5].mxu1  ;;  %v3137_v48 = vpop.f32.mrb[6].mxu0 }
 0x128   :  { %v3200_v43 = vadd.f32 %v3199_v4, %v3198_v31  ;;  %v3201_v53 = vpop.f32.mrb[6].mxu1  ;;  %v3138_v3 = vpop.f32.mrb[7].mxu0 }
 0x129   :  { %v3139_v9 = vadd.f32 %v3138_v3, %v3137_v48  ;;  %v3202_v0 = vpop.f32.mrb[7].mxu1 }
 0x12a   :  { %v4458_v11 = vadd.f32 %v3200_v43, %v3136_v51  ;;  %v3203_v8 = vadd.f32 %v3202_v0, %v3201_v53  ;;  %v2078_v0 = vand.u32 65535, %v3907_v13 }
 0x12c   :  { %v4460_v32 = vadd.f32 %v3203_v8, %v3139_v9  ;;  %v2106_v9 = vand.u32 65535, %v3887_v5  ;;  %v2080_v5 = vcvt.s32.f32 %v2078_v0 }
 0x12d   :  { %v3140_v38 = vpop.f32.mrb[8].mxu0 }
 0x12e   :  { %v3204_v17 = vpop.f32.mrb[8].mxu1  ;;  %v3141_v62 = vpop.f32.mrb[9].mxu0 }
 0x12f   :  { %v3142_v42 = vadd.f32 %v3141_v62, %v3140_v38  ;;  %v3205_v58 = vpop.f32.mrb[9].mxu1  ;;  %v3143_v23 = vpop.f32.mrb[10].mxu0 }
 0x130   :  { %v3206_v36 = vadd.f32 %v3205_v58, %v3204_v17  ;;  %v3207_v15 = vpop.f32.mrb[10].mxu1  ;;  %v3144_v46 = vpop.f32.mrb[11].mxu0 }
 0x131   :  { %v3145_v27 = vadd.f32 %v3144_v46, %v3143_v23  ;;  %v3208_v31 = vpop.f32.mrb[11].mxu1 }
 0x132   :  { %v4462_v4 = vadd.f32 %v3206_v36, %v3142_v42  ;;  %v3209_v48 = vadd.f32 %v3208_v31, %v3207_v15  ;;  %v2108_v42 = vcvt.s32.f32 %v2106_v9  ;;  %v2092_v9 = vand.u32 65535, %v3927_v20 }
 0x134   :  { %v4464_v3 = vadd.f32 %v3209_v48, %v3145_v27 }
 0x135   :  { %v3146_v51 = vpop.f32.mrb[12].mxu0 }
 0x136   :  { %v3210_v43 = vpop.f32.mrb[12].mxu1  ;;  %v3147_v53 = vpop.f32.mrb[13].mxu0 }
 0x137   :  { %v3148_v8 = vadd.f32 %v3147_v53, %v3146_v51  ;;  %v3211_v38 = vpop.f32.mrb[13].mxu1  ;;  %v3149_v62 = vpop.f32.mrb[14].mxu0 }
 0x138   :  { %v3212_v17 = vadd.f32 %v3211_v38, %v3210_v43  ;;  %v3213_v58 = vpop.f32.mrb[14].mxu1  ;;  %v3150_v19 = vpop.f32.mrb[15].mxu0 }
 0x139   :  { %v3151_v23 = vadd.f32 %v3150_v19, %v3149_v62  ;;  %v3214_v46 = vpop.f32.mrb[15].mxu1 }
 0x13a   :  { %v4470_v27 = vadd.f32 %v3212_v17, %v3148_v8  ;;  %v3215_v15 = vadd.f32 %v3214_v46, %v3213_v58 }
 0x13c   :  { %v4478_v48 = vadd.f32 %v3215_v15, %v3151_v23  ;;  %v2120_v15 = vand.u32 65535, %v3996_v37 }
 0x13d   :  { %v4468_v36 = vpop.xlane.xlu1 %2110  ;;  %v3152_v51 = vpop.f32.mrb[16].mxu0 }
 0x13e   :  { %vm2112_vm5 = vcmp.eq.f32.partialorder %v3917_v16, %v4468_v36  ;;  %v3216_v43 = vpop.f32.mrb[16].mxu1  ;;  %v3153_v53 = vpop.f32.mrb[17].mxu0  ;;  %v2134_v16 = vand.u32 65535, %v4025_v44 }
 0x13f   :  { %v4472_v31 = vpop.xlane.xlu0 %2082  ;;  %v2113_v13 = vsel %vm2112_vm5, %v2108_v42, inf  ;;  %v3154_v8 = vadd.f32 %v3153_v53, %v3152_v51  ;;  %v3217_v38 = vpop.f32.mrb[17].mxu1  ;;  %v2094_v42 = vcvt.s32.f32 %v2092_v9  ;;  %v2122_v53 = vcvt.s32.f32 %v2120_v15 }
 0x140   :  { %vm2084_vm9 = vcmp.eq.f32.partialorder %v3935_v22, %v4472_v31  ;;  %2114 = vmin.xlane.f32.xlu0 %v2113_v13  ;;  %v3155_v62 = vpop.f32.mrb[18].mxu0  ;;  %v3218_v0 = vadd.f32 %v3217_v38, %v3216_v43  ;;  %v3219_v17 = vpop.f32.mrb[18].mxu1  ;;  %v2136_v44 = vcvt.s32.f32 %v2134_v16  ;;  %v2148_v38 = vand.u32 65535, %v4048_v52 }
 0x141   :  { %v2085_v19 = vsel %vm2084_vm9, %v2080_v5, inf  ;;  %v3156_v58 = vpop.f32.mrb[19].mxu0  ;;  %v3220_v22 = vpop.f32.mrb[19].mxu1 }
 0x142   :  { %2086 = vmin.xlane.f32.xlu1 %v2085_v19  ;;  %v3157_v46 = vadd.f32 %v3156_v58, %v3155_v62  ;;  %v4485_v5 = vadd.f32 %v3218_v0, %v3154_v8  ;;  %v3221_v20 = vadd.f32 %v3220_v22, %v3219_v17  ;;  %v2162_v8 = vand.u32 65535, %v4070_v59 }
 0x143   :  { %v4482_v23 = vpop.xlane.xlu0 %2096  ;;  %v2150_v52 = vcvt.s32.f32 %v2148_v38 }
 0x144   :  { %vm2098_vm15 = vcmp.eq.f32.partialorder %v3965_v28, %v4482_v23  ;;  %v4493_v51 = vadd.f32 %v3221_v20, %v3157_v46  ;;  %v2164_v59 = vcvt.s32.f32 %v2162_v8 }
 0x145   :  { %v2099_v19 = vsel %vm2098_vm15, %v2094_v42, inf  ;;  %v3158_v9 = vpop.f32.mrb[20].mxu0 }
 0x146   :  { %2100 = vmin.xlane.f32.xlu1 %v2099_v19  ;;  %v3222_v28 = vpop.f32.mrb[20].mxu1  ;;  %v3159_v62 = vpop.f32.mrb[21].mxu0  ;;  %v2190_v19 = vand.u32 65535, %v4148_v30 }
 0x147   :  { %v4495_v43 = vpop.xlane.xlu0 %2124  ;;  %v3160_v16 = vadd.f32 %v3159_v62, %v3158_v9  ;;  %v3223_v0 = vpop.f32.mrb[21].mxu1 }
 0x148   :  { %v4489_v13 = vpop.xlane.xlu1 %2138  ;;  %vm2126_vm11 = vcmp.eq.f32.partialorder %v4035_v47, %v4495_v43  ;;  %v3224_v58 = vadd.f32 %v3223_v0, %v3222_v28  ;;  %v3225_v46 = vpop.f32.mrb[22].mxu1  ;;  %v2192_v62 = vcvt.s32.f32 %v2190_v19  ;;  %v2204_v0 = vand.u32 65535, %v4188_v41 }
 0x149   :  { %vm2140_vm6 = vcmp.eq.f32.partialorder %v4058_v55, %v4489_v13  ;;  %v3161_v55 = vpop.f32.mrb[22].mxu0  ;;  %v2127_v17 = vsel %vm2126_vm11, %v2122_v53, inf  ;;  %v3226_v15 = vpop.f32.mrb[23].mxu1 }
 0x14a   :  { %v2141_v37 = vsel %vm2140_vm6, %v2136_v44, inf  ;;  %2128 = vmin.xlane.f32.xlu0 %v2127_v17  ;;  %v3162_v22 = vpop.f32.mrb[23].mxu0  ;;  %v4504_v44 = vadd.f32 %v3224_v58, %v3160_v16  ;;  %v3227_v47 = vadd.f32 %v3226_v15, %v3225_v46  ;;  %v2218_v16 = vand.u32 65535, %v4214_v56 }
 0x14b   :  { %2142 = vmin.xlane.f32.xlu1 %v2141_v37  ;;  %v3163_v42 = vadd.f32 %v3162_v22, %v3161_v55  ;;  %v4506_v9 = vpop.xlane.xlu0 %2152  ;;  %v2176_v37 = vand.u32 65535, %v4122_v14  ;;  %v2206_v19 = vcvt.s32.f32 %v2204_v0 }
 0x14c   :  { %v4501_v20 = vpop.xlane.xlu1 %2166  ;;  %vm2154_vm13 = vcmp.eq.f32.partialorder %v4093_v2, %v4506_v9 }
 0x14d   :  { %vm2168_vm10 = vcmp.eq.f32.partialorder %v4117_v12, %v4501_v20  ;;  %v4513_v28 = vadd.f32 %v3227_v47, %v3163_v42  ;;  %v2155_v8 = vsel %vm2154_vm13, %v2150_v52, inf  ;;  %v3164_v38 = vpop.f32.mrb[24].mxu0  ;;  %v2178_v2 = vcvt.s32.f32 %v2176_v37 }
 0x14e   :  { %v2169_v53 = vsel %vm2168_vm10, %v2164_v59, inf  ;;  %2156 = vmin.xlane.f32.xlu0 %v2155_v8  ;;  %v3228_v14 = vpop.f32.mrb[24].mxu1  ;;  %v3165_v55 = vpop.f32.mrb[25].mxu0  ;;  %v2220_v52 = vcvt.s32.f32 %v2218_v16  ;;  %vm5575_vm10 = vcmask 7168  }
 0x14f   :  { %2170 = vmin.xlane.f32.xlu1 %v2169_v53  ;;  %v4519_v12 = vpop.xlane.xlu0 %2180  ;;  %v3229_v17 = vpop.f32.mrb[25].mxu1  ;;  %v3166_v46 = vadd.f32 %v3165_v55, %v3164_v38  ;;  %v2246_v38 = vand.u32 65535, %v4252_v29  ;;  %vm5576_vm13 = vmmov %vm5575_vm10 }
 0x150   :  { %vm2182_vm8 = vcmp.eq.f32.partialorder %v4165_v33, %v4519_v12  ;;  %v3230_v22 = vadd.f32 %v3229_v17, %v3228_v14  ;;  %v3167_v42 = vpop.f32.mrb[26].mxu0  ;;  %v3231_v15 = vpop.f32.mrb[26].mxu1 }
 0x151   :  { %v4515_v30 = vpop.xlane.xlu1 %2194  ;;  %v2183_v56 = vsel %vm2182_vm8, %v2178_v2, inf  ;;  %v3168_v41 = vpop.f32.mrb[27].mxu0  ;;  %v2248_v55 = vcvt.s32.f32 %v2246_v38 }
 0x152   :  { %vm2196_vm7 = vcmp.eq.f32.partialorder %v4183_v39, %v4515_v30  ;;  %2184 = vmin.xlane.f32.xlu0 %v2183_v56  ;;  %v3232_v59 = vpop.f32.mrb[27].mxu1  ;;  %v2232_v39 = vand.u32 65535, %v4234_v61  ;;  %v4526_v47 = vadd.f32 %v3230_v22, %v3166_v46  ;;  %v3169_v37 = vadd.f32 %v3168_v41, %v3167_v42 }
 0x153   :  { %v2197_v58 = vsel %vm2196_vm7, %v2192_v62, inf  ;;  %v3233_v53 = vadd.f32 %v3232_v59, %v3231_v15  ;;  %vm5577_vm7 = vmmov %vm5575_vm10 }
 0x154   :  { %2198 = vmin.xlane.f32.xlu1 %v2197_v58  ;;  %v4530_v33 = vpop.xlane.xlu0 %2208  ;;  %v2234_v17 = vcvt.s32.f32 %v2232_v39  ;;  %vm5578_vm8 = vmmov %vm5577_vm7 }
 0x155   :  { %vm2210_vm9 = vcmp.eq.f32.partialorder %v4225_v10, %v4530_v33  ;;  %v4537_v62 = vadd.f32 %v3233_v53, %v3169_v37  ;;  %v3170_v0 = vpop.f32.mrb[28].mxu0  ;;  %v2260_v10 = vand.u32 65535, %v4287_v45 }
 0x156   :  { %v2211_v61 = vsel %vm2210_vm9, %v2206_v19, inf  ;;  %v3234_v29 = vpop.f32.mrb[28].mxu1  ;;  %v3171_v58 = vpop.f32.mrb[29].mxu0 }
 0x157   :  { %v4528_v8 = vpop.xlane.xlu1 %2222  ;;  %2212 = vmin.xlane.f32.xlu0 %v2211_v61  ;;  %v3235_v46 = vpop.f32.mrb[29].mxu1 }
 0x158   :  { %vm2224_vm5 = vcmp.eq.f32.partialorder %v4244_v6, %v4528_v8  ;;  %v3172_v6 = vadd.f32 %v3171_v58, %v3170_v0  ;;  %v3173_v22 = vpop.f32.mrb[30].mxu0  ;;  %v3236_v56 = vadd.f32 %v3235_v46, %v3234_v29  ;;  %v3237_v41 = vpop.f32.mrb[30].mxu1 }
 0x159   :  { %v2225_v16 = vsel %vm2224_vm5, %v2220_v52, inf  ;;  %v4541_v2 = vpop.xlane.xlu0 %2236  ;;  %v3174_v59 = vpop.f32.mrb[31].mxu0  ;;  %vm5579_vm5 = vmmov %vm5577_vm7 }
 0x15a   :  { %2226 = vmin.xlane.f32.xlu1 %v2225_v16  ;;  %vm2238_vm6 = vcmp.eq.f32.partialorder %v4265_v49, %v4541_v2  ;;  %v3175_v52 = vadd.f32 %v3174_v59, %v3173_v22  ;;  %v3238_v19 = vpop.f32.mrb[31].mxu1  ;;  %v4548_v39 = vadd.f32 %v3236_v56, %v3172_v6  ;;  %v2262_v49 = vcvt.s32.f32 %v2260_v10  ;;  %vm5580_vm9 = vmmov %vm5579_vm5 }
 0x15b   :  { %v2239_v15 = vsel %vm2238_vm6, %v2234_v17, inf  ;;  %v3573_v16 = vmov 1073741824   ;;  %vm5582_vm6 = vmmov %vm5579_vm5 }
 0x15c   :  { %v4539_v14 = vpop.xlane.xlu1 %2250  ;;  %2240 = vmin.xlane.f32.xlu0 %v2239_v15  ;;  %105 = vst.msk [vmem:[#allocation6 + $0x8] sm:$0xff] %vm5575_vm10, %v3573_v16  ;;  %vm5583_vm0 = vmmov %vm5579_vm5 }
 0x15d   :  { %vm2252_vm15 = vcmp.eq.f32.partialorder %v4279_v50, %v4539_v14  ;;  %v3239_v50 = vadd.f32 %v3238_v19, %v3237_v41  ;;  %v3256_v38 = vpop.f32.mrb[32].mxu0  ;;  %104 = vst.msk [vmem:[#allocation6] sm:$0xff] %vm5576_vm13, %v3573_v16  ;;  %vm5585_vm3 = vmmov %vm5583_vm0 }
 0x15e   :  { %v2253_v42 = vsel %vm2252_vm15, %v2248_v55, inf  ;;  %106 = vst.msk [vmem:[#allocation6 + $0x10] sm:$0xff] %vm5577_vm7, %v3573_v16  ;;  %vm5581_vm15 = vmmov %vm5579_vm5  ;;  %v3257_v61 = vpop.f32.mrb[33].mxu0 }
 0x15f   :  { %2254 = vmin.xlane.f32.xlu1 %v2253_v42  ;;  %v4554_v45 = vadd.f32 %v3239_v50, %v3175_v52  ;;  %107 = vst.msk [vmem:[#allocation6 + $0x18] sm:$0xff] %vm5578_vm8, %v3573_v16  ;;  %vm5586_vm10 = vmmov %vm5583_vm0  ;;  %v3258_v0 = vadd.f32 %v3257_v61, %v3256_v38  ;;  %v3259_v29 = vpop.f32.mrb[34].mxu0 }
 0x160   :  { %108 = vst.msk [vmem:[#allocation6 + $0x20] sm:$0xff] %vm5579_vm5, %v3573_v16  ;;  %vm5587_vm13 = vmmov %vm5583_vm0  ;;  %v3260_v6 = vpop.f32.mrb[35].mxu0 }
 0x161   :  { %v4550_v37 = vpop.xlane.xlu0 %2264  ;;  %109 = vst.msk [vmem:[#allocation6 + $0x28] sm:$0xff] %vm5580_vm9, %v3573_v16  ;;  %vm5588_vm7 = vmmov %vm5583_vm0  ;;  %v1245_v10 = vadd.f32 %v3258_v0, %v4454_v1  ;;  %v3261_v22 = vadd.f32 %v3260_v6, %v3259_v29  ;;  %vm5596_vm9 = vnez %v5543_v40 }
 0x162   :  { %vm2266_vm11 = vcmp.eq.f32.partialorder %v4305_v24, %v4550_v37  ;;  %110 = vst.msk [vmem:[#allocation6 + $0x30] sm:$0xff] %vm5581_vm15, %v3573_v16  ;;  %vm5589_vm8 = vmmov %vm5583_vm0  ;;  %v3320_v24 = vpop.f32.mrb[32].mxu1  ;;  %vm5597_vm15 = vnez %v5548_v54 }
 0x163   :  { %v2267_v53 = vsel %vm2266_vm11, %v2262_v49, inf  ;;  %111 = vst.msk [vmem:[#allocation6 + $0x38] sm:$0xff] %vm5582_vm6, %v3573_v16  ;;  %vm5584_vm11 = vmmov %vm5583_vm0  ;;  %v3321_v55 = vpop.f32.mrb[33].mxu1  ;;  %v1248_v56 = vadd.f32 %v3261_v22, %v4456_v7  ;;  %vm5598_vm6 = vnez %v5551_v57 }
 0x164   :  { %112 = vst.msk [vmem:[#allocation6 + $0x40] sm:$0xff] %vm5583_vm0, %v3573_v16  ;;  %vm5590_vm5 = vmmov %vm5583_vm0  ;;  %2268 = vmin.xlane.f32.xlu0 %v2267_v53  ;;  %v3322_v17 = vadd.f32 %v3321_v55, %v3320_v24  ;;  %v3323_v58 = vpop.f32.mrb[34].mxu1  ;;  %vm5595_vm0 = vnez %v5540_v35 }
 0x165   :  { %113 = vst.msk [vmem:[#allocation6 + $0x48] sm:$0xff] %vm5584_vm11, %v3573_v16  ;;  %v3324_v46 = vpop.f32.mrb[35].mxu1  ;;  %v3262_v41 = vpop.f32.mrb[36].mxu0 }
 0x166   :  { %114 = vst.msk [vmem:[#allocation6 + $0x50] sm:$0xff] %vm5585_vm3, %v3573_v16  ;;  %v3325_v42 = vadd.f32 %v3324_v46, %v3323_v58  ;;  %v1342_v15 = vadd.f32 %v3322_v17, %v1245_v10  ;;  %v3326_v19 = vpop.f32.mrb[36].mxu1  ;;  %v3263_v50 = vpop.f32.mrb[37].mxu0  ;;  %vm5594_vm3 = vnez %v5535_v60 }
 0x167   :  { %115 = vst.msk [vmem:[#allocation6 + $0x58] sm:$0xff] %vm5586_vm10, %v3573_v16  ;;  %v3264_v49 = vadd.f32 %v3263_v50, %v3262_v41  ;;  %v3327_v53 = vpop.f32.mrb[37].mxu1  ;;  %v3265_v38 = vpop.f32.mrb[38].mxu0 }
 0x168   :  { %116 = vst.msk [vmem:[#allocation6 + $0x60] sm:$0xff] %vm5587_vm13, %v3573_v16  ;;  %v1439_v59 = vmul.f32 0.25, %v1342_v15  ;;  %v1345_v52 = vadd.f32 %v3325_v42, %v1248_v56  ;;  %v3328_v24 = vadd.f32 %v3327_v53, %v3326_v19  ;;  %v3329_v61 = vpop.f32.mrb[38].mxu1  ;;  %v3266_v1 = vpop.f32.mrb[39].mxu0 }
 0x169   :  { %117 = vst.msk [vmem:[#allocation6 + $0x68] sm:$0xff] %vm5588_vm7, %v3573_v16  ;;  %v1253_v55 = vadd.f32 %v3264_v49, %v4458_v11  ;;  %v3267_v29 = vadd.f32 %v3266_v1, %v3265_v38  ;;  %v3330_v17 = vpop.f32.mrb[39].mxu1 }
 0x16a   :  { %118 = vst.msk [vmem:[#allocation6 + $0x70] sm:$0xff] %vm5589_vm8, %v3573_v16  ;;  %v1440_v0 = vmul.f32 0.25, %v1345_v52  ;;  %v3331_v58 = vadd.f32 %v3330_v17, %v3329_v61  ;;  %vm5611_vm8 = vmmov %vm5590_vm5 }
 0x16b   :  { %119 = vst.msk [vmem:[#allocation6 + $0x78] sm:$0xff] %vm5590_vm5, %v3573_v16  ;;  %v4574_v16 = vadd.f32 0.25, %v1439_v59  ;;  %v1350_v6 = vadd.f32 %v3328_v24, %v1253_v55  ;;  %v1256_v46 = vadd.f32 %v3267_v29, %v4460_v32 }
 0x16c   :  { %v4583_v10 = vadd.f32 0.25, %v1440_v0 }
 0x16d   :  { %v4580_v7 = vsel %vm3941_vm4, %v4574_v16, -inf  ;;  %v1353_v11 = vadd.f32 %v3331_v58, %v1256_v46  ;;  %v3268_v42 = vpop.f32.mrb[40].mxu0  ;;  %v1441_v25 = vmul.f32 0.25, %v1350_v6  ;;  %vm5591_vm4 = vnez %v5522_v18 }
 0x16e   :  { %1677 = vmax.xlane.f32.xlu1 %v4580_v7  ;;  %v4589_v22 = vsel %vm4080_vm14, %v4583_v10, -inf  ;;  %v3332_v15 = vpop.f32.mrb[40].mxu1  ;;  %v3269_v56 = vpop.f32.mrb[41].mxu0  ;;  %vm5592_vm14 = vnez %v5527_v21 }
 0x16f   :  { %1679 = vmax.xlane.f32.xlu0 %v4589_v22  ;;  %v3270_v41 = vadd.f32 %v3269_v56, %v3268_v42  ;;  %v3333_v59 = vpop.f32.mrb[41].mxu1  ;;  %v3271_v52 = vpop.f32.mrb[42].mxu0  ;;  %v4592_v19 = vadd.f32 0.25, %v1441_v25  ;;  %v1442_v50 = vmul.f32 0.25, %v1353_v11 }
 0x170   :  { %v3334_v49 = vadd.f32 %v3333_v59, %v3332_v15  ;;  %v3335_v32 = vpop.f32.mrb[42].mxu1  ;;  %v3272_v53 = vpop.f32.mrb[43].mxu0 }
 0x171   :  { %v1261_v63 = vadd.f32 %v3270_v41, %v4462_v4  ;;  %v3273_v38 = vadd.f32 %v3272_v53, %v3271_v52  ;;  %v3336_v24 = vpop.f32.mrb[43].mxu1  ;;  %v4598_v61 = vsel %vm4258_vm12, %v4592_v19, -inf  ;;  %v4600_v1 = vadd.f32 0.25, %v1442_v50 }
 0x172   :  { %v3337_v0 = vadd.f32 %v3336_v24, %v3335_v32  ;;  %vm5593_vm12 = vnez %v5531_v26 }
 0x173   :  { %1681 = vmax.xlane.f32.xlu0 %v4598_v61  ;;  %v1358_v55 = vadd.f32 %v3334_v49, %v1261_v63  ;;  %v1264_v29 = vadd.f32 %v3273_v38, %v4464_v3  ;;  %v4607_v17 = vsel %vm5591_vm4, %v4600_v1, -inf }
 0x174   :  { %1683 = vmax.xlane.f32.xlu1 %v4607_v17 }
 0x175   :  { %v1361_v4 = vadd.f32 %v3337_v0, %v1264_v29  ;;  %v3274_v58 = vpop.f32.mrb[44].mxu0  ;;  %v1443_v34 = vmul.f32 0.25, %v1358_v55 }
 0x176   :  { %v3338_v6 = vpop.f32.mrb[44].mxu1  ;;  %v3275_v46 = vpop.f32.mrb[45].mxu0 }
 0x177   :  { %v3276_v11 = vadd.f32 %v3275_v46, %v3274_v58  ;;  %v3339_v42 = vpop.f32.mrb[45].mxu1  ;;  %v3277_v25 = vpop.f32.mrb[46].mxu0  ;;  %v4610_v15 = vadd.f32 0.25, %v1443_v34  ;;  %v1444_v56 = vmul.f32 0.25, %v1361_v4 }
 0x178   :  { %v3340_v41 = vadd.f32 %v3339_v42, %v3338_v6  ;;  %v3341_v3 = vpop.f32.mrb[46].mxu1  ;;  %v3278_v59 = vpop.f32.mrb[47].mxu0 }
 0x179   :  { %v1269_v18 = vadd.f32 %v3276_v11, %v4470_v27  ;;  %v3279_v52 = vadd.f32 %v3278_v59, %v3277_v25  ;;  %v3342_v50 = vpop.f32.mrb[47].mxu1  ;;  %v4616_v49 = vsel %vm5592_vm14, %v4610_v15, -inf  ;;  %v4618_v32 = vadd.f32 0.25, %v1444_v56 }
 0x17a   :  { %v3343_v53 = vadd.f32 %v3342_v50, %v3341_v3  ;;  %1685 = vmax.xlane.f32.xlu0 %v4616_v49 }
 0x17b   :  { %v1366_v63 = vadd.f32 %v3340_v41, %v1269_v18  ;;  %v1272_v38 = vadd.f32 %v3279_v52, %v4478_v48  ;;  %v4625_v24 = vsel %vm5593_vm12, %v4618_v32, -inf }
 0x17c   :  { %1687 = vmax.xlane.f32.xlu1 %v4625_v24 }
 0x17d   :  { %v1369_v27 = vadd.f32 %v3343_v53, %v1272_v38  ;;  %v3280_v0 = vpop.f32.mrb[48].mxu0  ;;  %v1445_v21 = vmul.f32 0.25, %v1366_v63 }
 0x17e   :  { %v3344_v55 = vpop.f32.mrb[48].mxu1  ;;  %v3281_v29 = vpop.f32.mrb[49].mxu0 }
 0x17f   :  { %v3282_v4 = vadd.f32 %v3281_v29, %v3280_v0  ;;  %v3345_v58 = vpop.f32.mrb[49].mxu1  ;;  %v3283_v34 = vpop.f32.mrb[50].mxu0  ;;  %v4628_v6 = vadd.f32 0.25, %v1445_v21  ;;  %v1446_v46 = vmul.f32 0.25, %v1369_v27 }
 0x180   :  { %v3346_v11 = vadd.f32 %v3345_v58, %v3344_v55  ;;  %v3347_v48 = vpop.f32.mrb[50].mxu1  ;;  %v3284_v42 = vpop.f32.mrb[51].mxu0 }
 0x181   :  { %v1277_v26 = vadd.f32 %v3282_v4, %v4485_v5  ;;  %v3285_v25 = vadd.f32 %v3284_v42, %v3283_v34  ;;  %v3348_v56 = vpop.f32.mrb[51].mxu1  ;;  %v4634_v41 = vsel %vm5594_vm3, %v4628_v6, -inf  ;;  %v4636_v3 = vadd.f32 0.25, %v1446_v46 }
 0x182   :  { %v3349_v59 = vadd.f32 %v3348_v56, %v3347_v48  ;;  %1689 = vmax.xlane.f32.xlu0 %v4634_v41 }
 0x183   :  { %v1374_v18 = vadd.f32 %v3346_v11, %v1277_v26  ;;  %v1280_v52 = vadd.f32 %v3285_v25, %v4493_v51  ;;  %v4643_v50 = vsel %vm5595_vm0, %v4636_v3, -inf  ;;  %vm5615_vm0 = vmmov %vm5590_vm5 }
 0x184   :  { %1691 = vmax.xlane.f32.xlu1 %v4643_v50 }
 0x185   :  { %v1377_v5 = vadd.f32 %v3349_v59, %v1280_v52  ;;  %v3286_v53 = vpop.f32.mrb[52].mxu0  ;;  %v1447_v60 = vmul.f32 0.25, %v1374_v18 }
 0x186   :  { %v3350_v63 = vpop.f32.mrb[52].mxu1  ;;  %v3287_v38 = vpop.f32.mrb[53].mxu0 }
 0x187   :  { %v3288_v27 = vadd.f32 %v3287_v38, %v3286_v53  ;;  %v3351_v0 = vpop.f32.mrb[53].mxu1  ;;  %v3289_v21 = vpop.f32.mrb[54].mxu0  ;;  %v4646_v55 = vadd.f32 0.25, %v1447_v60  ;;  %v1448_v29 = vmul.f32 0.25, %v1377_v5 }
 0x188   :  { %v3352_v4 = vadd.f32 %v3351_v0, %v3350_v63  ;;  %v3353_v51 = vpop.f32.mrb[54].mxu1  ;;  %v3290_v58 = vpop.f32.mrb[55].mxu0 }
 0x189   :  { %v1285_v35 = vadd.f32 %v3288_v27, %v4504_v44  ;;  %v3291_v34 = vadd.f32 %v3290_v58, %v3289_v21  ;;  %v3354_v46 = vpop.f32.mrb[55].mxu1  ;;  %v4652_v11 = vsel %vm5596_vm9, %v4646_v55, -inf  ;;  %v4654_v48 = vadd.f32 0.25, %v1448_v29 }
 0x18a   :  { %v3355_v42 = vadd.f32 %v3354_v46, %v3353_v51  ;;  %1693 = vmax.xlane.f32.xlu0 %v4652_v11  ;;  %v5599_v46 = vld [vmem:[#allocation34_spill] sm:$0xff] }
 0x18b   :  { %v1382_v26 = vadd.f32 %v3352_v4, %v1285_v35  ;;  %v1288_v25 = vadd.f32 %v3291_v34, %v4513_v28  ;;  %v4661_v56 = vsel %vm5597_vm15, %v4654_v48, -inf  ;;  %vm5600_vm11 = vnez %v5599_v46 }
 0x18c   :  { %1695 = vmax.xlane.f32.xlu1 %v4661_v56 }
 0x18d   :  { %v1385_v44 = vadd.f32 %v3355_v42, %v1288_v25  ;;  %v3292_v59 = vpop.f32.mrb[56].mxu0  ;;  %v1449_v40 = vmul.f32 0.25, %v1382_v26 }
 0x18e   :  { %v3356_v18 = vpop.f32.mrb[56].mxu1  ;;  %v3293_v52 = vpop.f32.mrb[57].mxu0 }
 0x18f   :  { %v3294_v5 = vadd.f32 %v3293_v52, %v3292_v59  ;;  %v3357_v53 = vpop.f32.mrb[57].mxu1  ;;  %v3295_v60 = vpop.f32.mrb[58].mxu0  ;;  %v4664_v63 = vadd.f32 0.25, %v1449_v40  ;;  %v1450_v38 = vmul.f32 0.25, %v1385_v44 }
 0x190   :  { %v3358_v27 = vadd.f32 %v3357_v53, %v3356_v18  ;;  %v3359_v28 = vpop.f32.mrb[58].mxu1  ;;  %v3296_v0 = vpop.f32.mrb[59].mxu0 }
 0x191   :  { %v1293_v54 = vadd.f32 %v3294_v5, %v4526_v47  ;;  %v3297_v21 = vadd.f32 %v3296_v0, %v3295_v60  ;;  %v3360_v29 = vpop.f32.mrb[59].mxu1  ;;  %v4670_v4 = vsel %vm5598_vm6, %v4664_v63, -inf  ;;  %v4672_v51 = vadd.f32 0.25, %v1450_v38 }
 0x192   :  { %v3361_v58 = vadd.f32 %v3360_v29, %v3359_v28  ;;  %1697 = vmax.xlane.f32.xlu0 %v4670_v4  ;;  %v2089_v0 = vcvt.f32.s32 %v4472_v31 }
 0x193   :  { %v1390_v35 = vadd.f32 %v3358_v27, %v1293_v54  ;;  %v1296_v34 = vadd.f32 %v3297_v21, %v4537_v62  ;;  %v4679_v42 = vsel %vm5600_vm11, %v4672_v51, -inf }
 0x194   :  { %1699 = vmax.xlane.f32.xlu1 %v4679_v42 }
 0x195   :  { %v1393_v47 = vadd.f32 %v3361_v58, %v1296_v34  ;;  %v3298_v26 = vpop.f32.mrb[60].mxu0  ;;  %v1451_v57 = vmul.f32 0.25, %v1390_v35 }
 0x196   :  { %v3362_v25 = vpop.f32.mrb[60].mxu1  ;;  %v3299_v44 = vpop.f32.mrb[61].mxu0 }
 0x197   :  { %v3300_v59 = vadd.f32 %v3299_v44, %v3298_v26  ;;  %v3363_v40 = vpop.f32.mrb[61].mxu1  ;;  %v3301_v18 = vpop.f32.mrb[62].mxu0  ;;  %v4682_v52 = vadd.f32 0.25, %v1451_v57  ;;  %v1452_v5 = vmul.f32 0.25, %v1393_v47  ;;  %v5604_v44 = vld [vmem:[#allocation32_spill] sm:$0xff] }
 0x198   :  { %v3364_v53 = vadd.f32 %v3363_v40, %v3362_v25  ;;  %v3365_v62 = vpop.f32.mrb[62].mxu1  ;;  %v3302_v60 = vpop.f32.mrb[63].mxu0  ;;  %v5605_v40 = vld [vmem:[#allocation37_spill] sm:$0xff] }
 0x199   :  { %v1301_v38 = vadd.f32 %v3300_v59, %v4548_v39  ;;  %v3303_v27 = vadd.f32 %v3302_v60, %v3301_v18  ;;  %v3366_v28 = vpop.f32.mrb[63].mxu1  ;;  %v4688_v54 = vsel %vm4429_vm1, %v4682_v52, -inf  ;;  %v4690_v21 = vadd.f32 0.25, %v1452_v5  ;;  %v4700_v26 = vpop.xlane.xlu0 %2292  ;;  %v5607_v5 = vld [vmem:[#allocation33_spill] sm:$0xff] }
 0x19a   :  { %v3367_v29 = vadd.f32 %v3366_v28, %v3365_v62  ;;  %1701 = vmax.xlane.f32.xlu0 %v4688_v54  ;;  %v2288_v59 = vand.u32 65535, %v5604_v44  ;;  %vm5606_vm1 = vnez %v5605_v40  ;;  %v4722_v28 = vpop.xlane.xlu1 %2278 }
 0x19b   :  { %v1398_v58 = vadd.f32 %v3364_v53, %v1301_v38  ;;  %v1304_v35 = vadd.f32 %v3303_v27, %v4554_v45  ;;  %v4697_v46 = vsel %vm4435_vm2, %v4690_v21, -inf  ;;  %vm2294_vm2 = vcmp.eq.f32.partialorder %v5607_v5, %v4700_v26  ;;  %v5608_v53 = vld [vmem:[#allocation38_spill] sm:$0xff] }
 0x19c   :  { %1703 = vmax.xlane.f32.xlu1 %v4697_v46  ;;  %vm5609_vm10 = vnez %v5608_v53  ;;  %v2290_v60 = vcvt.s32.f32 %v2288_v59  ;;  %v2117_v27 = vcvt.f32.s32 %v4468_v36  ;;  %v4729_v59 = vld [vmem:[#allocation6] sm:$0xff]  ;;  %v2103_v36 = vcvt.f32.s32 %v4482_v23 }
 0x19d   :  { %v1401_v39 = vadd.f32 %v3367_v29, %v1304_v35  ;;  %v1453_v47 = vmul.f32 0.25, %v1398_v58  ;;  %v2145_v23 = vcvt.f32.s32 %v4489_v13  ;;  %v2131_v53 = vcvt.f32.s32 %v4495_v43  ;;  %v5612_v13 = vld [vmem:[#allocation13_spill] sm:$0xff] }
 0x19e   :  { %v2295_v38 = vsel %vm2294_vm2, %v2290_v60, inf  ;;  %v2118_v58 = vshll.u32 %v2117_v27, 16  ;;  %v2159_v43 = vcvt.f32.s32 %v4506_v9  ;;  %v4777_v9 = vld [vmem:[#allocation6 + $0x20] sm:$0xff]  ;;  %vm5620_vm2 = vmmov %vm5615_vm0 }
 0x19f   :  { %v4702_v57 = vadd.f32 0.25, %v1453_v47  ;;  %v1454_v25 = vmul.f32 0.25, %v1401_v39  ;;  %v2090_v39 = vshll.u32 %v2089_v0, 16  ;;  %v4752_v0 = vld [vmem:[#allocation6 + $0x8] sm:$0xff]  ;;  %5616 = vst [vmem:[#allocation36_spill] sm:$0xff] %v4777_v9 }
 0x1a1   :  { %5603 = vst [vmem:[#allocation34_spill] sm:$0xff] %v4702_v57  ;;  %v4708_v45 = vsel %vm5606_vm1, %v4702_v57, -inf  ;;  %v4710_v18 = vadd.f32 0.25, %v1454_v25  ;;  %v4725_v25 = vld [vmem:[#allocation6 + $0x10] sm:$0xff] }
 0x1a2   :  { %1705 = vmax.xlane.f32.xlu0 %v4708_v45  ;;  %5610 = vst [vmem:[#allocation35_spill] sm:$0xff] %v4725_v25 }
 0x1a3   :  { %v4718_v62 = vsel %vm5609_vm10, %v4710_v18, -inf  ;;  %vm5621_vm10 = vmmov %vm5615_vm0 }
 0x1a4   :  { %1707 = vmax.xlane.f32.xlu1 %v4718_v62 }
 0x1a6   :  { %2296 = vmin.xlane.f32.xlu0 %v2295_v38  ;;  %v2104_v38 = vshll.u32 %v2103_v36, 16  ;;  %v5613_v36 = vld [vmem:[#allocation16_spill] sm:$0xff] }
 0x1a7   :  { %vm5614_vm12 = vnez %v5613_v36 }
 0x1cd   :  { %v2115_v29 = vpop.xlane.xlu0 %2114 }
 0x1ce   :  { %v2116_v34 = vcvt.f32.s32 %v2115_v29 }
 0x1cf   :  { %v2087_v35 = vpop.xlane.xlu1 %2086 }
 0x1d0   :  { %v2088_v47 = vcvt.f32.s32 %v2087_v35  ;;  %v4727_v44 = vadd.s32 %v2118_v58, %v2116_v34  ;;  %v2146_v58 = vshll.u32 %v2145_v23, 16  ;;  %v2132_v35 = vshll.u32 %v2131_v53, 16 }
 0x1d1   :  { %v2173_v34 = vcvt.f32.s32 %v4501_v20 }
 0x1d2   :  { %v4731_v40 = vadd.s32 %v2090_v39, %v2088_v47  ;;  %vm5443_vm13 = vcmp.lt.s32.totalorder %v4727_v44, %v4725_v25 }
 0x1d3   :  { %v2496_v31 = vsel %vm5443_vm13, %v4727_v44, %v4725_v25  ;;  %v2101_v60 = vpop.xlane.xlu1 %2100 }
 0x1d4   :  { %vm5444_vm7 = vcmp.lt.s32.totalorder %v4731_v40, %v4729_v59  ;;  %2512 = vst.msk [vmem:[#allocation6 + $0x10] sm:$0xff] %vm5611_vm8, %v2496_v31  ;;  %v2102_v27 = vcvt.f32.s32 %v2101_v60  ;;  %vm2302_vm13 = vcmp.eq.s32.totalorder %v5612_v13, %v4731_v40 }
 0x1d5   :  { %v2494_v5 = vsel %vm5444_vm7, %v4731_v40, %v4729_v59 }
 0x1d6   :  { %2510 = vst.msk [vmem:[#allocation6] sm:$0xff] %vm5590_vm5, %v2494_v5  ;;  %v4754_v29 = vadd.s32 %v2104_v38, %v2102_v27  ;;  %v4769_v5 = vld [vmem:[#allocation6 + $0x18] sm:$0xff]  ;;  %v2174_v38 = vshll.u32 %v2173_v34, 16  ;;  %v2201_v27 = vcvt.f32.s32 %v4515_v30 }
 0x1d7   :  { %v2129_v47 = vpop.xlane.xlu0 %2128 }
 0x1d8   :  { %v2143_v39 = vpop.xlane.xlu1 %2142  ;;  %v2130_v25 = vcvt.f32.s32 %v2129_v47  ;;  %vm2303_vm4 = vcmp.eq.s32.totalorder %v5612_v13, %v4754_v29  ;;  %vm2415_vm14 = vcmp.lt.s32.totalorder %v4754_v29, %v4752_v0  ;;  %v2187_v47 = vcvt.f32.s32 %v4519_v12  ;;  %v4794_v12 = vld [vmem:[#allocation6 + $0x30] sm:$0xff] }
 0x1d9   :  { %v2144_v31 = vcvt.f32.s32 %v2143_v39  ;;  %vm2319_vm3 = vmand %vm5614_vm12, %vm2303_vm4  ;;  %v2495_v20 = vsel %vm2415_vm14, %v4754_v29, %v4752_v0  ;;  %5619 = vst [vmem:[#allocation32_spill] sm:$0xff] %v4794_v12  ;;  %v2435_v0 = vld [vmem:[#allocation5 + $0x28] sm:$0xff] }
 0x1da   :  { %v4773_v53 = vadd.s32 %v2132_v35, %v2130_v25  ;;  %v2351_v60 = vsel %vm2319_vm3, %v4583_v10, 0.0  ;;  %2511 = vst.msk [vmem:[#allocation6 + $0x8] sm:$0xff] %vm5615_vm0, %v2495_v20  ;;  %v2160_v10 = vshll.u32 %v2159_v43, 16  ;;  %v2202_v43 = vshll.u32 %v2201_v27, 16  ;;  %v4823_v27 = vld [vmem:[#allocation6 + $0x40] sm:$0xff] }
 0x1db   :  { %v4771_v23 = vadd.s32 %v2146_v58, %v2144_v31  ;;  %2368 = vadd.xlane.f32.xlu0 %v2351_v60  ;;  %v2157_v57 = vpop.xlane.xlu0 %2156  ;;  %v5617_v58 = vld [vmem:[#allocation17_spill] sm:$0xff]  ;;  %v2229_v20 = vcvt.f32.s32 %v4528_v8  ;;  %5622 = vst [vmem:[#allocation37_spill] sm:$0xff] %v4823_v27 }
 0x1dc   :  { %v2171_v39 = vpop.xlane.xlu1 %2170  ;;  %vm2305_vm9 = vcmp.eq.s32.totalorder %v5612_v13, %v4773_v53  ;;  %vm2417_vm15 = vcmp.lt.s32.totalorder %v4773_v53, %v4769_v5  ;;  %v2158_v25 = vcvt.f32.s32 %v2157_v57  ;;  %vm5618_vm6 = vnez %v5617_v58  ;;  %v4800_v57 = vld [vmem:[#allocation6 + $0x28] sm:$0xff] }
 0x1dd   :  { %v2172_v36 = vcvt.f32.s32 %v2171_v39  ;;  %vm2321_vm11 = vmand %vm5618_vm6, %vm2305_vm9  ;;  %v2497_v30 = vsel %vm2417_vm15, %v4773_v53, %v4769_v5  ;;  %vm5439_vm1 = vcmp.lt.s32.totalorder %v4771_v23, %v4777_v9  ;;  %v2437_v5 = vld [vmem:[#allocation5 + $0x38] sm:$0xff] }
 0x1de   :  { %v2353_v34 = vsel %vm2321_vm11, %v4600_v1, 0.0  ;;  %2513 = vst.msk [vmem:[#allocation6 + $0x18] sm:$0xff] %vm5620_vm2, %v2497_v30  ;;  %v2498_v31 = vsel %vm5439_vm1, %v4771_v23, %v4777_v9  ;;  %v4808_v60 = vadd.s32 %v2160_v10, %v2158_v25  ;;  %v2188_v1 = vshll.u32 %v2187_v47, 16  ;;  %v5623_v47 = vld [vmem:[#allocation19_spill] sm:$0xff]  ;;  %v4834_v25 = vld [vmem:[#allocation6 + $0x38] sm:$0xff]  ;;  %vm5625_vm9 = vmmov %vm5615_vm0 }
 0x1df   :  { %v4796_v35 = vadd.s32 %v2174_v38, %v2172_v36  ;;  %2372 = vadd.xlane.f32.xlu0 %v2353_v34  ;;  %2514 = vst.msk [vmem:[#allocation6 + $0x20] sm:$0xff] %vm5621_vm10, %v2498_v31  ;;  %v2215_v38 = vcvt.f32.s32 %v4530_v33  ;;  %v2185_v58 = vpop.xlane.xlu0 %2184  ;;  %vm5624_vm12 = vnez %v5623_v47  ;;  %v2230_v34 = vshll.u32 %v2229_v20, 16 }
 0x1e0   :  { %v2186_v30 = vcvt.f32.s32 %v2185_v58  ;;  %vm2307_vm5 = vcmp.eq.s32.totalorder %v5612_v13, %v4808_v60  ;;  %vm2419_vm4 = vcmp.lt.s32.totalorder %v4808_v60, %v4800_v57  ;;  %v2243_v58 = vcvt.f32.s32 %v4541_v2 }
 0x1e1   :  { %v2199_v39 = vpop.xlane.xlu1 %2198  ;;  %vm5438_vm8 = vcmp.lt.s32.totalorder %v4796_v35, %v4794_v12  ;;  %vm2323_vm3 = vmand %vm5624_vm12, %vm2307_vm5  ;;  %v2499_v10 = vsel %vm2419_vm4, %v4808_v60, %v4800_v57 }
 0x1e2   :  { %v2200_v36 = vcvt.f32.s32 %v2199_v39  ;;  %v2500_v8 = vsel %vm5438_vm8, %v4796_v35, %v4794_v12  ;;  %v4837_v31 = vadd.s32 %v2188_v1, %v2186_v30  ;;  %v2355_v39 = vsel %vm2323_vm3, %v4618_v32, 0.0  ;;  %2515 = vst.msk [vmem:[#allocation6 + $0x28] sm:$0xff] %vm5625_vm9, %v2499_v10  ;;  %v5626_v32 = vld [vmem:[#allocation21_spill] sm:$0xff]  ;;  %vm5628_vm12 = vmmov %vm5615_vm0  ;;  %v4870_v30 = vld [vmem:[#allocation6 + $0x50] sm:$0xff] }
 0x1e3   :  { %2516 = vst.msk [vmem:[#allocation6 + $0x30] sm:$0xff] %vm5615_vm0, %v2500_v8  ;;  %2376 = vadd.xlane.f32.xlu0 %v2355_v39  ;;  %vm5627_vm10 = vnez %v5626_v32  ;;  %vm5629_vm3 = vmmov %vm5615_vm0  ;;  %v2244_v32 = vshll.u32 %v2243_v58, 16 }
 0x1e4   :  { %v4825_v33 = vadd.s32 %v2202_v43, %v2200_v36  ;;  %v2216_v43 = vshll.u32 %v2215_v38, 16  ;;  %v2257_v36 = vcvt.f32.s32 %v4539_v14  ;;  %v2213_v12 = vpop.xlane.xlu0 %2212  ;;  %vm2309_vm11 = vcmp.eq.s32.totalorder %v5612_v13, %v4837_v31  ;;  %v4867_v38 = vld [vmem:[#allocation6 + $0x48] sm:$0xff] }
 0x1e5   :  { %v2214_v8 = vcvt.f32.s32 %v2213_v12  ;;  %vm2421_vm2 = vcmp.lt.s32.totalorder %v4837_v31, %v4834_v25  ;;  %vm2325_vm5 = vmand %vm5627_vm10, %vm2309_vm11 }
 0x1e6   :  { %vm5437_vm6 = vcmp.lt.s32.totalorder %v4825_v33, %v4823_v27  ;;  %v2501_v14 = vsel %vm2421_vm2, %v4837_v31, %v4834_v25  ;;  %v2357_v1 = vsel %vm2325_vm5, %v4636_v3, 0.0  ;;  %v2258_v10 = vshll.u32 %v2257_v36, 16  ;;  %v4883_v36 = vld [vmem:[#allocation6 + $0x60] sm:$0xff] }
 0x1e7   :  { %v2227_v47 = vpop.xlane.xlu1 %2226  ;;  %v2502_v2 = vsel %vm5437_vm6, %v4825_v33, %v4823_v27  ;;  %v4863_v20 = vadd.s32 %v2216_v43, %v2214_v8  ;;  %2517 = vst.msk [vmem:[#allocation6 + $0x38] sm:$0xff] %vm5628_vm12, %v2501_v14  ;;  %2380 = vadd.xlane.f32.xlu0 %v2357_v1  ;;  %v2271_v3 = vcvt.f32.s32 %v4550_v37  ;;  %v4879_v43 = vld [vmem:[#allocation6 + $0x58] sm:$0xff]  ;;  %vm5632_vm12 = vmmov %vm5629_vm3 }
 0x1e8   :  { %v2228_v9 = vcvt.f32.s32 %v2227_v47  ;;  %2518 = vst.msk [vmem:[#allocation6 + $0x40] sm:$0xff] %vm5629_vm3, %v2502_v2 }
 0x1e9   :  { %v2241_v47 = vpop.xlane.xlu0 %2240  ;;  %vm2311_vm0 = vcmp.eq.s32.totalorder %v5612_v13, %v4863_v20  ;;  %vm2423_vm10 = vcmp.lt.s32.totalorder %v4863_v20, %v4867_v38 }
 0x1ea   :  { %v4861_v12 = vadd.s32 %v2230_v34, %v2228_v9  ;;  %v2242_v9 = vcvt.f32.s32 %v2241_v47  ;;  %v5630_v34 = vld [vmem:[#allocation23_spill] sm:$0xff]  ;;  %v2503_v37 = vsel %vm2423_vm10, %v4863_v20, %v4867_v38  ;;  %v4917_v47 = vld [vmem:[#allocation6 + $0x68] sm:$0xff] }
 0x1eb   :  { %vm5631_vm9 = vnez %v5630_v34  ;;  %2519 = vst.msk [vmem:[#allocation6 + $0x48] sm:$0xff] %vm5632_vm12, %v2503_v37  ;;  %v4935_v37 = vld [vmem:[#allocation3 + $0x8] sm:$0xff] }
 0x1ec   :  { %v2255_v39 = vpop.xlane.xlu1 %2254  ;;  %vm2327_vm11 = vmand %vm5631_vm9, %vm2311_vm0  ;;  %vm5407_vm5 = vcmp.lt.s32.totalorder %v4861_v12, %v4870_v30  ;;  %v4887_v8 = vadd.s32 %v2244_v32, %v2242_v9 }
 0x1ed   :  { %v2256_v27 = vcvt.f32.s32 %v2255_v39  ;;  %v2359_v14 = vsel %vm2327_vm11, %v4654_v48, 0.0  ;;  %vm5633_vm0 = vmmov %vm5632_vm12  ;;  %v2272_v48 = vshll.u32 %v2271_v3, 16  ;;  %v4930_v3 = vld [vmem:[#allocation3] sm:$0xff] }
 0x1ee   :  { %2384 = vadd.xlane.f32.xlu0 %v2359_v14  ;;  %vm2425_vm3 = vcmp.lt.s32.totalorder %v4887_v8, %v4879_v43  ;;  %vm5634_vm11 = vmmov %vm5633_vm0  ;;  %5637 = vst [vmem:[#allocation33_spill] sm:$0xff] %v4930_v3 }
 0x1ef   :  { %v4885_v58 = vadd.s32 %v2258_v10, %v2256_v27  ;;  %v2504_v27 = vsel %vm5407_vm5, %v4861_v12, %v4870_v30  ;;  %v2505_v10 = vsel %vm2425_vm3, %v4887_v8, %v4879_v43  ;;  %vm5635_vm12 = vmmov %vm5633_vm0 }
 0x1f0   :  { %2520 = vst.msk [vmem:[#allocation6 + $0x50] sm:$0xff] %vm5633_vm0, %v2504_v27  ;;  %vm5636_vm5 = vmmov %vm5634_vm11  ;;  %v4972_v27 = vld [vmem:[#allocation3 + $0x28] sm:$0xff] }
 0x1f1   :  { %v2269_v2 = vpop.xlane.xlu0 %2268  ;;  %vm5436_vm9 = vcmp.lt.s32.totalorder %v4885_v58, %v4883_v36  ;;  %2521 = vst.msk [vmem:[#allocation6 + $0x58] sm:$0xff] %vm5634_vm11, %v2505_v10  ;;  %vm5639_vm11 = vmmov %vm5636_vm5  ;;  %v4949_v10 = vld [vmem:[#allocation3 + $0x10] sm:$0xff] }
 0x1f2   :  { %v2270_v1 = vcvt.f32.s32 %v2269_v2  ;;  %v2506_v39 = vsel %vm5436_vm9, %v4885_v58, %v4883_v36  ;;  %5641 = vst [vmem:[#allocation16_spill] sm:$0xff] %v4949_v10  ;;  %5648 = vst [vmem:[#allocation39_spill] sm:$0xff] %v4972_v27 }
 0x1f3   :  { %2522 = vst.msk [vmem:[#allocation6 + $0x60] sm:$0xff] %vm5635_vm12, %v2506_v39  ;;  %vm5644_vm12 = vmmov %vm5636_vm5 }
 0x1f4   :  { %v4920_v32 = vadd.s32 %v2272_v48, %v2270_v1 }
 0x1f6   :  { %vm2427_vm0 = vcmp.lt.s32.totalorder %v4920_v32, %v4917_v47  ;;  %vm2315_vm8 = vcmp.eq.s32.totalorder %v5612_v13, %v4920_v32 }
 0x1f7   :  { %v2507_v9 = vsel %vm2427_vm0, %v4920_v32, %v4917_v47  ;;  %v2432_v47 = vld [vmem:[#allocation5 + $0x10] sm:$0xff]  ;;  %v5709_v32 = vld [vmem:[#allocation28_spill] sm:$0xff] }
 0x1f8   :  { %2523 = vst.msk [vmem:[#allocation6 + $0x68] sm:$0xff] %vm5636_vm5, %v2507_v9  ;;  %v4951_v9 = vld [vmem:[#allocation3 + $0x18] sm:$0xff] }
 0x1f9   :  { %5642 = vst [vmem:[#allocation17_spill] sm:$0xff] %v4951_v9 }
 0x1fb   :  { %v1678_v34 = vpop.xlane.xlu1 %1677 }
 0x1fc   :  { %v4933_v14 = vmax.f32 %v4930_v3, %v1678_v34  ;;  %v1680_v2 = vpop.xlane.xlu0 %1679 }
 0x1fd   :  { %v4942_v48 = vmax.f32 %v4935_v37, %v1680_v2 }
 0x1fe   :  { %5638 = vst [vmem:[#allocation38_spill] sm:$0xff] %v4933_v14  ;;  %1998 = vst.msk [vmem:[#allocation3] sm:$0xff] %vm5639_vm11, %v4933_v14 }
 0x1ff   :  { %5640 = vst [vmem:[#allocation13_spill] sm:$0xff] %v4942_v48  ;;  %1999 = vst.msk [vmem:[#allocation3 + $0x8] sm:$0xff] %vm5636_vm5, %v4942_v48  ;;  %1812 = vperm.xlu1 %3379, %v4942_v48  }
 0x200   :  { %v1682_v39 = vpop.xlane.xlu0 %1681  ;;  %vm5646_vm11 = vmmov %vm5636_vm5 }
 0x201   :  { %v4954_v34 = vmax.f32 %v4949_v10, %v1682_v39  ;;  %v1684_v2 = vpop.xlane.xlu1 %1683  ;;  %v4970_v39 = vld [vmem:[#allocation3 + $0x20] sm:$0xff] }
 0x202   :  { %v4962_v1 = vmax.f32 %v4951_v9, %v1684_v2  ;;  %5647 = vst [vmem:[#allocation23_spill] sm:$0xff] %v4970_v39 }
 0x203   :  { %5643 = vst [vmem:[#allocation19_spill] sm:$0xff] %v4954_v34  ;;  %2000 = vst.msk [vmem:[#allocation3 + $0x10] sm:$0xff] %vm5644_vm12, %v4954_v34  ;;  %1817 = vperm.xlu1 %3379, %v4954_v34   ;;  %v4992_v34 = vld [vmem:[#allocation3 + $0x38] sm:$0xff] }
 0x204   :  { %1807 = vperm.xlu0 %3378, %v4933_v14   ;;  %5645 = vst [vmem:[#allocation21_spill] sm:$0xff] %v4962_v1  ;;  %2001 = vst.msk [vmem:[#allocation3 + $0x18] sm:$0xff] %vm5646_vm11, %v4962_v1 }
 0x205   :  { %vm5651_vm12 = vmmov %vm5636_vm5  ;;  %5653 = vst [vmem:[#allocation43_spill] sm:$0xff] %v4992_v34 }
 0x206   :  { %vm5655_vm11 = vmmov %vm5636_vm5 }
 0x207   :  { %v1686_v14 = vpop.xlane.xlu0 %1685 }
 0x208   :  { %1822 = vperm.xlu0 %3378, %v4962_v1   ;;  %v4975_v10 = vmax.f32 %v4970_v39, %v1686_v14  ;;  %v4990_v14 = vld [vmem:[#allocation3 + $0x30] sm:$0xff] }
 0x209   :  { %v1688_v2 = vpop.xlane.xlu1 %1687  ;;  %5652 = vst [vmem:[#allocation42_spill] sm:$0xff] %v4990_v14 }
 0x20a   :  { %5649 = vst [vmem:[#allocation40_spill] sm:$0xff] %v4975_v10  ;;  %2002 = vst.msk [vmem:[#allocation3 + $0x20] sm:$0xff] %vm5636_vm5, %v4975_v10  ;;  %v4982_v3 = vmax.f32 %v4972_v27, %v1688_v2  ;;  %1827 = vperm.xlu1 %3379, %v4975_v10   ;;  %v5012_v10 = vld [vmem:[#allocation3 + $0x48] sm:$0xff] }
 0x20b   :  { %5658 = vst [vmem:[#allocation47_spill] sm:$0xff] %v5012_v10 }
 0x20c   :  { %5650 = vst [vmem:[#allocation41_spill] sm:$0xff] %v4982_v3  ;;  %2003 = vst.msk [vmem:[#allocation3 + $0x28] sm:$0xff] %vm5651_vm12, %v4982_v3  ;;  %1832 = vperm.xlu0 %3378, %v4982_v3  }
 0x20d   :  { %vm5660_vm12 = vmmov %vm5636_vm5 }
 0x20f   :  { %v1690_v9 = vpop.xlane.xlu0 %1689 }
 0x210   :  { %v4995_v39 = vmax.f32 %v4990_v14, %v1690_v9  ;;  %v5010_v9 = vld [vmem:[#allocation3 + $0x40] sm:$0xff] }
 0x211   :  { %v1692_v2 = vpop.xlane.xlu1 %1691  ;;  %5657 = vst [vmem:[#allocation46_spill] sm:$0xff] %v5010_v9 }
 0x212   :  { %5654 = vst [vmem:[#allocation44_spill] sm:$0xff] %v4995_v39  ;;  %2004 = vst.msk [vmem:[#allocation3 + $0x30] sm:$0xff] %vm5655_vm11, %v4995_v39  ;;  %v5002_v1 = vmax.f32 %v4992_v34, %v1692_v2  ;;  %1837 = vperm.xlu1 %3379, %v4995_v39   ;;  %v5032_v39 = vld [vmem:[#allocation3 + $0x58] sm:$0xff] }
 0x213   :  { %vm5662_vm11 = vmmov %vm5636_vm5  ;;  %5664 = vst [vmem:[#allocation51_spill] sm:$0xff] %v5032_v39 }
 0x214   :  { %5656 = vst [vmem:[#allocation45_spill] sm:$0xff] %v5002_v1  ;;  %2005 = vst.msk [vmem:[#allocation3 + $0x38] sm:$0xff] %vm5636_vm5, %v5002_v1  ;;  %1842 = vperm.xlu0 %3378, %v5002_v1  }
 0x217   :  { %v1694_v27 = vpop.xlane.xlu0 %1693 }
 0x218   :  { %v5015_v14 = vmax.f32 %v5010_v9, %v1694_v27  ;;  %v5030_v27 = vld [vmem:[#allocation3 + $0x50] sm:$0xff] }
 0x219   :  { %v1696_v2 = vpop.xlane.xlu1 %1695  ;;  %5663 = vst [vmem:[#allocation50_spill] sm:$0xff] %v5030_v27 }
 0x21a   :  { %5659 = vst [vmem:[#allocation48_spill] sm:$0xff] %v5015_v14  ;;  %2006 = vst.msk [vmem:[#allocation3 + $0x40] sm:$0xff] %vm5660_vm12, %v5015_v14  ;;  %v5022_v3 = vmax.f32 %v5012_v10, %v1696_v2  ;;  %1847 = vperm.xlu1 %3379, %v5015_v14   ;;  %v5052_v14 = vld [vmem:[#allocation3 + $0x68] sm:$0xff] }
 0x21b   :  { %vm5667_vm12 = vmmov %vm5636_vm5  ;;  %5669 = vst [vmem:[#allocation55_spill] sm:$0xff] %v5052_v14 }
 0x21c   :  { %5661 = vst [vmem:[#allocation49_spill] sm:$0xff] %v5022_v3  ;;  %2007 = vst.msk [vmem:[#allocation3 + $0x48] sm:$0xff] %vm5662_vm11, %v5022_v3  ;;  %1852 = vperm.xlu0 %3378, %v5022_v3  }
 0x21d   :  { %vm5671_vm11 = vmmov %vm5636_vm5 }
 0x21f   :  { %v1698_v34 = vpop.xlane.xlu0 %1697 }
 0x220   :  { %v5035_v9 = vmax.f32 %v5030_v27, %v1698_v34  ;;  %v5050_v34 = vld [vmem:[#allocation3 + $0x60] sm:$0xff] }
 0x221   :  { %v1700_v2 = vpop.xlane.xlu1 %1699  ;;  %5668 = vst [vmem:[#allocation54_spill] sm:$0xff] %v5050_v34 }
 0x222   :  { %5665 = vst [vmem:[#allocation52_spill] sm:$0xff] %v5035_v9  ;;  %2008 = vst.msk [vmem:[#allocation3 + $0x50] sm:$0xff] %vm5636_vm5, %v5035_v9  ;;  %v5042_v1 = vmax.f32 %v5032_v39, %v1700_v2  ;;  %1857 = vperm.xlu1 %3379, %v5035_v9   ;;  %v5072_v9 = vld [vmem:[#allocation3 + $0x78] sm:$0xff] }
 0x224   :  { %5666 = vst [vmem:[#allocation53_spill] sm:$0xff] %v5042_v1  ;;  %2009 = vst.msk [vmem:[#allocation3 + $0x58] sm:$0xff] %vm5667_vm12, %v5042_v1  ;;  %1862 = vperm.xlu0 %3378, %v5042_v1  }
 0x225   :  { %vm5674_vm12 = vmmov %vm5636_vm5 }
 0x227   :  { %v1702_v10 = vpop.xlane.xlu0 %1701 }
 0x228   :  { %v5055_v27 = vmax.f32 %v5050_v34, %v1702_v10  ;;  %v5070_v10 = vld [vmem:[#allocation3 + $0x70] sm:$0xff]  ;;  %v2299_v34 = vcvt.f32.s32 %v4700_v26 }
 0x229   :  { %v1704_v2 = vpop.xlane.xlu1 %1703  ;;  %5673 = vst [vmem:[#allocation58_spill] sm:$0xff] %v5070_v10  ;;  %v5682_v26 = vld [vmem:[#allocation31_spill] sm:$0xff] }
 0x22a   :  { %5670 = vst [vmem:[#allocation56_spill] sm:$0xff] %v5055_v27  ;;  %2010 = vst.msk [vmem:[#allocation3 + $0x60] sm:$0xff] %vm5671_vm11, %v5055_v27  ;;  %v5062_v3 = vmax.f32 %v5052_v14, %v1704_v2  ;;  %1867 = vperm.xlu1 %3379, %v5055_v27   ;;  %v2300_v14 = vshll.u32 %v2299_v34, 16  ;;  %v5091_v27 = vld [vmem:[#allocation6 + $0x78] sm:$0xff]  ;;  %v5681_v34 = vld [vmem:[#allocation29_spill] sm:$0xff]  ;;  %vm2280_vm1 = vcmp.eq.f32.partialorder %v5682_v26, %v4722_v28 }
 0x22b   :  { %vm5676_vm11 = vmmov %vm5636_vm5  ;;  %5677 = vst [vmem:[#allocation60_spill] sm:$0xff] %v5091_v27  ;;  %v5687_v26 = vld [vmem:[#allocation14_spill] sm:$0xff] }
 0x22c   :  { %5672 = vst [vmem:[#allocation57_spill] sm:$0xff] %v5062_v3  ;;  %2011 = vst.msk [vmem:[#allocation3 + $0x68] sm:$0xff] %vm5636_vm5, %v5062_v3  ;;  %1872 = vperm.xlu0 %3378, %v5062_v3   ;;  %vm5688_vm7 = vnez %v5687_v26 }
 0x22f   :  { %v1706_v39 = vpop.xlane.xlu0 %1705 }
 0x230   :  { %v5076_v2 = vmax.f32 %v5070_v10, %v1706_v39 }
 0x231   :  { %v1708_v48 = vpop.xlane.xlu1 %1707 }
 0x232   :  { %2012 = vst.msk [vmem:[#allocation3 + $0x70] sm:$0xff] %vm5674_vm12, %v5076_v2  ;;  %v5083_v1 = vmax.f32 %v5072_v9, %v1708_v48  ;;  %1877 = vperm.xlu1 %3379, %v5076_v2   ;;  %vm5678_vm12 = vmmov %vm5676_vm11 }
 0x233   :  { %v2297_v3 = vpop.xlane.xlu0 %2296 }
 0x234   :  { %5675 = vst [vmem:[#allocation59_spill] sm:$0xff] %v5083_v1  ;;  %2013 = vst.msk [vmem:[#allocation3 + $0x78] sm:$0xff] %vm5676_vm11, %v5083_v1  ;;  %v2298_v39 = vcvt.f32.s32 %v2297_v3  ;;  %1882 = vperm.xlu0 %3378, %v5083_v1   ;;  %vm2313_vm11 = vcmp.eq.s32.totalorder %v5612_v13, %v4887_v8  ;;  %v5679_v3 = vld [vmem:[#allocation25_spill] sm:$0xff]  ;;  %v5683_v1 = vld [vmem:[#allocation27_spill] sm:$0xff] }
 0x235   :  { %vm5680_vm9 = vnez %v5679_v3 }
 0x236   :  { %v5093_v10 = vadd.s32 %v2300_v14, %v2298_v39  ;;  %vm2329_vm6 = vmand %vm5680_vm9, %vm2313_vm11  ;;  %v2274_v14 = vand.u32 65535, %v5681_v34  ;;  %v5685_v34 = vld [vmem:[#allocation15_spill] sm:$0xff] }
 0x237   :  { %v2361_v39 = vsel %vm2329_vm6, %v4672_v51, 0.0  ;;  %vm5686_vm9 = vnez %v5685_v34  ;;  %vm2304_vm6 = vcmp.eq.s32.totalorder %v5612_v13, %v4727_v44 }
 0x238   :  { %vm5442_vm5 = vcmp.lt.s32.totalorder %v5093_v10, %v5091_v27  ;;  %vm2318_vm11 = vmand %vm5686_vm9, %vm2302_vm13  ;;  %vm2308_vm13 = vcmp.eq.s32.totalorder %v5612_v13, %v4796_v35 }
 0x239   :  { %v2509_v48 = vsel %vm5442_vm5, %v5093_v10, %v5091_v27  ;;  %v2276_v27 = vcvt.s32.f32 %v2274_v14  ;;  %v2350_v51 = vsel %vm2318_vm11, %v4574_v16, 0.0  ;;  %v5691_v16 = vld [vmem:[#allocation20_spill] sm:$0xff]  ;;  %v2431_v14 = vld [vmem:[#allocation5 + $0x8] sm:$0xff] }
 0x23a   :  { %2525 = vst.msk [vmem:[#allocation6 + $0x78] sm:$0xff] %vm5678_vm12, %v2509_v48  ;;  %vm5684_vm12 = vnez %v5683_v1  ;;  %vm5692_vm9 = vnez %v5691_v16  ;;  %v2439_v16 = vld [vmem:[#allocation5 + $0x48] sm:$0xff] }
 0x23b   :  { %vm2331_vm5 = vmand %vm5684_vm12, %vm2315_vm8  ;;  %v2281_v48 = vsel %vm2280_vm1, %v2276_v27, inf  ;;  %vm2306_vm12 = vcmp.eq.s32.totalorder %v5612_v13, %v4771_v23 }
 0x23c   :  { %v2363_v3 = vsel %vm2331_vm5, %v4690_v21, 0.0  ;;  %vm2320_vm8 = vmand %vm5688_vm7, %vm2304_vm6  ;;  %v5689_v21 = vld [vmem:[#allocation18_spill] sm:$0xff]  ;;  %vm2310_vm7 = vcmp.eq.s32.totalorder %v5612_v13, %v4825_v33 }
 0x23d   :  { %v2352_v1 = vsel %vm2320_vm8, %v4592_v19, 0.0  ;;  %vm5690_vm1 = vnez %v5689_v21  ;;  %vm2324_vm11 = vmand %vm5692_vm9, %vm2308_vm13 }
 0x23e   :  { %vm2322_vm5 = vmand %vm5690_vm1, %vm2306_vm12  ;;  %vm2312_vm12 = vcmp.eq.s32.totalorder %v5612_v13, %v4861_v12  ;;  %vm5695_vm1 = vcmask 7168  }
 0x23f   :  { %v2354_v27 = vsel %vm2322_vm5, %v4610_v15, 0.0  ;;  %v2433_v15 = vld [vmem:[#allocation5 + $0x18] sm:$0xff]  ;;  %vm5698_vm9 = vmmov %vm5695_vm1 }
 0x253   :  { %2388 = vadd.xlane.f32.xlu0 %v2361_v39  ;;  %v2356_v39 = vsel %vm2324_vm11, %v4628_v6, 0.0  ;;  %v5696_v6 = vld [vmem:[#allocation24_spill] sm:$0xff] }
 0x254   :  { %vm5697_vm5 = vnez %v5696_v6 }
 0x255   :  { %vm2328_vm13 = vmand %vm5697_vm5, %vm2312_vm12 }
 0x256   :  { %2282 = vmin.xlane.f32.xlu1 %v2281_v48  ;;  %v5693_v48 = vld [vmem:[#allocation22_spill] sm:$0xff]  ;;  %v2360_v29 = vsel %vm2328_vm13, %v4664_v63, 0.0  ;;  %vm5706_vm12 = vmmov %vm5695_vm1 }
 0x257   :  { %2392 = vadd.xlane.f32.xlu0 %v2363_v3  ;;  %vm5694_vm6 = vnez %v5693_v48 }
 0x258   :  { %vm2326_vm8 = vmand %vm5694_vm6, %vm2310_vm7 }
 0x259   :  { %v2358_v34 = vsel %vm2326_vm8, %v4646_v55, 0.0  ;;  %vm5701_vm6 = vmmov %vm5695_vm1 }
 0x25a   :  { %2366 = vadd.xlane.f32.xlu1 %v2350_v51 }
 0x25e   :  { %2370 = vadd.xlane.f32.xlu1 %v2352_v1  ;;  %v5699_v1 = vld [vmem:[#allocation26_spill] sm:$0xff] }
 0x25f   :  { %vm5700_vm11 = vnez %v5699_v1 }
 0x262   :  { %2374 = vadd.xlane.f32.xlu1 %v2354_v27 }
 0x266   :  { %2378 = vadd.xlane.f32.xlu1 %v2356_v39 }
 0x268   :  { %v2369_v19 = vpop.xlane.xlu0 %2368 }
 0x269   :  { %v2447_v3 = vsel %vm2415_vm14, %v2369_v19, %v2431_v14  ;;  %vm2314_vm14 = vcmp.eq.s32.totalorder %v5612_v13, %v4885_v58 }
 0x26a   :  { %2463 = vst.msk [vmem:[#allocation5 + $0x8] sm:$0xff] %vm5695_vm1, %v2447_v3  ;;  %2382 = vadd.xlane.f32.xlu1 %v2358_v34  ;;  %vm2330_vm7 = vmand %vm5700_vm11, %vm2314_vm14 }
 0x26b   :  { %v2362_v53 = vsel %vm2330_vm7, %v4682_v52, 0.0  ;;  %vm5708_vm14 = vmmov %vm5695_vm1 }
 0x26c   :  { %v2373_v51 = vpop.xlane.xlu0 %2372  ;;  %vm5712_vm11 = vmmov %vm5695_vm1 }
 0x26d   :  { %v2449_v26 = vsel %vm2417_vm15, %v2373_v51, %v2433_v15  ;;  %vm5702_vm15 = vmmov %vm5695_vm1 }
 0x26e   :  { %2465 = vst.msk [vmem:[#allocation5 + $0x18] sm:$0xff] %vm5698_vm9, %v2449_v26  ;;  %2386 = vadd.xlane.f32.xlu1 %v2360_v29 }
 0x270   :  { %v2377_v55 = vpop.xlane.xlu0 %2376 }
 0x271   :  { %v2451_v21 = vsel %vm2419_vm4, %v2377_v55, %v2435_v0  ;;  %vm5703_vm4 = vmmov %vm5695_vm1 }
 0x272   :  { %2467 = vst.msk [vmem:[#allocation5 + $0x28] sm:$0xff] %vm5701_vm6, %v2451_v21  ;;  %2390 = vadd.xlane.f32.xlu1 %v2362_v53  ;;  %vm5715_vm6 = vmmov %vm5695_vm1 }
 0x274   :  { %v2381_v27 = vpop.xlane.xlu0 %2380 }
 0x275   :  { %v2453_v63 = vsel %vm2421_vm2, %v2381_v27, %v2437_v5  ;;  %vm2317_vm2 = vcmp.eq.s32.totalorder %v5612_v13, %v5093_v10 }
 0x276   :  { %2469 = vst.msk [vmem:[#allocation5 + $0x38] sm:$0xff] %vm5702_vm15, %v2453_v63 }
 0x27b   :  { %v2385_v14 = vpop.xlane.xlu0 %2384 }
 0x27c   :  { %v2455_v57 = vsel %vm2423_vm10, %v2385_v14, %v2439_v16 }
 0x27d   :  { %2471 = vst.msk [vmem:[#allocation5 + $0x48] sm:$0xff] %vm5703_vm4, %v2455_v57  ;;  %vm5718_vm4 = vmmov %vm5695_vm1 }
 0x27e   :  { %v1813_v60 = vpop.permute.xlu1 %1812 }
 0x27f   :  { %v1886_v39 = vsub.f32 %v4589_v22, %v1813_v60 }
 0x281   :  { %v1903_v52 = vmul.f32 1.442695, %v1886_v39 }
 0x282   :  { %v1818_v25 = vpop.permute.xlu1 %1817 }
 0x283   :  { %v1808_v19 = vpop.permute.xlu0 %1807  ;;  %3444 = vpow2.f32 %v1903_v52  ;;  %v1887_v3 = vsub.f32 %v4598_v61, %v1818_v25 }
 0x284   :  { %v1885_v48 = vsub.f32 %v4580_v7, %v1808_v19 }
 0x285   :  { %v1905_v34 = vmul.f32 1.442695, %v1887_v3 }
 0x286   :  { %v1901_v31 = vmul.f32 1.442695, %v1885_v48 }
 0x287   :  { %v1823_v15 = vpop.permute.xlu0 %1822 }
 0x288   :  { %3446 = vpow2.f32 %v1901_v31  ;;  %v1888_v20 = vsub.f32 %v4607_v17, %v1823_v15 }
 0x289   :  { %3448 = vpow2.f32 %v1905_v34  ;;  %v1828_v51 = vpop.permute.xlu1 %1827 }
 0x28a   :  { %v1907_v38 = vmul.f32 1.442695, %v1888_v20  ;;  %v1889_v22 = vsub.f32 %v4616_v49, %v1828_v51 }
 0x28b   :  { %v1833_v26 = vpop.permute.xlu0 %1832 }
 0x28c   :  { %3450 = vpow2.f32 %v1907_v38  ;;  %v1909_v0 = vmul.f32 1.442695, %v1889_v22  ;;  %v1890_v7 = vsub.f32 %v4625_v24, %v1833_v26 }
 0x28d   :  { %v3445_v6 = vpop.eup %3444 }
 0x28e   :  { %1935 = vadd.xlane.f32.xlu1 %v3445_v6  ;;  %3452 = vpow2.f32 %v1909_v0  ;;  %v1911_v61 = vmul.f32 1.442695, %v1890_v7 }
 0x290   :  { %3454 = vpow2.f32 %v1911_v61 }
 0x291   :  { %v1838_v55 = vpop.permute.xlu1 %1837 }
 0x292   :  { %v3447_v29 = vpop.eup %3446  ;;  %v1891_v21 = vsub.f32 %v4634_v41, %v1838_v55 }
 0x293   :  { %1933 = vadd.xlane.f32.xlu0 %v3447_v29  ;;  %v3449_v1 = vpop.eup %3448  ;;  %v1843_v5 = vpop.permute.xlu0 %1842 }
 0x294   :  { %v1913_v49 = vmul.f32 1.442695, %v1891_v21  ;;  %v1892_v53 = vsub.f32 %v4643_v50, %v1843_v5  ;;  %v2285_v5 = vcvt.f32.s32 %v4722_v28 }
 0x296   :  { %v3451_v17 = vpop.eup %3450  ;;  %3456 = vpow2.f32 %v1913_v49  ;;  %v1915_v27 = vmul.f32 1.442695, %v1892_v53 }
 0x297   :  { %1937 = vadd.xlane.f32.xlu0 %v3449_v1  ;;  %1939 = vadd.xlane.f32.xlu1 %v3451_v17  ;;  %v5704_v17 = vld [vmem:[#allocation30_spill] sm:$0xff] }
 0x298   :  { %v3453_v63 = vpop.eup %3452  ;;  %3458 = vpow2.f32 %v1915_v27  ;;  %vm5705_vm10 = vnez %v5704_v17  ;;  %v2443_v27 = vld [vmem:[#allocation5 + $0x68] sm:$0xff] }
 0x299   :  { %v1848_v24 = vpop.permute.xlu1 %1847  ;;  %vm2333_vm8 = vmand %vm5705_vm10, %vm2317_vm2 }
 0x29a   :  { %v3455_v16 = vpop.eup %3454  ;;  %v1893_v14 = vsub.f32 %v4652_v11, %v1848_v24  ;;  %v2365_v21 = vsel %vm2333_vm8, %v4710_v18, 0.0  ;;  %v2286_v24 = vshll.u32 %v2285_v5, 16  ;;  %vm5721_vm10 = vmmov %vm5695_vm1  ;;  %v5741_v5 = vld [vmem:[#allocation40_spill] sm:$0xff] }
 0x29b   :  { %1941 = vadd.xlane.f32.xlu0 %v3453_v63  ;;  %1943 = vadd.xlane.f32.xlu1 %v3455_v16  ;;  %v1853_v57 = vpop.permute.xlu0 %1852 }
 0x29c   :  { %v1917_v60 = vmul.f32 1.442695, %v1893_v14  ;;  %v1894_v41 = vsub.f32 %v4661_v56, %v1853_v57  ;;  %v2430_v57 = vld [vmem:[#allocation5] sm:$0xff] }
 0x29e   :  { %3460 = vpow2.f32 %v1917_v60  ;;  %v1919_v39 = vmul.f32 1.442695, %v1894_v41  ;;  %v5200_v60 = vld [vmem:[#allocation6 + $0x70] sm:$0xff] }
 0x2a0   :  { %v3457_v52 = vpop.eup %3456  ;;  %3462 = vpow2.f32 %v1919_v39  ;;  %v5713_v39 = vld [vmem:[#allocation35_spill] sm:$0xff] }
 0x2a1   :  { %v1858_v19 = vpop.permute.xlu1 %1857  ;;  %1945 = vadd.xlane.f32.xlu0 %v3457_v52  ;;  %vm5714_vm7 = vcmp.lt.s32.totalorder %v4727_v44, %v5713_v39  ;;  %v2438_v44 = vld [vmem:[#allocation5 + $0x40] sm:$0xff] }
 0x2a2   :  { %v3459_v50 = vpop.eup %3458  ;;  %v1895_v48 = vsub.f32 %v4670_v4, %v1858_v19  ;;  %v2434_v19 = vld [vmem:[#allocation5 + $0x20] sm:$0xff] }
 0x2a3   :  { %1947 = vadd.xlane.f32.xlu1 %v3459_v50  ;;  %v1863_v25 = vpop.permute.xlu0 %1862 }
 0x2a4   :  { %v1921_v31 = vmul.f32 1.442695, %v1895_v48  ;;  %v1896_v3 = vsub.f32 %v4679_v42, %v1863_v25  ;;  %v5716_v48 = vld [vmem:[#allocation36_spill] sm:$0xff] }
 0x2a5   :  { %vm5717_vm15 = vcmp.lt.s32.totalorder %v4771_v23, %v5716_v48  ;;  %v2440_v23 = vld [vmem:[#allocation5 + $0x50] sm:$0xff]  ;;  %v5746_v48 = vld [vmem:[#allocation42_spill] sm:$0xff] }
 0x2a6   :  { %3464 = vpow2.f32 %v1921_v31  ;;  %v1923_v11 = vmul.f32 1.442695, %v1896_v3  ;;  %v2436_v31 = vld [vmem:[#allocation5 + $0x30] sm:$0xff] }
 0x2a8   :  { %v3461_v15 = vpop.eup %3460  ;;  %3466 = vpow2.f32 %v1923_v11  ;;  %v5719_v11 = vld [vmem:[#allocation32_spill] sm:$0xff] }
 0x2a9   :  { %v1868_v34 = vpop.permute.xlu1 %1867  ;;  %1949 = vadd.xlane.f32.xlu0 %v3461_v15  ;;  %vm5720_vm2 = vcmp.lt.s32.totalorder %v4796_v35, %v5719_v11  ;;  %v2442_v35 = vld [vmem:[#allocation5 + $0x60] sm:$0xff] }
 0x2aa   :  { %v3463_v56 = vpop.eup %3462  ;;  %v1897_v20 = vsub.f32 %v4688_v54, %v1868_v34 }
 0x2ab   :  { %1951 = vadd.xlane.f32.xlu1 %v3463_v56  ;;  %v1873_v38 = vpop.permute.xlu0 %1872  ;;  %v5722_v56 = vld [vmem:[#allocation37_spill] sm:$0xff] }
 0x2ac   :  { %v1925_v51 = vmul.f32 1.442695, %v1897_v20  ;;  %v1898_v22 = vsub.f32 %v4697_v46, %v1873_v38  ;;  %vm5723_vm8 = vcmp.lt.s32.totalorder %v4825_v33, %v5722_v56  ;;  %v5729_v33 = vld [vmem:[#allocation13_spill] sm:$0xff]  ;;  %v5750_v56 = vld [vmem:[#allocation43_spill] sm:$0xff] }
 0x2ae   :  { %3468 = vpow2.f32 %v1925_v51  ;;  %v1927_v4 = vmul.f32 1.442695, %v1898_v22 }
 0x2b0   :  { %v3465_v6 = vpop.eup %3464  ;;  %3470 = vpow2.f32 %v1927_v4 }
 0x2b1   :  { %v1878_v26 = vpop.permute.xlu1 %1877  ;;  %1953 = vadd.xlane.f32.xlu0 %v3465_v6  ;;  %v5730_v6 = vsub.f32 %v4935_v37, %v5729_v33 }
 0x2b2   :  { %v3467_v42 = vpop.eup %3466  ;;  %v1899_v0 = vsub.f32 %v4708_v45, %v1878_v26 }
 0x2b3   :  { %1955 = vadd.xlane.f32.xlu1 %v3467_v42  ;;  %v1883_v7 = vpop.permute.xlu0 %1882  ;;  %v1759_v26 = vmul.f32 1.442695, %v5730_v6 }
 0x2b4   :  { %v1929_v29 = vmul.f32 1.442695, %v1899_v0  ;;  %v1900_v61 = vsub.f32 %v4718_v62, %v1883_v7  ;;  %v2441_v62 = vld [vmem:[#allocation5 + $0x58] sm:$0xff]  ;;  %v5731_v0 = vld [vmem:[#allocation33_spill] sm:$0xff]  ;;  %v5732_v7 = vld [vmem:[#allocation38_spill] sm:$0xff] }
 0x2b6   :  { %3472 = vpow2.f32 %v1929_v29  ;;  %v1931_v54 = vmul.f32 1.442695, %v1900_v61  ;;  %v5734_v61 = vld [vmem:[#allocation16_spill] sm:$0xff] }
 0x2b8   :  { %v3469_v1 = vpop.eup %3468  ;;  %3474 = vpow2.f32 %v1931_v54  ;;  %v5735_v54 = vld [vmem:[#allocation19_spill] sm:$0xff] }
 0x2b9   :  { %1957 = vadd.xlane.f32.xlu0 %v3469_v1  ;;  %3476 = vpow2.f32 %v1759_v26  ;;  %v5736_v1 = vsub.f32 %v5734_v61, %v5735_v54  ;;  %v5757_v61 = vld [vmem:[#allocation48_spill] sm:$0xff] }
 0x2ba   :  { %v3471_v46 = vpop.eup %3470 }
 0x2bb   :  { %1959 = vadd.xlane.f32.xlu1 %v3471_v46  ;;  %v5737_v46 = vld [vmem:[#allocation17_spill] sm:$0xff] }
 0x2c0   :  { %v3473_v55 = vpop.eup %3472 }
 0x2c1   :  { %1961 = vadd.xlane.f32.xlu0 %v3473_v55  ;;  %v5738_v55 = vld [vmem:[#allocation21_spill] sm:$0xff] }
 0x2c2   :  { %v3475_v45 = vpop.eup %3474  ;;  %v5739_v17 = vsub.f32 %v5737_v46, %v5738_v55 }
 0x2c3   :  { %1963 = vadd.xlane.f32.xlu1 %v3475_v45 }
 0x2c4   :  { %v1763_v37 = vmul.f32 1.442695, %v5739_v17 }
 0x2c5   :  { %2396 = vadd.xlane.f32.xlu0 %v2365_v21 }
 0x2e0   :  { %v2389_v49 = vpop.xlane.xlu0 %2388 }
 0x2e1   :  { %v2457_v53 = vsel %vm2425_vm3, %v2389_v49, %v2441_v62  ;;  %vm5707_vm3 = vcmp.lt.s32.totalorder %v4731_v40, %v4729_v59  ;;  %v5711_v59 = vld [vmem:[#allocation34_spill] sm:$0xff]  ;;  %v5740_v62 = vld [vmem:[#allocation23_spill] sm:$0xff] }
 0x2e2   :  { %2473 = vst.msk [vmem:[#allocation5 + $0x58] sm:$0xff] %vm5706_vm12, %v2457_v53  ;;  %vm5724_vm12 = vmmov %vm5695_vm1  ;;  %v5742_v49 = vsub.f32 %v5740_v62, %v5741_v5 }
 0x2e3   :  { %v2283_v63 = vpop.xlane.xlu1 %2282 }
 0x2e4   :  { %v2284_v16 = vcvt.f32.s32 %v2283_v63  ;;  %v2393_v14 = vpop.xlane.xlu0 %2392  ;;  %v1765_v53 = vmul.f32 1.442695, %v5742_v49  ;;  %v3477_v63 = vpop.eup %3476 }
 0x2e5   :  { %v2459_v18 = vsel %vm2427_vm0, %v2393_v14, %v2443_v27  ;;  %vm5710_vm0 = vnez %v5709_v32  ;;  %v5744_v14 = vld [vmem:[#allocation41_spill] sm:$0xff] }
 0x2e6   :  { %v5202_v28 = vadd.s32 %v2286_v24, %v2284_v16  ;;  %2475 = vst.msk [vmem:[#allocation5 + $0x68] sm:$0xff] %vm5695_vm1, %v2459_v18  ;;  %vm5725_vm1 = vcmp.lt.s32.totalorder %v4861_v12, %v4870_v30  ;;  %v5733_v12 = vsub.f32 %v5731_v0, %v5732_v7  ;;  %v1726_v24 = vld [vmem:[#allocation4 + $0x8] sm:$0xff]  ;;  %v5743_v16 = vld [vmem:[#allocation39_spill] sm:$0xff] }
 0x2e7   :  { %v2367_v43 = vpop.xlane.xlu1 %2366  ;;  %v5745_v18 = vsub.f32 %v5743_v16, %v5744_v14 }
 0x2e8   :  { %v2446_v8 = vsel %vm5707_vm3, %v2367_v43, %v2430_v57  ;;  %vm2316_vm5 = vcmp.eq.s32.totalorder %v5612_v13, %v5202_v28  ;;  %vm2428_vm13 = vcmp.lt.s32.totalorder %v5202_v28, %v5200_v60  ;;  %vm5726_vm3 = vmmov %vm5718_vm4  ;;  %v1757_v30 = vmul.f32 1.442695, %v5733_v12  ;;  %v1729_v12 = vld [vmem:[#allocation4 + $0x20] sm:$0xff] }
 0x2e9   :  { %2462 = vst.msk [vmem:[#allocation5] sm:$0xff] %vm5708_vm14, %v2446_v8  ;;  %vm2332_vm9 = vmand %vm5710_vm0, %vm2316_vm5  ;;  %v2508_v41 = vsel %vm2428_vm13, %v5202_v28, %v5200_v60  ;;  %vm5727_vm5 = vcmp.lt.s32.totalorder %v4885_v58, %v4883_v36  ;;  %v1761_v36 = vmul.f32 1.442695, %v5736_v1  ;;  %v2609_v58 = vld [vmem:[#allocation3] sm:$0xff]  ;;  %v1767_v57 = vmul.f32 1.442695, %v5745_v18 }
 0x2ea   :  { %v2364_v40 = vsel %vm2332_vm9, %v5711_v59, 0.0  ;;  %2524 = vst.msk [vmem:[#allocation6 + $0x70] sm:$0xff] %vm5712_vm11, %v2508_v41  ;;  %vm5728_vm14 = vmmov %vm5726_vm3  ;;  %3478 = vpow2.f32 %v1757_v30  ;;  %v1790_v41 = vmul.f32 %v3477_v63, %v1726_v24  ;;  %v1725_v59 = vld [vmem:[#allocation4] sm:$0xff] }
 0x2eb   :  { %v2371_v13 = vpop.xlane.xlu1 %2370  ;;  %2394 = vadd.xlane.f32.xlu1 %v2364_v40  ;;  %3480 = vpow2.f32 %v1761_v36  ;;  %vm5749_vm0 = vmmov %vm5726_vm3  ;;  %v1730_v36 = vld [vmem:[#allocation4 + $0x28] sm:$0xff] }
 0x2ec   :  { %v2448_v52 = vsel %vm5714_vm7, %v2371_v13, %v2432_v47  ;;  %3482 = vpow2.f32 %v1763_v37  ;;  %vm5753_vm9 = vmmov %vm5749_vm0  ;;  %v5759_v37 = vld [vmem:[#allocation47_spill] sm:$0xff] }
 0x2ed   :  { %2464 = vst.msk [vmem:[#allocation5 + $0x10] sm:$0xff] %vm5715_vm6, %v2448_v52  ;;  %3484 = vpow2.f32 %v1765_v53  ;;  %vm5754_vm11 = vmmov %vm5749_vm0 }
 0x2ee   :  { %3486 = vpow2.f32 %v1767_v57  ;;  %vm5755_vm7 = vmmov %vm5749_vm0 }
 0x2ef   :  { %v2375_v50 = vpop.xlane.xlu1 %2374  ;;  %vm5762_vm6 = vmmov %vm5749_vm0 }
 0x2f0   :  { %v2450_v25 = vsel %vm5717_vm15, %v2375_v50, %v2434_v19  ;;  %v5249_v42 = vld [vmem:[#allocation5] sm:$0xff]  ;;  %vm5763_vm15 = vmmov %vm5749_vm0 }
 0x2f1   :  { %2466 = vst.msk [vmem:[#allocation5 + $0x20] sm:$0xff] %vm5718_vm4, %v2450_v25  ;;  %v2625_v29 = vmax.f32 %v5249_v42, 0.0  ;;  %v5747_v25 = vld [vmem:[#allocation44_spill] sm:$0xff]  ;;  %vm5770_vm4 = vmmov %vm5749_vm0 }
 0x2f3   :  { %v2379_v3 = vpop.xlane.xlu1 %2378  ;;  %v5261_v45 = vmax.f32 %v2609_v58, %v2625_v29  ;;  %v5756_v29 = vld [vmem:[#allocation46_spill] sm:$0xff] }
 0x2f4   :  { %v2452_v15 = vsel %vm5720_vm2, %v2379_v3, %v2436_v31  ;;  %v3479_v47 = vpop.eup %3478  ;;  %v5748_v31 = vsub.f32 %v5746_v48, %v5747_v25  ;;  %v5758_v54 = vsub.f32 %v5756_v29, %v5757_v61  ;;  %v5768_v48 = vld [vmem:[#allocation53_spill] sm:$0xff]  ;;  %vm5771_vm2 = vmmov %vm5749_vm0 }
 0x2f5   :  { %2468 = vst.msk [vmem:[#allocation5 + $0x30] sm:$0xff] %vm5721_vm10, %v2452_v15  ;;  %v2673_v21 = vsub.f32 %v2609_v58, %v5261_v45  ;;  %v2801_v27 = vsub.f32 0.0, %v5261_v45  ;;  %v2737_v43 = vsub.f32 %v5249_v42, %v5261_v45  ;;  %v3481_v52 = vpop.eup %3480  ;;  %v1789_v19 = vmul.f32 %v3479_v47, %v1725_v59  ;;  %v1727_v15 = vld [vmem:[#allocation4 + $0x10] sm:$0xff]  ;;  %v5764_v59 = vld [vmem:[#allocation50_spill] sm:$0xff]  ;;  %vm5778_vm10 = vmmov %vm5749_vm0 }
 0x2f6   :  { %v3483_v50 = vpop.eup %3482  ;;  %v1769_v3 = vmul.f32 1.442695, %v5748_v31  ;;  %v1773_v1 = vmul.f32 1.442695, %v5758_v54  ;;  %v1731_v47 = vld [vmem:[#allocation4 + $0x30] sm:$0xff] }
 0x2f7   :  { %v2383_v34 = vpop.xlane.xlu1 %2382  ;;  %v2689_v8 = vmul.f32 1.442695, %v2673_v21  ;;  %v2817_v32 = vmul.f32 1.442695, %v2801_v27  ;;  %v2753_v13 = vmul.f32 1.442695, %v2737_v43  ;;  %v3485_v7 = vpop.eup %3484 }
 0x2f8   :  { %v2454_v20 = vsel %vm5723_vm8, %v2383_v34, %v2438_v44  ;;  %v1728_v44 = vld [vmem:[#allocation4 + $0x18] sm:$0xff]  ;;  %v3487_v30 = vpop.eup %3486  ;;  %v1793_v55 = vmul.f32 %v3485_v7, %v1729_v12  ;;  %v5760_v21 = vld [vmem:[#allocation49_spill] sm:$0xff]  ;;  %vm5779_vm8 = vmmov %vm5749_vm0 }
 0x2f9   :  { %2470 = vst.msk [vmem:[#allocation5 + $0x40] sm:$0xff] %vm5724_vm12, %v2454_v20  ;;  %3488 = vpow2.f32 %v2689_v8  ;;  %v5751_v20 = vld [vmem:[#allocation45_spill] sm:$0xff]  ;;  %v5761_v62 = vsub.f32 %v5759_v37, %v5760_v21  ;;  %v1794_v24 = vmul.f32 %v3487_v30, %v1730_v36  ;;  %v5780_v37 = vld [vmem:[#allocation58_spill] sm:$0xff]  ;;  %vm5784_vm12 = vmmov %vm5749_vm0 }
 0x2fa   :  { %3490 = vpow2.f32 %v2817_v32  ;;  %v5781_v21 = vsub.f32 %v5780_v37, %v5076_v2 }
 0x2fb   :  { %v2387_v38 = vpop.xlane.xlu1 %2386  ;;  %3492 = vpow2.f32 %v2753_v13  ;;  %v1775_v5 = vmul.f32 1.442695, %v5761_v62 }
 0x2fc   :  { %v2456_v51 = vsel %vm5725_vm1, %v2387_v38, %v2440_v23  ;;  %v5752_v23 = vsub.f32 %v5750_v56, %v5751_v20  ;;  %3494 = vpow2.f32 %v1769_v3  ;;  %v1733_v20 = vld [vmem:[#allocation4 + $0x40] sm:$0xff]  ;;  %v1785_v62 = vmul.f32 1.442695, %v5781_v21  ;;  %vm5785_vm1 = vmmov %vm5749_vm0 }
 0x2fd   :  { %2472 = vst.msk [vmem:[#allocation5 + $0x50] sm:$0xff] %vm5726_vm3, %v2456_v51  ;;  %v2545_v51 = vld [vmem:[%s5340_s4] sm:$0xff]  ;;  %vm5786_vm3 = vmmov %vm5749_vm0 }
 0x2fe   :  { %v1771_v38 = vmul.f32 1.442695, %v5752_v23  ;;  %v2561_v6 = vcvt.s32.f32 %v2545_v51  ;;  %v5773_v51 = vld [vmem:[#allocation56_spill] sm:$0xff] }
 0x2ff   :  { %v2391_v22 = vpop.xlane.xlu1 %2390 }
 0x300   :  { %v2458_v4 = vsel %vm5727_vm5, %v2391_v22, %v2442_v35  ;;  %v1791_v35 = vmul.f32 %v3481_v52, %v1727_v15  ;;  %v1792_v22 = vmul.f32 %v3483_v50, %v1728_v44  ;;  %3496 = vpow2.f32 %v1771_v38  ;;  %v1732_v52 = vld [vmem:[#allocation4 + $0x38] sm:$0xff]  ;;  %v5767_v50 = vld [vmem:[#allocation51_spill] sm:$0xff]  ;;  %v5772_v38 = vld [vmem:[#allocation54_spill] sm:$0xff] }
 0x301   :  { %2474 = vst.msk [vmem:[#allocation5 + $0x60] sm:$0xff] %vm5728_vm14, %v2458_v4  ;;  %v2577_v46 = vadd.f32 6.0, %v2561_v6  ;;  %3498 = vpow2.f32 %v1773_v1  ;;  %v5769_v25 = vsub.f32 %v5767_v50, %v5768_v48  ;;  %v5775_v6 = vld [vmem:[#allocation55_spill] sm:$0xff]  ;;  %vm5787_vm5 = vmmov %vm5749_vm0 }
 0x302   :  { %3500 = vpow2.f32 %v1775_v5  ;;  %vm5788_vm14 = vmmov %vm5749_vm0 }
 0x303   :  { %v3489_v58 = vpop.eup %3488  ;;  %v1779_v31 = vmul.f32 1.442695, %v5769_v25 }
 0x304   :  { %v3491_v17 = vpop.eup %3490 }
 0x305   :  { %v3493_v16 = vpop.eup %3492  ;;  %v2849_v57 = vmul.f32 %v3491_v17, %v2577_v46 }
 0x306   :  { %v3495_v8 = vpop.eup %3494 }
 0x31b   :  { %v1936_v40 = vpop.xlane.xlu1 %1935 }
 0x31c   :  { %v1966_v39 = vadd.f32 %v1936_v40, %v1790_v41  ;;  %v3497_v41 = vpop.eup %3496  ;;  %v5765_v40 = vld [vmem:[#allocation52_spill] sm:$0xff] }
 0x31d   :  { %v5766_v13 = vsub.f32 %v5764_v59, %v5765_v40  ;;  %v1796_v15 = vmul.f32 %v3497_v41, %v1732_v52  ;;  %v3499_v56 = vpop.eup %3498 }
 0x31e   :  { %1983 = vst.msk [vmem:[#allocation4 + $0x8] sm:$0xff] %vm5749_vm0, %v1966_v39  ;;  %v3501_v23 = vpop.eup %3500 }
 0x31f   :  { %v1777_v39 = vmul.f32 1.442695, %v5766_v13 }
 0x320   :  { %v1934_v11 = vpop.xlane.xlu0 %1933 }
 0x321   :  { %v1965_v34 = vadd.f32 %v1934_v11, %v1789_v19  ;;  %v1795_v19 = vmul.f32 %v3495_v8, %v1731_v47 }
 0x323   :  { %1982 = vst.msk [vmem:[#allocation4] sm:$0xff] %vm5753_vm9, %v1965_v34  ;;  %vm5789_vm9 = vmmov %vm5749_vm0 }
 0x324   :  { %v1938_v4 = vpop.xlane.xlu0 %1937  ;;  %v1940_v33 = vpop.xlane.xlu1 %1939 }
 0x325   :  { %v1967_v26 = vadd.f32 %v1938_v4, %v1791_v35  ;;  %v1968_v0 = vadd.f32 %v1940_v33, %v1792_v22  ;;  %v5774_v35 = vsub.f32 %v5772_v38, %v5773_v51  ;;  %v1734_v4 = vld [vmem:[#allocation4 + $0x48] sm:$0xff]  ;;  %v1797_v33 = vmul.f32 %v3499_v56, %v1733_v20  ;;  %v2444_v20 = vld [vmem:[#allocation5 + $0x70] sm:$0xff] }
 0x326   :  { %v1798_v61 = vmul.f32 %v3501_v23, %v1734_v4 }
 0x327   :  { %1984 = vst.msk [vmem:[#allocation4 + $0x10] sm:$0xff] %vm5754_vm11, %v1967_v26  ;;  %v1781_v22 = vmul.f32 1.442695, %v5774_v35  ;;  %v5776_v26 = vld [vmem:[#allocation57_spill] sm:$0xff] }
 0x328   :  { %1985 = vst.msk [vmem:[#allocation4 + $0x18] sm:$0xff] %vm5755_vm7, %v1968_v0  ;;  %v1942_v53 = vpop.xlane.xlu0 %1941  ;;  %v1944_v14 = vpop.xlane.xlu1 %1943  ;;  %v5777_v0 = vsub.f32 %v5775_v6, %v5776_v26  ;;  %vm5792_vm7 = vmmov %vm5749_vm0 }
 0x329   :  { %v1969_v63 = vadd.f32 %v1942_v53, %v1793_v55  ;;  %v1970_v43 = vadd.f32 %v1944_v14, %v1794_v24  ;;  %v1735_v55 = vld [vmem:[#allocation4 + $0x50] sm:$0xff] }
 0x32a   :  { %v2657_v49 = vld [vmem:[#allocation4] sm:$0xff]  ;;  %v1783_v7 = vmul.f32 1.442695, %v5777_v0 }
 0x32b   :  { %v2721_v27 = vmul.f32 %v3489_v58, %v2657_v49  ;;  %1986 = vst.msk [vmem:[#allocation4 + $0x20] sm:$0xff] %vm5762_vm6, %v1969_v63  ;;  %v1736_v49 = vld [vmem:[#allocation4 + $0x58] sm:$0xff]  ;;  %vm5793_vm6 = vmmov %vm5749_vm0 }
 0x32c   :  { %1987 = vst.msk [vmem:[#allocation4 + $0x28] sm:$0xff] %vm5763_vm15, %v1970_v43  ;;  %v1738_v43 = vld [vmem:[#allocation4 + $0x68] sm:$0xff] }
 0x32d   :  { %v2785_v18 = vadd.f32 %v3493_v16, %v2721_v27  ;;  %v5782_v27 = vld [vmem:[#allocation59_spill] sm:$0xff] }
 0x32e   :  { %v1946_v3 = vpop.xlane.xlu0 %1945  ;;  %v5783_v63 = vsub.f32 %v5072_v9, %v5782_v27 }
 0x32f   :  { %v2865_v32 = vadd.f32 %v2849_v57, %v2785_v18  ;;  %v1971_v11 = vadd.f32 %v1946_v3, %v1795_v19  ;;  %v1737_v57 = vld [vmem:[#allocation4 + $0x60] sm:$0xff]  ;;  %v1740_v19 = vld [vmem:[#allocation4 + $0x78] sm:$0xff] }
 0x330   :  { %v1948_v44 = vpop.xlane.xlu1 %1947  ;;  %v1787_v24 = vmul.f32 1.442695, %v5783_v63 }
 0x331   :  { %3502 = vlog2.f32 %v2865_v32  ;;  %1988 = vst.msk [vmem:[#allocation4 + $0x30] sm:$0xff] %vm5770_vm4, %v1971_v11  ;;  %v1972_v34 = vadd.f32 %v1948_v44, %v1796_v15  ;;  %v2445_v11 = vld [vmem:[#allocation5 + $0x78] sm:$0xff] }
 0x332   :  { %3504 = vpow2.f32 %v1777_v39  ;;  %v1739_v39 = vld [vmem:[#allocation4 + $0x70] sm:$0xff] }
 0x333   :  { %3506 = vpow2.f32 %v1779_v31  ;;  %1989 = vst.msk [vmem:[#allocation4 + $0x38] sm:$0xff] %vm5771_vm2, %v1972_v34  ;;  %v5790_v34 = vld [vmem:[#allocation60_spill] sm:$0xff] }
 0x334   :  { %3508 = vpow2.f32 %v1781_v22  ;;  %vm5791_vm11 = vcmp.lt.s32.totalorder %v5093_v10, %v5790_v34 }
 0x335   :  { %3510 = vpow2.f32 %v1783_v7 }
 0x336   :  { %v1950_v12 = vpop.xlane.xlu0 %1949  ;;  %3512 = vpow2.f32 %v1785_v62 }
 0x337   :  { %v1973_v29 = vadd.f32 %v1950_v12, %v1797_v33  ;;  %3514 = vpow2.f32 %v1787_v24 }
 0x338   :  { %v1952_v1 = vpop.xlane.xlu1 %1951 }
 0x339   :  { %1990 = vst.msk [vmem:[#allocation4 + $0x40] sm:$0xff] %vm5778_vm10, %v1973_v29  ;;  %v1974_v36 = vadd.f32 %v1952_v1, %v1798_v61 }
 0x33b   :  { %v3503_v30 = vpop.eup %3502  ;;  %1991 = vst.msk [vmem:[#allocation4 + $0x48] sm:$0xff] %vm5779_vm8, %v1974_v36 }
 0x33c   :  { %v2882_v54 = vmul.f32 0.6931472, %v3503_v30  ;;  %v3505_v58 = vpop.eup %3504 }
 0x33d   :  { %v3507_v17 = vpop.eup %3506  ;;  %v1799_v53 = vmul.f32 %v3505_v58, %v1735_v55 }
 0x33e   :  { %v2913_v46 = vadd.f32 %v2882_v54, %v5261_v45  ;;  %v1954_v45 = vpop.xlane.xlu0 %1953  ;;  %v1800_v14 = vmul.f32 %v3507_v17, %v1736_v49 }
 0x33f   :  { %v1975_v16 = vadd.f32 %v1954_v45, %v1799_v53 }
 0x340   :  { %v2929_v5 = vsub.f32 %v2913_v46, %v5249_v42  ;;  %v1956_v18 = vpop.xlane.xlu1 %1955  ;;  %v3509_v42 = vpop.eup %3508 }
 0x341   :  { %1992 = vst.msk [vmem:[#allocation4 + $0x50] sm:$0xff] %vm5785_vm1, %v1975_v16  ;;  %v1976_v2 = vadd.f32 %v1956_v18, %v1800_v14  ;;  %v3511_v9 = vpop.eup %3510  ;;  %v1801_v8 = vmul.f32 %v3509_v42, %v1737_v57 }
 0x342   :  { %2961 = vst.msk [vmem:[%s5341_s5] sm:$0xff] %vm5784_vm12, %v2929_v5  ;;  %v1802_v41 = vmul.f32 %v3511_v9, %v1738_v43  ;;  %v3513_v13 = vpop.eup %3512 }
 0x343   :  { %1993 = vst.msk [vmem:[#allocation4 + $0x58] sm:$0xff] %vm5786_vm3, %v1976_v2  ;;  %v3515_v52 = vpop.eup %3514  ;;  %v1803_v50 = vmul.f32 %v3513_v13, %v1739_v39 }
 0x344   :  { %v1804_v31 = vmul.f32 %v3515_v52, %v1740_v19 }
 0x346   :  { %v1958_v47 = vpop.xlane.xlu0 %1957 }
 0x347   :  { %v1977_v32 = vadd.f32 %v1958_v47, %v1801_v8 }
 0x348   :  { %v1960_v59 = vpop.xlane.xlu1 %1959 }
 0x349   :  { %1994 = vst.msk [vmem:[#allocation4 + $0x60] sm:$0xff] %vm5787_vm5, %v1977_v32  ;;  %v1978_v40 = vadd.f32 %v1960_v59, %v1802_v41 }
 0x34b   :  { %1995 = vst.msk [vmem:[#allocation4 + $0x68] sm:$0xff] %vm5788_vm14, %v1978_v40 }
 0x34e   :  { %v1962_v48 = vpop.xlane.xlu0 %1961 }
 0x34f   :  { %v1979_v25 = vadd.f32 %v1962_v48, %v1803_v50 }
 0x350   :  { %v1964_v3 = vpop.xlane.xlu1 %1963 }
 0x351   :  { %1996 = vst.msk [vmem:[#allocation4 + $0x70] sm:$0xff] %vm5749_vm0, %v1979_v25  ;;  %v1980_v15 = vadd.f32 %v1964_v3, %v1804_v31 }
 0x352   :  { %v2397_v44 = vpop.xlane.xlu0 %2396 }
 0x353   :  { %1997 = vst.msk [vmem:[#allocation4 + $0x78] sm:$0xff] %vm5789_vm9, %v1980_v15  ;;  %v2461_v56 = vsel %vm5791_vm11, %v2397_v44, %v2445_v11 }
 0x354   :  { %2477 = vst.msk [vmem:[#allocation5 + $0x78] sm:$0xff] %vm5792_vm7, %v2461_v56 }
 0x378   :  { %v2395_v23 = vpop.xlane.xlu1 %2394 }
 0x379   :  { %v2460_v38 = vsel %vm2428_vm13, %v2395_v23, %v2444_v20 }
 0x37a   :  { %2476 = vst.msk [vmem:[#allocation5 + $0x70] sm:$0xff] %vm5793_vm6, %v2460_v38 }
 0x37b   :  { %2981 = vsyncpa [#allocation8], 1 }
 0x37c   :  { %2982 = vsyncpa [#allocation10], 1 }

</bundles_post_ra>
